<compile_context>
chip_gen: v6e
topology: v6e:2x2x1
jax: 0.10.0
libtpu: 0.0.40
codegen_flags: <defaults>
</compile_context>

<pallas_src>
import functools

import jax
import jax.numpy as jnp
from jax.experimental import pallas as pl
from jax.experimental.pallas import tpu as pltpu

_EPS = 1e-5
_STRIP = 128        # in-kernel M strip (multiple of 8; keeps live vregs small)
_TM_MAX = 1024      # M tile for the multi-tile path (multiple of _STRIP)


def _round_up(x, m):
    return (x + m - 1) // m * m


@functools.lru_cache(maxsize=None)
def _vmem_limit_bytes():
    """Scoped-VMEM budget: ~3/4 of physical VMEM, capped at 100 MiB."""
    cap = 64 * 1024 * 1024
    try:
        cap = int(pltpu.get_tpu_info().vmem_capacity_bytes)
    except Exception:  # conservative fallback if the query is unavailable
        pass
    return int(min(cap * 3 // 4, 100 * 1024 * 1024))


# ------------------------------ Pallas kernels ------------------------------ #

def _fused_conv_bn_act_kernel(a_ref, w_ref, g_ref, b_ref, o_ref, y_ref, *,
                              m_true, relu, sigmoid, eps):
    """Single-tile layer: y = A @ W, BatchNorm(train) over all rows, activation.

    a_ref: (Mp, Kp) bf16 im2col patches (zero-padded rows/cols)
    w_ref: (Kp, Cp) bf16 weights
    g_ref, b_ref: (1, Cp) f32 gamma / beta
    o_ref: (Mp, Cp) output (bf16 intermediate layers, f32 final layer)
    y_ref: (Mp, Cp) f32 VMEM scratch holding the raw conv output
    """
    mp, cp = o_ref.shape
    n_strips = mp // _STRIP

    # Pass A: strip-wise MXU matmul into the VMEM scratch + running column
    # sums (padded rows/cols are zero, so they do not perturb the stats).
    s = jnp.zeros((1, cp), jnp.float32)
    s2 = jnp.zeros((1, cp), jnp.float32)
    for i in range(n_strips):
        sl = slice(i * _STRIP, (i + 1) * _STRIP)
        y = jnp.dot(a_ref[sl, :], w_ref[...], preferred_element_type=jnp.float32)
        y_ref[sl, :] = y
        s = s + jnp.sum(y, axis=0, keepdims=True)
        s2 = s2 + jnp.sum(y * y, axis=0, keepdims=True)

    inv_m = 1.0 / m_true
    mean = s * inv_m
    var = jnp.maximum(s2 * inv_m - mean * mean, 0.0)
    scale = g_ref[...] * jax.lax.rsqrt(var + eps)
    shift = b_ref[...] - mean * scale

    # Pass B: strip-wise FMA + activation, bf16/f32 store.
    for i in range(n_strips):
        sl = slice(i * _STRIP, (i + 1) * _STRIP)
        out = y_ref[sl, :] * scale + shift
        if relu:
            out = jnp.maximum(out, 0.0)
        if sigmoid:
            out = 1.0 / (1.0 + jnp.exp(-out))
        o_ref[sl, :] = out.astype(o_ref.dtype)


def _conv_stats_kernel(a_ref, w_ref, s_ref, s2_ref):
    """Tiled pass 1: per-M-tile column sum / sumsq of y = A @ W (y not stored).

    s_ref / s2_ref: (8, Cp) f32 per-tile blocks, the sums replicated to 8 rows
    so the output block stays sublane-aligned.
    """
    tm = a_ref.shape[0]
    cp = s_ref.shape[1]
    n_strips = tm // _STRIP

    s = jnp.zeros((1, cp), jnp.float32)
    s2 = jnp.zeros((1, cp), jnp.float32)
    for i in range(n_strips):
        sl = slice(i * _STRIP, (i + 1) * _STRIP)
        y = jnp.dot(a_ref[sl, :], w_ref[...], preferred_element_type=jnp.float32)
        s = s + jnp.sum(y, axis=0, keepdims=True)
        s2 = s2 + jnp.sum(y * y, axis=0, keepdims=True)
    s_ref[...] = jnp.broadcast_to(s, (8, cp))
    s2_ref[...] = jnp.broadcast_to(s2, (8, cp))


def _conv_bn_apply_kernel(a_ref, w_ref, s_ref, s2_ref, g_ref, b_ref, o_ref, *,
                          m_true, relu, sigmoid, eps):
    """Tiled pass 2: recompute the matmul and fuse stats fold + BN + activation.

    s_ref / s2_ref: (n_tiles*8, Cp) f32 partials from pass 1 (whole array,
    constant index map).  The fold is recomputed per tile: it is a few hundred
    VPU cycles and keeps the grid axis megacore-safe ("parallel").
    """
    tm = a_ref.shape[0]
    n_strips = tm // _STRIP

    inv_m = 1.0 / m_true
    total = jnp.sum(s_ref[...], axis=0, keepdims=True) * 0.125    # /8 replicas
    total2 = jnp.sum(s2_ref[...], axis=0, keepdims=True) * 0.125
    mean = total * inv_m
    var = jnp.maximum(total2 * inv_m - mean * mean, 0.0)
    scale = g_ref[...] * jax.lax.rsqrt(var + eps)
    shift = b_ref[...] - mean * scale

    for i in range(n_strips):
        sl = slice(i * _STRIP, (i + 1) * _STRIP)
        y = jnp.dot(a_ref[sl, :], w_ref[...], preferred_element_type=jnp.float32)
        out = y * scale + shift
        if relu:
            out = jnp.maximum(out, 0.0)
        if sigmoid:
            out = 1.0 / (1.0 + jnp.exp(-out))
        o_ref[sl, :] = out.astype(o_ref.dtype)


# ------------------------------ pallas_call glue ----------------------------- #

def _fused_conv_bn_act(patches, w_mat, g, b, *, m_true, relu, sigmoid, out_dtype):
    m_pad, k_pad = patches.shape
    c_pad = w_mat.shape[1]
    kernel = functools.partial(_fused_conv_bn_act_kernel, m_true=float(m_true),
                               relu=relu, sigmoid=sigmoid, eps=_EPS)
    return pl.pallas_call(
        kernel,
        out_shape=jax.ShapeDtypeStruct((m_pad, c_pad), out_dtype),
        in_specs=[pl.BlockSpec((m_pad, k_pad), lambda: (0, 0)),
                  pl.BlockSpec((k_pad, c_pad), lambda: (0, 0)),
                  pl.BlockSpec((1, c_pad), lambda: (0, 0)),
                  pl.BlockSpec((1, c_pad), lambda: (0, 0))],
        out_specs=pl.BlockSpec((m_pad, c_pad), lambda: (0, 0)),
        scratch_shapes=[pltpu.VMEM((m_pad, c_pad), jnp.float32)],
        compiler_params=pltpu.CompilerParams(vmem_limit_bytes=_vmem_limit_bytes()),
    )(patches, w_mat, g, b)


def _tiled_conv_bn_act(patches, w_mat, g, b, *, m_true, tm, relu, sigmoid,
                       out_dtype):
    m_pad, k_pad = patches.shape
    c_pad = w_mat.shape[1]
    n_tiles = m_pad // tm
    cparams = pltpu.CompilerParams(
        dimension_semantics=("parallel",),       # megacore-shard M tiles (v7x)
        vmem_limit_bytes=_vmem_limit_bytes())

    # Pass 1: stats only -- raw y never round-trips through HBM.
    s, s2 = pl.pallas_call(
        _conv_stats_kernel,
        out_shape=(jax.ShapeDtypeStruct((n_tiles * 8, c_pad), jnp.float32),
                   jax.ShapeDtypeStruct((n_tiles * 8, c_pad), jnp.float32)),
        grid=(n_tiles,),
        in_specs=[pl.BlockSpec((tm, k_pad), lambda i: (i, 0)),
                  pl.BlockSpec((k_pad, c_pad), lambda i: (0, 0))],
        out_specs=(pl.BlockSpec((8, c_pad), lambda i: (i, 0)),
                   pl.BlockSpec((8, c_pad), lambda i: (i, 0))),
        compiler_params=cparams,
    )(patches, w_mat)

    # Pass 2: redo the (memory-bound) matmul fused with the in-kernel stats
    # fold + BN apply + activation.  No XLA glue between the two calls.
    kernel = functools.partial(_conv_bn_apply_kernel, m_true=float(m_true),
                               relu=relu, sigmoid=sigmoid, eps=_EPS)
    out = pl.pallas_call(
        kernel,
        out_shape=jax.ShapeDtypeStruct((m_pad, c_pad), out_dtype),
        grid=(n_tiles,),
        in_specs=[pl.BlockSpec((tm, k_pad), lambda i: (i, 0)),
                  pl.BlockSpec((k_pad, c_pad), lambda i: (0, 0)),
                  pl.BlockSpec((n_tiles * 8, c_pad), lambda i: (0, 0)),
                  pl.BlockSpec((n_tiles * 8, c_pad), lambda i: (0, 0)),
                  pl.BlockSpec((1, c_pad), lambda i: (0, 0)),
                  pl.BlockSpec((1, c_pad), lambda i: (0, 0))],
        out_specs=pl.BlockSpec((tm, c_pad), lambda i: (i, 0)),
        compiler_params=cparams,
    )(patches, w_mat, s, s2, g, b)
    return out


# --------------------------------- Layer glue -------------------------------- #

def _im2col_nhwc(x, kh, kw, stride, pad):
    """x: (N, H, W, C) -> patches (N*Ho*Wo, kh*kw*C), Ho, Wo. Column order (kh, kw, C)."""
    n, h, w, c = x.shape
    xp = jnp.pad(x, ((0, 0), (pad, pad), (pad, pad), (0, 0)))
    ho = (h + 2 * pad - kh) // stride + 1
    wo = (w + 2 * pad - kw) // stride + 1
    cols = []
    for i in range(kh):
        for j in range(kw):
            cols.append(xp[:, i:i + stride * ho:stride, j:j + stride * wo:stride, :])
    p = jnp.concatenate(cols, axis=-1)                 # (N, Ho, Wo, kh*kw*C)
    return p.reshape(n * ho * wo, kh * kw * c), ho, wo


def _conv_bn_act_layer(x_nhwc, weight, gamma, beta, *, relu, sigmoid, out_dtype):
    """conv(k=4, s=2, p=1, bias=False) + BatchNorm(train) + activation.

    x_nhwc is bf16 (activations stay bf16 between layers), output is
    `out_dtype` (bf16 for intermediate layers, f32 for the final sigmoid).
    """
    n = x_nhwc.shape[0]
    c_out = weight.shape[0]
    patches, ho, wo = _im2col_nhwc(x_nhwc, 4, 4, 2, 1)     # bf16 in/out
    m, k = patches.shape

    # weight (Cout, Cin, kh, kw) -> (kh, kw, Cin, Cout) -> (K, Cout): matches
    # the im2col column order.
    w_mat = jnp.transpose(weight, (2, 3, 1, 0)).reshape(k, c_out)

    # Pad to hardware-friendly shapes (lane-dense loads/stores, full MXU cols).
    k_pad = _round_up(k, 128)
    c_pad = _round_up(c_out, 128)
    if m <= _TM_MAX:
        m_pad = _round_up(m, _STRIP)       # single fused tile
        tm = m_pad
        n_tiles = 1
    else:
        tm = _TM_MAX
        m_pad = _round_up(m, tm)
        n_tiles = m_pad // tm

    patches_p = jnp.pad(patches, ((0, m_pad - m), (0, k_pad - k)))   # bf16
    w_p = jnp.pad(w_mat, ((0, k_pad - k), (0, c_pad - c_out))).astype(jnp.bfloat16)
    g_p = jnp.pad(gamma.astype(jnp.float32), (0, c_pad - c_out),
                  constant_values=1.0).reshape(1, c_pad)
    b_p = jnp.pad(beta.astype(jnp.float32), (0, c_pad - c_out)).reshape(1, c_pad)

    if n_tiles == 1:
        out = _fused_conv_bn_act(patches_p, w_p, g_p, b_p, m_true=m,
                                 relu=relu, sigmoid=sigmoid, out_dtype=out_dtype)
    else:
        out = _tiled_conv_bn_act(patches_p, w_p, g_p, b_p, m_true=m, tm=tm,
                                 relu=relu, sigmoid=sigmoid, out_dtype=out_dtype)

    return out[:m, :c_out].reshape(n, ho, wo, c_out)   # stays NHWC


def dc_discriminator_forward(x_nchw, params):
    # NCHW -> NHWC once, cast to bf16 once; activations stay bf16 between
    # layers (halves im2col + inter-layer HBM traffic; accumulation is f32).
    x = jnp.transpose(x_nchw, (0, 2, 3, 1)).astype(jnp.bfloat16)
    x = _conv_bn_act_layer(x, *params["conv1"], relu=True, sigmoid=False,
                           out_dtype=jnp.bfloat16)
    x = _conv_bn_act_layer(x, *params["conv2"], relu=True, sigmoid=False,
                           out_dtype=jnp.bfloat16)
    x = _conv_bn_act_layer(x, *params["conv3"], relu=True, sigmoid=False,
                           out_dtype=jnp.bfloat16)
    x = _conv_bn_act_layer(x, *params["conv4"], relu=False, sigmoid=True,
                           out_dtype=jnp.float32)
    out = jnp.transpose(x, (0, 3, 1, 2))               # NHWC -> NCHW once
    return jnp.squeeze(out)


def init_params(key, num_channels, conv_dim):
    dims = [
        (num_channels, conv_dim),
        (conv_dim, conv_dim * 2),
        (conv_dim * 2, conv_dim * 4),
        (conv_dim * 4, conv_dim * 8),
    ]
    params = {}
    for idx, (cin, cout) in enumerate(dims, start=1):
        key, sub = jax.random.split(key)
        w = jax.random.normal(sub, (cout, cin, 4, 4), jnp.float32) * 0.05
        gamma = jnp.ones((cout,), jnp.float32)          # BatchNorm2d default init
        beta = jnp.zeros((cout,), jnp.float32)
        params[f"conv{idx}"] = (w, gamma, beta)
    return params


# ----------------------------- Pure-JAX reference ---------------------------- #

def _reference_forward(x, params, eps=_EPS):
    def layer(x, w, g, b, relu, sigmoid):
        y = jax.lax.conv_general_dilated(
            x, w, window_strides=(2, 2), padding=((1, 1), (1, 1)),
            dimension_numbers=("NCHW", "OIHW", "NCHW"))
        mean = jnp.mean(y, axis=(0, 2, 3), keepdims=True)
        var = jnp.mean(jnp.square(y - mean), axis=(0, 2, 3), keepdims=True)
        y = (y - mean) * jax.lax.rsqrt(var + eps)
        y = y * g[None, :, None, None] + b[None, :, None, None]
        if relu:
            y = jnp.maximum(y, 0.0)
        if sigmoid:
            y = jax.nn.sigmoid(y)
        return y

    out = layer(x, *params["conv1"], True, False)
    out = layer(out, *params["conv2"], True, False)
    out = layer(out, *params["conv3"], True, False)
    out = layer(out, *params["conv4"], False, True)
    return jnp.squeeze(out)


# ------------------------------------ Main ----------------------------------- #

if __name__ == "__main__":
    key = jax.random.PRNGKey(0)
    k_x, k_x2, k_p = jax.random.split(key, 3)

    # Shapes consistent with the module (opts.image_size=32, NCHW, 3 channels);
    # conv_dim kept small for the test.
    num_channels, spatial, conv_dim = 3, 32, 8
    params = init_params(k_p, num_channels, conv_dim)
    fwd = jax.jit(dc_discriminator_forward)

    # Tolerance note: bf16 activations between layers + bf16 MXU inputs (f32
    # accumulation / BN stats); acceptable for a GAN discriminator.
    tol = 4e-2

    # batch=2: every layer fits a single M tile -> fused single-kernel path.
    x_small = jax.random.normal(k_x, (2, num_channels, spatial, spatial),
                                jnp.float32)
    out_small = jax.block_until_ready(fwd(x_small, params))
    assert out_small.shape == (2, conv_dim * 8, 2, 2), out_small.shape
    ref_small = jax.block_until_ready(_reference_forward(x_small, params))
    err_small = float(jnp.max(jnp.abs(out_small - ref_small)))
    assert jnp.allclose(out_small, ref_small, atol=tol, rtol=tol), err_small

    # batch=16 (opts.batch_size): conv1 has M=4096 -> exercises the tiled
    # two-pass (stats + fused apply) path with 4 M tiles.
    x_big = jax.random.normal(k_x2, (16, num_channels, spatial, spatial),
                              jnp.float32)
    out_big = jax.block_until_ready(fwd(x_big, params))
    assert out_big.shape == (16, conv_dim * 8, 2, 2), out_big.shape
    ref_big = jax.block_until_ready(_reference_forward(x_big, params))
    err_big = float(jnp.max(jnp.abs(out_big - ref_big)))
    assert jnp.allclose(out_big, ref_big, atol=tol, rtol=tol), err_big

    print("KERNEL_OK")
</pallas_src>

<mosaic_0001>
module attributes {stable_mosaic.version = 11 : i64} {
  func.func @_fused_conv_bn_act_kernel(%arg0: memref<512x128xbf16, #tpu.memory_space<vmem>>, %arg1: memref<128x128xbf16, #tpu.memory_space<vmem>>, %arg2: memref<1x128xf32, #tpu.memory_space<vmem>>, %arg3: memref<1x128xf32, #tpu.memory_space<vmem>>, %arg4: memref<512x128xbf16, #tpu.memory_space<vmem>>, %arg5: memref<512x128xf32, #tpu.memory_space<vmem>>) attributes {dimension_semantics = [], scalar_prefetch = 0 : i64, scratch_operands = 1 : i64, tpu.core_type = #tpu.core_type<tc>} {
    %cst = arith.constant 0.000000e+00 : f32
    %0 = vector.broadcast %cst : f32 to vector<1x128xf32>
    %cst_0 = arith.constant 0.000000e+00 : f32
    %1 = vector.broadcast %cst_0 : f32 to vector<1x128xf32>
    %c0 = arith.constant 0 : index
    %c0_1 = arith.constant 0 : index
    %2 = vector.load %arg0[%c0, %c0_1] : memref<512x128xbf16, #tpu.memory_space<vmem>>, vector<128x128xbf16>
    %c0_2 = arith.constant 0 : index
    %c0_3 = arith.constant 0 : index
    %3 = vector.load %arg1[%c0_2, %c0_3] : memref<128x128xbf16, #tpu.memory_space<vmem>>, vector<128x128xbf16>
    %cst_4 = arith.constant dense<0.000000e+00> : vector<128x128xf32>
    %4 = tpu.matmul %2, %3, %cst_4 {dimension_numbers = #tpu.dot_dimension_numbers<[1], [0], [0], [1], [0, 0, 1, 1], [], []>} : vector<128x128xbf16>, vector<128x128xbf16>, vector<128x128xf32> -> vector<128x128xf32>
    %c0_5 = arith.constant 0 : index
    %c0_6 = arith.constant 0 : index
    %5 = vector.load %arg5[%c0_5, %c0_6] : memref<512x128xf32, #tpu.memory_space<vmem>>, vector<128x128xf32>
    tpu.vector_store %arg5[%c0_5, %c0_6], %4 {strides = array<i32>} : memref<512x128xf32, #tpu.memory_space<vmem>>, vector<128x128xf32>,
    %cst_7 = arith.constant dense<0.000000e+00> : vector<128xf32>
    %6 = vector.multi_reduction <add>, %4, %cst_7 [0] : vector<128x128xf32> to vector<128xf32>
    %7 = vector.shape_cast %6 : vector<128xf32> to vector<1x128xf32>
    %8 = arith.addf %0, %7 : vector<1x128xf32>
    %9 = arith.mulf %4, %4 : vector<128x128xf32>
    %cst_8 = arith.constant dense<0.000000e+00> : vector<128xf32>
    %10 = vector.multi_reduction <add>, %9, %cst_8 [0] : vector<128x128xf32> to vector<128xf32>
    %11 = vector.shape_cast %10 : vector<128xf32> to vector<1x128xf32>
    %12 = arith.addf %1, %11 : vector<1x128xf32>
    %c128 = arith.constant 128 : index
    %c0_9 = arith.constant 0 : index
    %13 = vector.load %arg0[%c128, %c0_9] : memref<512x128xbf16, #tpu.memory_space<vmem>>, vector<128x128xbf16>
    %c0_10 = arith.constant 0 : index
    %c0_11 = arith.constant 0 : index
    %14 = vector.load %arg1[%c0_10, %c0_11] : memref<128x128xbf16, #tpu.memory_space<vmem>>, vector<128x128xbf16>
    %cst_12 = arith.constant dense<0.000000e+00> : vector<128x128xf32>
    %15 = tpu.matmul %13, %14, %cst_12 {dimension_numbers = #tpu.dot_dimension_numbers<[1], [0], [0], [1], [0, 0, 1, 1], [], []>} : vector<128x128xbf16>, vector<128x128xbf16>, vector<128x128xf32> -> vector<128x128xf32>
    %c128_13 = arith.constant 128 : index
    %c0_14 = arith.constant 0 : index
    %16 = vector.load %arg5[%c128_13, %c0_14] : memref<512x128xf32, #tpu.memory_space<vmem>>, vector<128x128xf32>
    tpu.vector_store %arg5[%c128_13, %c0_14], %15 {strides = array<i32>} : memref<512x128xf32, #tpu.memory_space<vmem>>, vector<128x128xf32>,
    %cst_15 = arith.constant dense<0.000000e+00> : vector<128xf32>
    %17 = vector.multi_reduction <add>, %15, %cst_15 [0] : vector<128x128xf32> to vector<128xf32>
    %18 = vector.shape_cast %17 : vector<128xf32> to vector<1x128xf32>
    %19 = arith.addf %8, %18 : vector<1x128xf32>
    %20 = arith.mulf %15, %15 : vector<128x128xf32>
    %cst_16 = arith.constant dense<0.000000e+00> : vector<128xf32>
    %21 = vector.multi_reduction <add>, %20, %cst_16 [0] : vector<128x128xf32> to vector<128xf32>
    %22 = vector.shape_cast %21 : vector<128xf32> to vector<1x128xf32>
    %23 = arith.addf %12, %22 : vector<1x128xf32>
    %c256 = arith.constant 256 : index
    %c0_17 = arith.constant 0 : index
    %24 = vector.load %arg0[%c256, %c0_17] : memref<512x128xbf16, #tpu.memory_space<vmem>>, vector<128x128xbf16>
    %c0_18 = arith.constant 0 : index
    %c0_19 = arith.constant 0 : index
    %25 = vector.load %arg1[%c0_18, %c0_19] : memref<128x128xbf16, #tpu.memory_space<vmem>>, vector<128x128xbf16>
    %cst_20 = arith.constant dense<0.000000e+00> : vector<128x128xf32>
    %26 = tpu.matmul %24, %25, %cst_20 {dimension_numbers = #tpu.dot_dimension_numbers<[1], [0], [0], [1], [0, 0, 1, 1], [], []>} : vector<128x128xbf16>, vector<128x128xbf16>, vector<128x128xf32> -> vector<128x128xf32>
    %c256_21 = arith.constant 256 : index
    %c0_22 = arith.constant 0 : index
    %27 = vector.load %arg5[%c256_21, %c0_22] : memref<512x128xf32, #tpu.memory_space<vmem>>, vector<128x128xf32>
    tpu.vector_store %arg5[%c256_21, %c0_22], %26 {strides = array<i32>} : memref<512x128xf32, #tpu.memory_space<vmem>>, vector<128x128xf32>,
    %cst_23 = arith.constant dense<0.000000e+00> : vector<128xf32>
    %28 = vector.multi_reduction <add>, %26, %cst_23 [0] : vector<128x128xf32> to vector<128xf32>
    %29 = vector.shape_cast %28 : vector<128xf32> to vector<1x128xf32>
    %30 = arith.addf %19, %29 : vector<1x128xf32>
    %31 = arith.mulf %26, %26 : vector<128x128xf32>
    %cst_24 = arith.constant dense<0.000000e+00> : vector<128xf32>
    %32 = vector.multi_reduction <add>, %31, %cst_24 [0] : vector<128x128xf32> to vector<128xf32>
    %33 = vector.shape_cast %32 : vector<128xf32> to vector<1x128xf32>
    %34 = arith.addf %23, %33 : vector<1x128xf32>
    %c384 = arith.constant 384 : index
    %c0_25 = arith.constant 0 : index
    %35 = vector.load %arg0[%c384, %c0_25] : memref<512x128xbf16, #tpu.memory_space<vmem>>, vector<128x128xbf16>
    %c0_26 = arith.constant 0 : index
    %c0_27 = arith.constant 0 : index
    %36 = vector.load %arg1[%c0_26, %c0_27] : memref<128x128xbf16, #tpu.memory_space<vmem>>, vector<128x128xbf16>
    %cst_28 = arith.constant dense<0.000000e+00> : vector<128x128xf32>
    %37 = tpu.matmul %35, %36, %cst_28 {dimension_numbers = #tpu.dot_dimension_numbers<[1], [0], [0], [1], [0, 0, 1, 1], [], []>} : vector<128x128xbf16>, vector<128x128xbf16>, vector<128x128xf32> -> vector<128x128xf32>
    %c384_29 = arith.constant 384 : index
    %c0_30 = arith.constant 0 : index
    %38 = vector.load %arg5[%c384_29, %c0_30] : memref<512x128xf32, #tpu.memory_space<vmem>>, vector<128x128xf32>
    tpu.vector_store %arg5[%c384_29, %c0_30], %37 {strides = array<i32>} : memref<512x128xf32, #tpu.memory_space<vmem>>, vector<128x128xf32>,
    %cst_31 = arith.constant dense<0.000000e+00> : vector<128xf32>
    %39 = vector.multi_reduction <add>, %37, %cst_31 [0] : vector<128x128xf32> to vector<128xf32>
    %40 = vector.shape_cast %39 : vector<128xf32> to vector<1x128xf32>
    %41 = arith.addf %30, %40 : vector<1x128xf32>
    %42 = arith.mulf %37, %37 : vector<128x128xf32>
    %cst_32 = arith.constant dense<0.000000e+00> : vector<128xf32>
    %43 = vector.multi_reduction <add>, %42, %cst_32 [0] : vector<128x128xf32> to vector<128xf32>
    %44 = vector.shape_cast %43 : vector<128xf32> to vector<1x128xf32>
    %45 = arith.addf %34, %44 : vector<1x128xf32>
    %cst_33 = arith.constant 0.001953125 : f32
    %46 = vector.broadcast %cst_33 : f32 to vector<1x128xf32>
    %47 = arith.mulf %41, %46 : vector<1x128xf32>
    %cst_34 = arith.constant 0.001953125 : f32
    %48 = vector.broadcast %cst_34 : f32 to vector<1x128xf32>
    %49 = arith.mulf %45, %48 : vector<1x128xf32>
    %50 = arith.mulf %47, %47 : vector<1x128xf32>
    %51 = arith.subf %49, %50 : vector<1x128xf32>
    %cst_35 = arith.constant 0.000000e+00 : f32
    %52 = vector.broadcast %cst_35 : f32 to vector<1x128xf32>
    %53 = arith.maximumf %51, %52 : vector<1x128xf32>
    %c0_36 = arith.constant 0 : index
    %c0_37 = arith.constant 0 : index
    %54 = vector.load %arg2[%c0_36, %c0_37] : memref<1x128xf32, #tpu.memory_space<vmem>>, vector<1x128xf32>
    %cst_38 = arith.constant 9.99999974E-6 : f32
    %55 = vector.broadcast %cst_38 : f32 to vector<1x128xf32>
    %56 = arith.addf %53, %55 : vector<1x128xf32>
    %57 = math.rsqrt %56 : vector<1x128xf32>
    %58 = arith.mulf %54, %57 : vector<1x128xf32>
    %c0_39 = arith.constant 0 : index
    %c0_40 = arith.constant 0 : index
    %59 = vector.load %arg3[%c0_39, %c0_40] : memref<1x128xf32, #tpu.memory_space<vmem>>, vector<1x128xf32>
    %60 = arith.mulf %47, %58 : vector<1x128xf32>
    %61 = arith.subf %59, %60 : vector<1x128xf32>
    %c0_41 = arith.constant 0 : index
    %c0_42 = arith.constant 0 : index
    %62 = vector.load %arg5[%c0_41, %c0_42] : memref<512x128xf32, #tpu.memory_space<vmem>>, vector<128x128xf32>
    %63 = vector.broadcast %58 : vector<1x128xf32> to vector<128x128xf32>
    %64 = arith.mulf %62, %63 : vector<128x128xf32>
    %65 = vector.broadcast %61 : vector<1x128xf32> to vector<128x128xf32>
    %66 = arith.addf %64, %65 : vector<128x128xf32>
    %cst_43 = arith.constant 0.000000e+00 : f32
    %67 = vector.broadcast %cst_43 : f32 to vector<128x128xf32>
    %68 = arith.maximumf %66, %67 : vector<128x128xf32>
    %69 = arith.truncf %68 : vector<128x128xf32> to vector<128x128xbf16>
    %c0_44 = arith.constant 0 : index
    %c0_45 = arith.constant 0 : index
    %70 = vector.load %arg4[%c0_44, %c0_45] : memref<512x128xbf16, #tpu.memory_space<vmem>>, vector<128x128xbf16>
    tpu.vector_store %arg4[%c0_44, %c0_45], %69 {strides = array<i32>} : memref<512x128xbf16, #tpu.memory_space<vmem>>, vector<128x128xbf16>,
    %c128_46 = arith.constant 128 : index
    %c0_47 = arith.constant 0 : index
    %71 = vector.load %arg5[%c128_46, %c0_47] : memref<512x128xf32, #tpu.memory_space<vmem>>, vector<128x128xf32>
    %72 = vector.broadcast %58 : vector<1x128xf32> to vector<128x128xf32>
    %73 = arith.mulf %71, %72 : vector<128x128xf32>
    %74 = vector.broadcast %61 : vector<1x128xf32> to vector<128x128xf32>
    %75 = arith.addf %73, %74 : vector<128x128xf32>
    %cst_48 = arith.constant 0.000000e+00 : f32
    %76 = vector.broadcast %cst_48 : f32 to vector<128x128xf32>
    %77 = arith.maximumf %75, %76 : vector<128x128xf32>
    %78 = arith.truncf %77 : vector<128x128xf32> to vector<128x128xbf16>
    %c128_49 = arith.constant 128 : index
    %c0_50 = arith.constant 0 : index
    %79 = vector.load %arg4[%c128_49, %c0_50] : memref<512x128xbf16, #tpu.memory_space<vmem>>, vector<128x128xbf16>
    tpu.vector_store %arg4[%c128_49, %c0_50], %78 {strides = array<i32>} : memref<512x128xbf16, #tpu.memory_space<vmem>>, vector<128x128xbf16>,
    %c256_51 = arith.constant 256 : index
    %c0_52 = arith.constant 0 : index
    %80 = vector.load %arg5[%c256_51, %c0_52] : memref<512x128xf32, #tpu.memory_space<vmem>>, vector<128x128xf32>
    %81 = vector.broadcast %58 : vector<1x128xf32> to vector<128x128xf32>
    %82 = arith.mulf %80, %81 : vector<128x128xf32>
    %83 = vector.broadcast %61 : vector<1x128xf32> to vector<128x128xf32>
    %84 = arith.addf %82, %83 : vector<128x128xf32>
    %cst_53 = arith.constant 0.000000e+00 : f32
    %85 = vector.broadcast %cst_53 : f32 to vector<128x128xf32>
    %86 = arith.maximumf %84, %85 : vector<128x128xf32>
    %87 = arith.truncf %86 : vector<128x128xf32> to vector<128x128xbf16>
    %c256_54 = arith.constant 256 : index
    %c0_55 = arith.constant 0 : index
    %88 = vector.load %arg4[%c256_54, %c0_55] : memref<512x128xbf16, #tpu.memory_space<vmem>>, vector<128x128xbf16>
    tpu.vector_store %arg4[%c256_54, %c0_55], %87 {strides = array<i32>} : memref<512x128xbf16, #tpu.memory_space<vmem>>, vector<128x128xbf16>,
    %c384_56 = arith.constant 384 : index
    %c0_57 = arith.constant 0 : index
    %89 = vector.load %arg5[%c384_56, %c0_57] : memref<512x128xf32, #tpu.memory_space<vmem>>, vector<128x128xf32>
    %90 = vector.broadcast %58 : vector<1x128xf32> to vector<128x128xf32>
    %91 = arith.mulf %89, %90 : vector<128x128xf32>
    %92 = vector.broadcast %61 : vector<1x128xf32> to vector<128x128xf32>
    %93 = arith.addf %91, %92 : vector<128x128xf32>
    %cst_58 = arith.constant 0.000000e+00 : f32
    %94 = vector.broadcast %cst_58 : f32 to vector<128x128xf32>
    %95 = arith.maximumf %93, %94 : vector<128x128xf32>
    %96 = arith.truncf %95 : vector<128x128xf32> to vector<128x128xbf16>
    %c384_59 = arith.constant 384 : index
    %c0_60 = arith.constant 0 : index
    %97 = vector.load %arg4[%c384_59, %c0_60] : memref<512x128xbf16, #tpu.memory_space<vmem>>, vector<128x128xbf16>
    tpu.vector_store %arg4[%c384_59, %c0_60], %96 {strides = array<i32>} : memref<512x128xbf16, #tpu.memory_space<vmem>>, vector<128x128xbf16>,
    return
  }
}

module attributes {stable_mosaic.version = 11 : i64} {
  func.func @_fused_conv_bn_act_kernel(%arg0: memref<128x128xbf16, #tpu.memory_space<vmem>>, %arg1: memref<128x128xbf16, #tpu.memory_space<vmem>>, %arg2: memref<1x128xf32, #tpu.memory_space<vmem>>, %arg3: memref<1x128xf32, #tpu.memory_space<vmem>>, %arg4: memref<128x128xbf16, #tpu.memory_space<vmem>>, %arg5: memref<128x128xf32, #tpu.memory_space<vmem>>) attributes {dimension_semantics = [], scalar_prefetch = 0 : i64, scratch_operands = 1 : i64, tpu.core_type = #tpu.core_type<tc>} {
    %cst = arith.constant 0.000000e+00 : f32
    %0 = vector.broadcast %cst : f32 to vector<1x128xf32>
    %cst_0 = arith.constant 0.000000e+00 : f32
    %1 = vector.broadcast %cst_0 : f32 to vector<1x128xf32>
    %c0 = arith.constant 0 : index
    %c0_1 = arith.constant 0 : index
    %2 = vector.load %arg0[%c0, %c0_1] : memref<128x128xbf16, #tpu.memory_space<vmem>>, vector<128x128xbf16>
    %c0_2 = arith.constant 0 : index
    %c0_3 = arith.constant 0 : index
    %3 = vector.load %arg1[%c0_2, %c0_3] : memref<128x128xbf16, #tpu.memory_space<vmem>>, vector<128x128xbf16>
    %cst_4 = arith.constant dense<0.000000e+00> : vector<128x128xf32>
    %4 = tpu.matmul %2, %3, %cst_4 {dimension_numbers = #tpu.dot_dimension_numbers<[1], [0], [0], [1], [0, 0, 1, 1], [], []>} : vector<128x128xbf16>, vector<128x128xbf16>, vector<128x128xf32> -> vector<128x128xf32>
    %c0_5 = arith.constant 0 : index
    %c0_6 = arith.constant 0 : index
    %5 = vector.load %arg5[%c0_5, %c0_6] : memref<128x128xf32, #tpu.memory_space<vmem>>, vector<128x128xf32>
    tpu.vector_store %arg5[%c0_5, %c0_6], %4 {strides = array<i32>} : memref<128x128xf32, #tpu.memory_space<vmem>>, vector<128x128xf32>,
    %cst_7 = arith.constant dense<0.000000e+00> : vector<128xf32>
    %6 = vector.multi_reduction <add>, %4, %cst_7 [0] : vector<128x128xf32> to vector<128xf32>
    %7 = vector.shape_cast %6 : vector<128xf32> to vector<1x128xf32>
    %8 = arith.addf %0, %7 : vector<1x128xf32>
    %9 = arith.mulf %4, %4 : vector<128x128xf32>
    %cst_8 = arith.constant dense<0.000000e+00> : vector<128xf32>
    %10 = vector.multi_reduction <add>, %9, %cst_8 [0] : vector<128x128xf32> to vector<128xf32>
    %11 = vector.shape_cast %10 : vector<128xf32> to vector<1x128xf32>
    %12 = arith.addf %1, %11 : vector<1x128xf32>
    %cst_9 = arith.constant 7.812500e-03 : f32
    %13 = vector.broadcast %cst_9 : f32 to vector<1x128xf32>
    %14 = arith.mulf %8, %13 : vector<1x128xf32>
    %cst_10 = arith.constant 7.812500e-03 : f32
    %15 = vector.broadcast %cst_10 : f32 to vector<1x128xf32>
    %16 = arith.mulf %12, %15 : vector<1x128xf32>
    %17 = arith.mulf %14, %14 : vector<1x128xf32>
    %18 = arith.subf %16, %17 : vector<1x128xf32>
    %cst_11 = arith.constant 0.000000e+00 : f32
    %19 = vector.broadcast %cst_11 : f32 to vector<1x128xf32>
    %20 = arith.maximumf %18, %19 : vector<1x128xf32>
    %c0_12 = arith.constant 0 : index
    %c0_13 = arith.constant 0 : index
    %21 = vector.load %arg2[%c0_12, %c0_13] : memref<1x128xf32, #tpu.memory_space<vmem>>, vector<1x128xf32>
    %cst_14 = arith.constant 9.99999974E-6 : f32
    %22 = vector.broadcast %cst_14 : f32 to vector<1x128xf32>
    %23 = arith.addf %20, %22 : vector<1x128xf32>
    %24 = math.rsqrt %23 : vector<1x128xf32>
    %25 = arith.mulf %21, %24 : vector<1x128xf32>
    %c0_15 = arith.constant 0 : index
    %c0_16 = arith.constant 0 : index
    %26 = vector.load %arg3[%c0_15, %c0_16] : memref<1x128xf32, #tpu.memory_space<vmem>>, vector<1x128xf32>
    %27 = arith.mulf %14, %25 : vector<1x128xf32>
    %28 = arith.subf %26, %27 : vector<1x128xf32>
    %c0_17 = arith.constant 0 : index
    %c0_18 = arith.constant 0 : index
    %29 = vector.load %arg5[%c0_17, %c0_18] : memref<128x128xf32, #tpu.memory_space<vmem>>, vector<128x128xf32>
    %30 = vector.broadcast %25 : vector<1x128xf32> to vector<128x128xf32>
    %31 = arith.mulf %29, %30 : vector<128x128xf32>
    %32 = vector.broadcast %28 : vector<1x128xf32> to vector<128x128xf32>
    %33 = arith.addf %31, %32 : vector<128x128xf32>
    %cst_19 = arith.constant 0.000000e+00 : f32
    %34 = vector.broadcast %cst_19 : f32 to vector<128x128xf32>
    %35 = arith.maximumf %33, %34 : vector<128x128xf32>
    %36 = arith.truncf %35 : vector<128x128xf32> to vector<128x128xbf16>
    %c0_20 = arith.constant 0 : index
    %c0_21 = arith.constant 0 : index
    %37 = vector.load %arg4[%c0_20, %c0_21] : memref<128x128xbf16, #tpu.memory_space<vmem>>, vector<128x128xbf16>
    tpu.vector_store %arg4[%c0_20, %c0_21], %36 {strides = array<i32>} : memref<128x128xbf16, #tpu.memory_space<vmem>>, vector<128x128xbf16>,
    return
  }
}

module attributes {stable_mosaic.version = 11 : i64} {
  func.func @_fused_conv_bn_act_kernel(%arg0: memref<128x256xbf16, #tpu.memory_space<vmem>>, %arg1: memref<256x128xbf16, #tpu.memory_space<vmem>>, %arg2: memref<1x128xf32, #tpu.memory_space<vmem>>, %arg3: memref<1x128xf32, #tpu.memory_space<vmem>>, %arg4: memref<128x128xbf16, #tpu.memory_space<vmem>>, %arg5: memref<128x128xf32, #tpu.memory_space<vmem>>) attributes {dimension_semantics = [], scalar_prefetch = 0 : i64, scratch_operands = 1 : i64, tpu.core_type = #tpu.core_type<tc>} {
    %cst = arith.constant 0.000000e+00 : f32
    %0 = vector.broadcast %cst : f32 to vector<1x128xf32>
    %cst_0 = arith.constant 0.000000e+00 : f32
    %1 = vector.broadcast %cst_0 : f32 to vector<1x128xf32>
    %c0 = arith.constant 0 : index
    %c0_1 = arith.constant 0 : index
    %2 = vector.load %arg0[%c0, %c0_1] : memref<128x256xbf16, #tpu.memory_space<vmem>>, vector<128x256xbf16>
    %c0_2 = arith.constant 0 : index
    %c0_3 = arith.constant 0 : index
    %3 = vector.load %arg1[%c0_2, %c0_3] : memref<256x128xbf16, #tpu.memory_space<vmem>>, vector<256x128xbf16>
    %cst_4 = arith.constant dense<0.000000e+00> : vector<128x128xf32>
    %4 = tpu.matmul %2, %3, %cst_4 {dimension_numbers = #tpu.dot_dimension_numbers<[1], [0], [0], [1], [0, 0, 1, 1], [], []>} : vector<128x256xbf16>, vector<256x128xbf16>, vector<128x128xf32> -> vector<128x128xf32>
    %c0_5 = arith.constant 0 : index
    %c0_6 = arith.constant 0 : index
    %5 = vector.load %arg5[%c0_5, %c0_6] : memref<128x128xf32, #tpu.memory_space<vmem>>, vector<128x128xf32>
    tpu.vector_store %arg5[%c0_5, %c0_6], %4 {strides = array<i32>} : memref<128x128xf32, #tpu.memory_space<vmem>>, vector<128x128xf32>,
    %cst_7 = arith.constant dense<0.000000e+00> : vector<128xf32>
    %6 = vector.multi_reduction <add>, %4, %cst_7 [0] : vector<128x128xf32> to vector<128xf32>
    %7 = vector.shape_cast %6 : vector<128xf32> to vector<1x128xf32>
    %8 = arith.addf %0, %7 : vector<1x128xf32>
    %9 = arith.mulf %4, %4 : vector<128x128xf32>
    %cst_8 = arith.constant dense<0.000000e+00> : vector<128xf32>
    %10 = vector.multi_reduction <add>, %9, %cst_8 [0] : vector<128x128xf32> to vector<128xf32>
    %11 = vector.shape_cast %10 : vector<128xf32> to vector<1x128xf32>
    %12 = arith.addf %1, %11 : vector<1x128xf32>
    %cst_9 = arith.constant 3.125000e-02 : f32
    %13 = vector.broadcast %cst_9 : f32 to vector<1x128xf32>
    %14 = arith.mulf %8, %13 : vector<1x128xf32>
    %cst_10 = arith.constant 3.125000e-02 : f32
    %15 = vector.broadcast %cst_10 : f32 to vector<1x128xf32>
    %16 = arith.mulf %12, %15 : vector<1x128xf32>
    %17 = arith.mulf %14, %14 : vector<1x128xf32>
    %18 = arith.subf %16, %17 : vector<1x128xf32>
    %cst_11 = arith.constant 0.000000e+00 : f32
    %19 = vector.broadcast %cst_11 : f32 to vector<1x128xf32>
    %20 = arith.maximumf %18, %19 : vector<1x128xf32>
    %c0_12 = arith.constant 0 : index
    %c0_13 = arith.constant 0 : index
    %21 = vector.load %arg2[%c0_12, %c0_13] : memref<1x128xf32, #tpu.memory_space<vmem>>, vector<1x128xf32>
    %cst_14 = arith.constant 9.99999974E-6 : f32
    %22 = vector.broadcast %cst_14 : f32 to vector<1x128xf32>
    %23 = arith.addf %20, %22 : vector<1x128xf32>
    %24 = math.rsqrt %23 : vector<1x128xf32>
    %25 = arith.mulf %21, %24 : vector<1x128xf32>
    %c0_15 = arith.constant 0 : index
    %c0_16 = arith.constant 0 : index
    %26 = vector.load %arg3[%c0_15, %c0_16] : memref<1x128xf32, #tpu.memory_space<vmem>>, vector<1x128xf32>
    %27 = arith.mulf %14, %25 : vector<1x128xf32>
    %28 = arith.subf %26, %27 : vector<1x128xf32>
    %c0_17 = arith.constant 0 : index
    %c0_18 = arith.constant 0 : index
    %29 = vector.load %arg5[%c0_17, %c0_18] : memref<128x128xf32, #tpu.memory_space<vmem>>, vector<128x128xf32>
    %30 = vector.broadcast %25 : vector<1x128xf32> to vector<128x128xf32>
    %31 = arith.mulf %29, %30 : vector<128x128xf32>
    %32 = vector.broadcast %28 : vector<1x128xf32> to vector<128x128xf32>
    %33 = arith.addf %31, %32 : vector<128x128xf32>
    %cst_19 = arith.constant 0.000000e+00 : f32
    %34 = vector.broadcast %cst_19 : f32 to vector<128x128xf32>
    %35 = arith.maximumf %33, %34 : vector<128x128xf32>
    %36 = arith.truncf %35 : vector<128x128xf32> to vector<128x128xbf16>
    %c0_20 = arith.constant 0 : index
    %c0_21 = arith.constant 0 : index
    %37 = vector.load %arg4[%c0_20, %c0_21] : memref<128x128xbf16, #tpu.memory_space<vmem>>, vector<128x128xbf16>
    tpu.vector_store %arg4[%c0_20, %c0_21], %36 {strides = array<i32>} : memref<128x128xbf16, #tpu.memory_space<vmem>>, vector<128x128xbf16>,
    return
  }
}

module attributes {stable_mosaic.version = 11 : i64} {
  func.func @_fused_conv_bn_act_kernel(%arg0: memref<128x512xbf16, #tpu.memory_space<vmem>>, %arg1: memref<512x128xbf16, #tpu.memory_space<vmem>>, %arg2: memref<1x128xf32, #tpu.memory_space<vmem>>, %arg3: memref<1x128xf32, #tpu.memory_space<vmem>>, %arg4: memref<128x128xf32, #tpu.memory_space<vmem>>, %arg5: memref<128x128xf32, #tpu.memory_space<vmem>>) attributes {dimension_semantics = [], scalar_prefetch = 0 : i64, scratch_operands = 1 : i64, tpu.core_type = #tpu.core_type<tc>} {
    %cst = arith.constant 0.000000e+00 : f32
    %0 = vector.broadcast %cst : f32 to vector<1x128xf32>
    %cst_0 = arith.constant 0.000000e+00 : f32
    %1 = vector.broadcast %cst_0 : f32 to vector<1x128xf32>
    %c0 = arith.constant 0 : index
    %c0_1 = arith.constant 0 : index
    %2 = vector.load %arg0[%c0, %c0_1] : memref<128x512xbf16, #tpu.memory_space<vmem>>, vector<128x512xbf16>
    %c0_2 = arith.constant 0 : index
    %c0_3 = arith.constant 0 : index
    %3 = vector.load %arg1[%c0_2, %c0_3] : memref<512x128xbf16, #tpu.memory_space<vmem>>, vector<512x128xbf16>
    %cst_4 = arith.constant dense<0.000000e+00> : vector<128x128xf32>
    %4 = tpu.matmul %2, %3, %cst_4 {dimension_numbers = #tpu.dot_dimension_numbers<[1], [0], [0], [1], [0, 0, 1, 1], [], []>} : vector<128x512xbf16>, vector<512x128xbf16>, vector<128x128xf32> -> vector<128x128xf32>
    %c0_5 = arith.constant 0 : index
    %c0_6 = arith.constant 0 : index
    %5 = vector.load %arg5[%c0_5, %c0_6] : memref<128x128xf32, #tpu.memory_space<vmem>>, vector<128x128xf32>
    tpu.vector_store %arg5[%c0_5, %c0_6], %4 {strides = array<i32>} : memref<128x128xf32, #tpu.memory_space<vmem>>, vector<128x128xf32>,
    %cst_7 = arith.constant dense<0.000000e+00> : vector<128xf32>
    %6 = vector.multi_reduction <add>, %4, %cst_7 [0] : vector<128x128xf32> to vector<128xf32>
    %7 = vector.shape_cast %6 : vector<128xf32> to vector<1x128xf32>
    %8 = arith.addf %0, %7 : vector<1x128xf32>
    %9 = arith.mulf %4, %4 : vector<128x128xf32>
    %cst_8 = arith.constant dense<0.000000e+00> : vector<128xf32>
    %10 = vector.multi_reduction <add>, %9, %cst_8 [0] : vector<128x128xf32> to vector<128xf32>
    %11 = vector.shape_cast %10 : vector<128xf32> to vector<1x128xf32>
    %12 = arith.addf %1, %11 : vector<1x128xf32>
    %cst_9 = arith.constant 1.250000e-01 : f32
    %13 = vector.broadcast %cst_9 : f32 to vector<1x128xf32>
    %14 = arith.mulf %8, %13 : vector<1x128xf32>
    %cst_10 = arith.constant 1.250000e-01 : f32
    %15 = vector.broadcast %cst_10 : f32 to vector<1x128xf32>
    %16 = arith.mulf %12, %15 : vector<1x128xf32>
    %17 = arith.mulf %14, %14 : vector<1x128xf32>
    %18 = arith.subf %16, %17 : vector<1x128xf32>
    %cst_11 = arith.constant 0.000000e+00 : f32
    %19 = vector.broadcast %cst_11 : f32 to vector<1x128xf32>
    %20 = arith.maximumf %18, %19 : vector<1x128xf32>
    %c0_12 = arith.constant 0 : index
    %c0_13 = arith.constant 0 : index
    %21 = vector.load %arg2[%c0_12, %c0_13] : memref<1x128xf32, #tpu.memory_space<vmem>>, vector<1x128xf32>
    %cst_14 = arith.constant 9.99999974E-6 : f32
    %22 = vector.broadcast %cst_14 : f32 to vector<1x128xf32>
    %23 = arith.addf %20, %22 : vector<1x128xf32>
    %24 = math.rsqrt %23 : vector<1x128xf32>
    %25 = arith.mulf %21, %24 : vector<1x128xf32>
    %c0_15 = arith.constant 0 : index
    %c0_16 = arith.constant 0 : index
    %26 = vector.load %arg3[%c0_15, %c0_16] : memref<1x128xf32, #tpu.memory_space<vmem>>, vector<1x128xf32>
    %27 = arith.mulf %14, %25 : vector<1x128xf32>
    %28 = arith.subf %26, %27 : vector<1x128xf32>
    %c0_17 = arith.constant 0 : index
    %c0_18 = arith.constant 0 : index
    %29 = vector.load %arg5[%c0_17, %c0_18] : memref<128x128xf32, #tpu.memory_space<vmem>>, vector<128x128xf32>
    %30 = vector.broadcast %25 : vector<1x128xf32> to vector<128x128xf32>
    %31 = arith.mulf %29, %30 : vector<128x128xf32>
    %32 = vector.broadcast %28 : vector<1x128xf32> to vector<128x128xf32>
    %33 = arith.addf %31, %32 : vector<128x128xf32>
    %cst_19 = arith.constant 0.000000e+00 : f32
    %34 = vector.broadcast %cst_19 : f32 to vector<128x128xf32>
    %35 = arith.subf %34, %33 : vector<128x128xf32>
    %36 = math.exp %35 : vector<128x128xf32>
    %cst_20 = arith.constant 1.000000e+00 : f32
    %37 = vector.broadcast %cst_20 : f32 to vector<128x128xf32>
    %38 = arith.addf %37, %36 : vector<128x128xf32>
    %cst_21 = arith.constant 1.000000e+00 : f32
    %39 = vector.broadcast %cst_21 : f32 to vector<128x128xf32>
    %40 = arith.divf %39, %38 : vector<128x128xf32>
    %c0_22 = arith.constant 0 : index
    %c0_23 = arith.constant 0 : index
    %41 = vector.load %arg4[%c0_22, %c0_23] : memref<128x128xf32, #tpu.memory_space<vmem>>, vector<128x128xf32>
    tpu.vector_store %arg4[%c0_22, %c0_23], %40 {strides = array<i32>} : memref<128x128xf32, #tpu.memory_space<vmem>>, vector<128x128xf32>,
    return
  }
}

</mosaic_0001>

<bundles_post_ra>
// kernel: dc_discriminator_forward.4
= control target key start
LH: loop header
LB: loop body
LE: loop exit
PB: predicated region body
PF: predicated region fallthrough
CT: control target
= control target key end

     0   :  { %s3320_s1 = inlined_call_operand.vmem [shape: bf16[128,128], index: 1, kind: input, shape index: {}]   ;;  %s3321_s0 = inlined_call_operand.vmem [shape: bf16[512,128], index: 0, kind: input, shape index: {}]   ;;  %s3322_s2 = inlined_call_operand.vmem [shape: f32[1,128], index: 2, kind: input, shape index: {}]   ;;  %s3323_s3 = inlined_call_operand.vmem [shape: f32[1,128], index: 3, kind: input, shape index: {}]   ;;  %s3324_s4 = inlined_call_operand.vmem [shape: bf16[512,128], index: 4, kind: output, shape index: {}]  }
   0x1   :  { %v2401_v0 = vld [vmem:[%s3320_s1 + $0x38] sm:$0xff]   ;;  %v2403_v2 = vld [vmem:[%s3320_s1 + $0x30] sm:$0xff]   ;;  %v2405_v4 = vld [vmem:[%s3320_s1 + $0x28] sm:$0xff]  }
   0x2   :  { %v2402_v1 = vld [vmem:[%s3320_s1 + $0x38] sm:$0xff]   ;;  %2273 = vmatprep.subr.bf16.mxu0 %v2401_v0  ;;  %v2404_v3 = vld [vmem:[%s3320_s1 + $0x30] sm:$0xff]   ;;  %v2406_v5 = vld [vmem:[%s3320_s1 + $0x28] sm:$0xff]  }
   0x3   :  { %2305 = vmatprep.subr.bf16.mxu1 %v2402_v1  ;;  %2274 = vmatpush3.bf16.msra.mxu0 %v2401_v0  ;;  %v2407_v6 = vld [vmem:[%s3320_s1 + $0x20] sm:$0xff]   ;;  %v2409_v8 = vld [vmem:[%s3320_s1 + $0x18] sm:$0xff]   ;;  %v2411_v10 = vld [vmem:[%s3320_s1 + $0x10] sm:$0xff]  }
   0x4   :  { %2306 = vmatpush3.bf16.msra.mxu1 %v2402_v1  ;;  %2275 = vmatprep.subr.bf16.mxu0 %v2403_v2  ;;  %v2408_v7 = vld [vmem:[%s3320_s1 + $0x20] sm:$0xff]   ;;  %v2410_v9 = vld [vmem:[%s3320_s1 + $0x18] sm:$0xff]   ;;  %v2412_v11 = vld [vmem:[%s3320_s1 + $0x10] sm:$0xff]  }
   0x5   :  { %2307 = vmatprep.subr.bf16.mxu1 %v2404_v3  ;;  %v2417_v12 = vld [vmem:[%s3321_s0] sm:$0xff]   ;;  %v2413_v14 = vld [vmem:[%s3320_s1 + $0x8] sm:$0xff]   ;;  %v2421_v19 = vld [vmem:[%s3320_s1 + $0x38] sm:$0xff]  }
   0x6   :  { %v2418_v13 = vld [vmem:[%s3321_s0 + $0x40] sm:$0xff]   ;;  %2289 = vmatprep.mubr.bf16.mxu0 %v2417_v12  ;;  %v2414_v15 = vld [vmem:[%s3320_s1 + $0x8] sm:$0xff]   ;;  %v2422_v20 = vld [vmem:[%s3320_s1 + $0x38] sm:$0xff]  }
   0x7   :  { %2276 = vmatpush3.bf16.msra.mxu0 %v2403_v2  ;;  %2321 = vmatprep.mubr.bf16.mxu1 %v2418_v13  ;;  %v2415_v16 = vld [vmem:[%s3320_s1] sm:$0xff]   ;;  %v2419_v18 = vld [vmem:[%s3321_s0 + $0x8] sm:$0xff]   ;;  %v2423_v22 = vld [vmem:[%s3320_s1 + $0x30] sm:$0xff]  }
   0x8   :  { %2308 = vmatpush3.bf16.msra.mxu1 %v2404_v3  ;;  %2277 = vmatprep.subr.bf16.mxu0 %v2405_v4  ;;  %v2416_v17 = vld [vmem:[%s3320_s1] sm:$0xff]   ;;  %v2420_v21 = vld [vmem:[%s3321_s0 + $0x48] sm:$0xff]   ;;  %v2424_v23 = vld [vmem:[%s3320_s1 + $0x30] sm:$0xff]  }
   0x9   :  { %2309 = vmatprep.subr.bf16.mxu1 %v2406_v5  ;;  %v2425_v24 = vld [vmem:[%s3321_s0 + $0x10] sm:$0xff]   ;;  %v2427_v26 = vld [vmem:[%s3321_s0 + $0x18] sm:$0xff]   ;;  %v2429_v27 = vld [vmem:[%s3320_s1 + $0x28] sm:$0xff]  }
   0xa   :  { %v2426_v25 = vld [vmem:[%s3321_s0 + $0x50] sm:$0xff]   ;;  %v2430_v28 = vld [vmem:[%s3320_s1 + $0x28] sm:$0xff]   ;;  %v2428_v29 = vld [vmem:[%s3321_s0 + $0x58] sm:$0xff]  }
   0xb   :  { %2278 = vmatpush3.bf16.msra.mxu0 %v2405_v4  ;;  %v2431_v30 = vld [vmem:[%s3320_s1 + $0x20] sm:$0xff]   ;;  %v2435_v34 = vld [vmem:[%s3321_s0 + $0x28] sm:$0xff]   ;;  %v2437_v35 = vld [vmem:[%s3320_s1 + $0x18] sm:$0xff]  }
   0xc   :  { %2310 = vmatpush3.bf16.msra.mxu1 %v2406_v5  ;;  %2279 = vmatprep.subr.bf16.mxu0 %v2407_v6  ;;  %v2432_v31 = vld [vmem:[%s3320_s1 + $0x20] sm:$0xff]   ;;  %v2438_v36 = vld [vmem:[%s3320_s1 + $0x18] sm:$0xff]   ;;  %v2436_v37 = vld [vmem:[%s3321_s0 + $0x68] sm:$0xff]  }
   0xd   :  { %2311 = vmatprep.subr.bf16.mxu1 %v2408_v7  ;;  %v2433_v32 = vld [vmem:[%s3321_s0 + $0x20] sm:$0xff]   ;;  %v2439_v38 = vld [vmem:[%s3320_s1 + $0x10] sm:$0xff]   ;;  %v2443_v42 = vld [vmem:[%s3321_s0 + $0x38] sm:$0xff]  }
   0xe   :  { %v2434_v33 = vld [vmem:[%s3321_s0 + $0x60] sm:$0xff]   ;;  %v2440_v39 = vld [vmem:[%s3320_s1 + $0x10] sm:$0xff]   ;;  %v2445_v43 = vld [vmem:[%s3320_s1 + $0x8] sm:$0xff]  }
   0xf   :  { %2280 = vmatpush3.bf16.msra.mxu0 %v2407_v6  ;;  %v2441_v40 = vld [vmem:[%s3321_s0 + $0x30] sm:$0xff]   ;;  %v2446_v44 = vld [vmem:[%s3320_s1 + $0x8] sm:$0xff]   ;;  %v2444_v45 = vld [vmem:[%s3321_s0 + $0x78] sm:$0xff]  }
  0x10   :  { %2312 = vmatpush3.bf16.msra.mxu1 %v2408_v7  ;;  %2281 = vmatprep.subr.bf16.mxu0 %v2409_v8  ;;  %v2442_v41 = vld [vmem:[%s3321_s0 + $0x70] sm:$0xff]   ;;  %v2447_v46 = vld [vmem:[%s3320_s1] sm:$0xff]   ;;  %v2451_v50 = vld [vmem:[%s3321_s0 + $0x88] sm:$0xff]  }
  0x11   :  { %2313 = vmatprep.subr.bf16.mxu1 %v2410_v9  ;;  %v2448_v47 = vld [vmem:[%s3320_s1] sm:$0xff]   ;;  %v2452_v51 = vld [vmem:[%s3321_s0 + $0xc8] sm:$0xff]   ;;  %v2453_v52 = vld [vmem:[%s3321_s0 + $0x90] sm:$0xff]  }
  0x12   :  { %v2449_v48 = vld [vmem:[%s3321_s0 + $0x80] sm:$0xff]   ;;  %v2454_v53 = vld [vmem:[%s3321_s0 + $0xd0] sm:$0xff]   ;;  %v2455_v54 = vld [vmem:[%s3321_s0 + $0x98] sm:$0xff]  }
  0x13   :  { %2282 = vmatpush3.bf16.msra.mxu0 %v2409_v8  ;;  %v2450_v49 = vld [vmem:[%s3321_s0 + $0xc0] sm:$0xff]   ;;  %v2456_v55 = vld [vmem:[%s3321_s0 + $0xd8] sm:$0xff]   ;;  %v2459_v58 = vld [vmem:[%s3321_s0 + $0xa8] sm:$0xff]  }
  0x14   :  { %2314 = vmatpush3.bf16.msra.mxu1 %v2410_v9  ;;  %2283 = vmatprep.subr.bf16.mxu0 %v2411_v10  ;;  %v2457_v56 = vld [vmem:[%s3321_s0 + $0xa0] sm:$0xff]   ;;  %v2460_v59 = vld [vmem:[%s3321_s0 + $0xe8] sm:$0xff]   ;;  %v2461_v60 = vld [vmem:[%s3321_s0 + $0xb0] sm:$0xff]  }
  0x15   :  { %2315 = vmatprep.subr.bf16.mxu1 %v2412_v11  ;;  %v2458_v57 = vld [vmem:[%s3321_s0 + $0xe0] sm:$0xff]   ;;  %v2462_v61 = vld [vmem:[%s3321_s0 + $0xf0] sm:$0xff]   ;;  %v2463_v62 = vld [vmem:[%s3321_s0 + $0xb8] sm:$0xff]  }
  0x16   :  { %v2464_v63 = vld [vmem:[%s3321_s0 + $0xf8] sm:$0xff]  }
  0x17   :  { %2284 = vmatpush3.bf16.msra.mxu0 %v2411_v10 }
  0x18   :  { %2316 = vmatpush3.bf16.msra.mxu1 %v2412_v11  ;;  %2285 = vmatprep.subr.bf16.mxu0 %v2413_v14 }
  0x19   :  { %2317 = vmatprep.subr.bf16.mxu1 %v2414_v15 }
  0x1b   :  { %2286 = vmatpush3.bf16.msra.mxu0 %v2413_v14 }
  0x1c   :  { %2318 = vmatpush3.bf16.msra.mxu1 %v2414_v15  ;;  %2287 = vmatprep.subr.bf16.mxu0 %v2415_v16 }
  0x1d   :  { %2319 = vmatprep.subr.bf16.mxu1 %v2416_v17 }
  0x1f   :  { %2288 = vmatpush3.bf16.msra.mxu0 %v2415_v16 }
  0x20   :  { %2320 = vmatpush3.bf16.msra.mxu1 %v2416_v17  ;;  %2337 = vmatprep.subr.bf16.mxu0 %v2421_v19 }
  0x21   :  { %2369 = vmatprep.subr.bf16.mxu1 %v2422_v20 }
  0x22   :  { %2290 = vmatmul.mubr.bf16.vlgmr.msra.gmra.mxu0 %v2419_v18 }
  0x23   :  { %2322 = vmatmul.mubr.bf16.vlgmr.msra.gmra.mxu1 %v2420_v21  ;;  %2338 = vmatpush3.bf16.msra.mxu0 %v2421_v19 }
  0x24   :  { %2370 = vmatpush3.bf16.msra.mxu1 %v2422_v20  ;;  %2339 = vmatprep.subr.bf16.mxu0 %v2423_v22 }
  0x25   :  { %2371 = vmatprep.subr.bf16.mxu1 %v2424_v23  ;;  %2293 = vmatprep.mubr.bf16.mxu0 %v2425_v24 }
  0x26   :  { %2325 = vmatprep.mubr.bf16.mxu1 %v2426_v25 }
  0x27   :  { %2340 = vmatpush3.bf16.msra.mxu0 %v2423_v22 }
  0x28   :  { %2372 = vmatpush3.bf16.msra.mxu1 %v2424_v23  ;;  %2341 = vmatprep.subr.bf16.mxu0 %v2429_v27 }
  0x29   :  { %2373 = vmatprep.subr.bf16.mxu1 %v2430_v28 }
  0x2a   :  { %2294 = vmatmul.mubr.bf16.gmra.mxu0 %v2427_v26 }
  0x2b   :  { %2326 = vmatmul.mubr.bf16.gmra.mxu1 %v2428_v29  ;;  %2342 = vmatpush3.bf16.msra.mxu0 %v2429_v27 }
  0x2c   :  { %2374 = vmatpush3.bf16.msra.mxu1 %v2430_v28  ;;  %2343 = vmatprep.subr.bf16.mxu0 %v2431_v30 }
  0x2d   :  { %2375 = vmatprep.subr.bf16.mxu1 %v2432_v31  ;;  %2297 = vmatprep.mubr.bf16.mxu0 %v2433_v32 }
  0x2e   :  { %2329 = vmatprep.mubr.bf16.mxu1 %v2434_v33 }
  0x2f   :  { %2344 = vmatpush3.bf16.msra.mxu0 %v2431_v30 }
  0x30   :  { %2376 = vmatpush3.bf16.msra.mxu1 %v2432_v31  ;;  %2345 = vmatprep.subr.bf16.mxu0 %v2437_v35 }
  0x31   :  { %2377 = vmatprep.subr.bf16.mxu1 %v2438_v36 }
  0x32   :  { %2298 = vmatmul.mubr.bf16.gmra.mxu0 %v2435_v34 }
  0x33   :  { %2330 = vmatmul.mubr.bf16.gmra.mxu1 %v2436_v37  ;;  %2346 = vmatpush3.bf16.msra.mxu0 %v2437_v35 }
  0x34   :  { %2378 = vmatpush3.bf16.msra.mxu1 %v2438_v36  ;;  %2347 = vmatprep.subr.bf16.mxu0 %v2439_v38 }
  0x35   :  { %2379 = vmatprep.subr.bf16.mxu1 %v2440_v39  ;;  %2301 = vmatprep.mubr.bf16.mxu0 %v2441_v40 }
  0x36   :  { %2333 = vmatprep.mubr.bf16.mxu1 %v2442_v41 }
  0x37   :  { %2348 = vmatpush3.bf16.msra.mxu0 %v2439_v38 }
  0x38   :  { %2380 = vmatpush3.bf16.msra.mxu1 %v2440_v39  ;;  %2349 = vmatprep.subr.bf16.mxu0 %v2445_v43 }
  0x39   :  { %2381 = vmatprep.subr.bf16.mxu1 %v2446_v44 }
  0x3a   :  { %2302 = vmatmul.mubr.bf16.gmra.mxu0 %v2443_v42 }
  0x3b   :  { %2334 = vmatmul.mubr.bf16.gmra.mxu1 %v2444_v45  ;;  %2350 = vmatpush3.bf16.msra.mxu0 %v2445_v43 }
  0x3c   :  { %2382 = vmatpush3.bf16.msra.mxu1 %v2446_v44  ;;  %2351 = vmatprep.subr.bf16.mxu0 %v2447_v46 }
  0x3d   :  { %2383 = vmatprep.subr.bf16.mxu1 %v2448_v47  ;;  %2353 = vmatprep.mubr.bf16.mxu0 %v2449_v48 }
  0x3e   :  { %2385 = vmatprep.mubr.bf16.mxu1 %v2450_v49 }
  0x3f   :  { %2352 = vmatpush3.bf16.msra.mxu0 %v2447_v46 }
  0x40   :  { %2384 = vmatpush3.bf16.msra.mxu1 %v2448_v47 }
  0x42   :  { %2354 = vmatmul.mubr.bf16.vlgmr.msra.gmra.mxu0 %v2451_v50 }
  0x43   :  { %2386 = vmatmul.mubr.bf16.vlgmr.msra.gmra.mxu1 %v2452_v51  ;;  %2357 = vmatprep.mubr.bf16.mxu0 %v2453_v52 }
  0x44   :  { %2389 = vmatprep.mubr.bf16.mxu1 %v2454_v53 }
  0x4a   :  { %2358 = vmatmul.mubr.bf16.gmra.mxu0 %v2455_v54 }
  0x4b   :  { %2390 = vmatmul.mubr.bf16.gmra.mxu1 %v2456_v55  ;;  %2361 = vmatprep.mubr.bf16.mxu0 %v2457_v56 }
  0x4c   :  { %2393 = vmatprep.mubr.bf16.mxu1 %v2458_v57 }
  0x52   :  { %2362 = vmatmul.mubr.bf16.gmra.mxu0 %v2459_v58 }
  0x53   :  { %2394 = vmatmul.mubr.bf16.gmra.mxu1 %v2460_v59  ;;  %2365 = vmatprep.mubr.bf16.mxu0 %v2461_v60 }
  0x54   :  { %2397 = vmatprep.mubr.bf16.mxu1 %v2462_v61 }
  0x5a   :  { %2366 = vmatmul.mubr.bf16.gmra.mxu0 %v2463_v62 }
  0x5b   :  { %2398 = vmatmul.mubr.bf16.gmra.mxu1 %v2464_v63 }
  0xe2   :  { %v2684_v0 = vpop.f32.mrf.mxu0 }
  0xe3   :  { %v2686_v1 = vpop.f32.mrf.mxu1  ;;  %v283_v15 = vmul.f32 %v2684_v0, %v2684_v0 }
  0xe4   :  { %v2688_v2 = vpop.f32.mrf.mxu0  ;;  %v584_v19 = vmul.f32 %v2686_v1, %v2686_v1 }
  0xe5   :  { %v2690_v3 = vpop.f32.mrf.mxu1  ;;  %v281_v7 = vmul.f32 %v2688_v2, %v2688_v2 }
  0xe6   :  { %v2692_v4 = vpop.f32.mrf.mxu0  ;;  %v582_v11 = vmul.f32 %v2690_v3, %v2690_v3 }
  0xe7   :  { %v2694_v5 = vpop.f32.mrf.mxu1  ;;  %v284_v23 = vmul.f32 %v2692_v4, %v2692_v4 }
  0xe8   :  { %v2696_v6 = vpop.f32.mrf.mxu0  ;;  %v585_v27 = vmul.f32 %v2694_v5, %v2694_v5 }
  0xe9   :  { %v259_v8 = vadd.f32 %v2696_v6, %v2688_v2  ;;  %v282_v9 = vmul.f32 %v2696_v6, %v2696_v6  ;;  %v2704_v10 = vpop.f32.mrf.mxu1 }
  0xea   :  { %v560_v12 = vadd.f32 %v2704_v10, %v2690_v3  ;;  %v583_v13 = vmul.f32 %v2704_v10, %v2704_v10  ;;  %v2712_v14 = vpop.f32.mrf.mxu0 }
  0xeb   :  { %v260_v16 = vadd.f32 %v2684_v0, %v259_v8  ;;  %v297_v17 = vadd.f32 %v282_v9, %v281_v7  ;;  %v2717_v18 = vpop.f32.mrf.mxu1  ;;  %v287_v47 = vmul.f32 %v2712_v14, %v2712_v14 }
  0xec   :  { %v561_v20 = vadd.f32 %v2686_v1, %v560_v12  ;;  %v598_v21 = vadd.f32 %v583_v13, %v582_v11  ;;  %v2722_v22 = vpop.f32.mrf.mxu0  ;;  %v588_v51 = vmul.f32 %v2717_v18, %v2717_v18 }
  0xed   :  { %v298_v24 = vadd.f32 %v297_v17, %v283_v15  ;;  %v261_v25 = vadd.f32 %v2692_v4, %v260_v16  ;;  %v2727_v26 = vpop.f32.mrf.mxu1  ;;  %v285_v32 = vmul.f32 %v2722_v22, %v2722_v22 }
  0xee   :  { %v599_v28 = vadd.f32 %v598_v21, %v584_v19  ;;  %v562_v29 = vadd.f32 %v2694_v5, %v561_v20  ;;  %v2732_v30 = vpop.f32.mrf.mxu0  ;;  %v586_v36 = vmul.f32 %v2727_v26, %v2727_v26 }
  0xef   :  { %v262_v31 = vadd.f32 %v261_v25, %v2722_v22  ;;  %v299_v33 = vadd.f32 %v298_v24, %v284_v23  ;;  %v2737_v34 = vpop.f32.mrf.mxu1  ;;  %v288_v55 = vmul.f32 %v2732_v30, %v2732_v30 }
  0xf0   :  { %v563_v35 = vadd.f32 %v562_v29, %v2727_v26  ;;  %v600_v37 = vadd.f32 %v599_v28, %v585_v27  ;;  %v2742_v38 = vpop.f32.mrf.mxu0  ;;  %v589_v59 = vmul.f32 %v2737_v34, %v2737_v34 }
  0xf1   :  { %v300_v39 = vadd.f32 %v299_v33, %v285_v32  ;;  %v263_v40 = vadd.f32 %v262_v31, %v2742_v38  ;;  %v286_v41 = vmul.f32 %v2742_v38, %v2742_v38  ;;  %v2747_v42 = vpop.f32.mrf.mxu1 }
  0xf2   :  { %v601_v43 = vadd.f32 %v600_v37, %v586_v36  ;;  %v564_v44 = vadd.f32 %v563_v35, %v2747_v42  ;;  %v587_v45 = vmul.f32 %v2747_v42, %v2747_v42  ;;  %v2752_v46 = vpop.f32.mrf.mxu0 }
  0xf3   :  { %v264_v48 = vadd.f32 %v2712_v14, %v263_v40  ;;  %v301_v49 = vadd.f32 %v300_v39, %v286_v41  ;;  %v2757_v50 = vpop.f32.mrf.mxu1  ;;  %v291_v33 = vmul.f32 %v2752_v46, %v2752_v46 }
  0xf4   :  { %v565_v52 = vadd.f32 %v2717_v18, %v564_v44  ;;  %v602_v53 = vadd.f32 %v601_v43, %v587_v45  ;;  %v2762_v54 = vpop.f32.mrf.mxu0  ;;  %v592_v45 = vmul.f32 %v2757_v50, %v2757_v50 }
  0xf5   :  { %v302_v56 = vadd.f32 %v301_v49, %v287_v47  ;;  %v265_v57 = vadd.f32 %v2732_v30, %v264_v48  ;;  %v2767_v58 = vpop.f32.mrf.mxu1  ;;  %v289_v7 = vmul.f32 %v2762_v54, %v2762_v54 }
  0xf6   :  { %v603_v60 = vadd.f32 %v602_v53, %v588_v51  ;;  %v566_v61 = vadd.f32 %v2737_v34, %v565_v52  ;;  %v2772_v62 = vpop.f32.mrf.mxu0  ;;  %v590_v20 = vmul.f32 %v2767_v58, %v2767_v58 }
  0xf7   :  { %v266_v63 = vadd.f32 %v265_v57, %v2762_v54  ;;  %v303_v8 = vadd.f32 %v302_v56, %v288_v55  ;;  %v2777_v9 = vpop.f32.mrf.mxu1  ;;  %v292_v47 = vmul.f32 %v2772_v62, %v2772_v62 }
  0xf8   :  { %v567_v11 = vadd.f32 %v566_v61, %v2767_v58  ;;  %v604_v12 = vadd.f32 %v603_v60, %v589_v59  ;;  %v2780_v13 = vpop.f32.mrf.mxu0  ;;  %v593_v59 = vmul.f32 %v2777_v9, %v2777_v9 }
  0xf9   :  { %v304_v15 = vadd.f32 %v303_v8, %v289_v7  ;;  %v267_v16 = vadd.f32 %v266_v63, %v2780_v13  ;;  %v290_v17 = vmul.f32 %v2780_v13, %v2780_v13  ;;  %v2785_v19 = vpop.f32.mrf.mxu1 }
  0xfa   :  { %v2789_v21 = vpop.f32.mrf.mxu0  ;;  %v568_v23 = vadd.f32 %v567_v11, %v2785_v19  ;;  %v605_v25 = vadd.f32 %v604_v12, %v590_v20  ;;  %v591_v28 = vmul.f32 %v2785_v19, %v2785_v19 }
  0xfb   :  { %v2792_v24 = vpop.f32.mrf.mxu1  ;;  %v305_v27 = vadd.f32 %v304_v15, %v290_v17  ;;  %v268_v31 = vadd.f32 %v2752_v46, %v267_v16 }
  0xfc   :  { %3360 = vst [vmem:[#allocation3_spill] sm:$0xff] %v2792_v24  ;;  %v2796_v29 = vpop.f32.mrf.mxu0  ;;  %v569_v36 = vadd.f32 %v2757_v50, %v568_v23  ;;  %v606_v40 = vadd.f32 %v605_v25, %v591_v28 }
  0xfd   :  { %v2799_v32 = vpop.f32.mrf.mxu1  ;;  %v306_v39 = vadd.f32 %v305_v27, %v291_v33  ;;  %v269_v43 = vadd.f32 %v2772_v62, %v268_v31  ;;  %v293_v60 = vmul.f32 %v2796_v29, %v2796_v29 }
  0xfe   :  { %v2803_v35 = vpop.f32.mrf.mxu0  ;;  %v570_v49 = vadd.f32 %v2777_v9, %v569_v36  ;;  %v607_v52 = vadd.f32 %v606_v40, %v592_v45  ;;  %v594_v11 = vmul.f32 %v2799_v32, %v2799_v32 }
  0xff   :  { %v2806_v37 = vpop.f32.mrf.mxu1  ;;  %v307_v53 = vadd.f32 %v306_v39, %v292_v47  ;;  %v270_v56 = vadd.f32 %v269_v43, %v2796_v29 }
 0x100   :  { %3361 = vst [vmem:[#allocation4_spill] sm:$0xff] %v2806_v37  ;;  %v2808_v41 = vpop.f32.mrf.mxu0  ;;  %v571_v63 = vadd.f32 %v570_v49, %v2799_v32  ;;  %v608_v12 = vadd.f32 %v607_v52, %v593_v59 }
 0x101   :  { %v2811_v44 = vpop.f32.mrf.mxu1  ;;  %v308_v8 = vadd.f32 %v307_v53, %v293_v60  ;;  %v271_v16 = vadd.f32 %v270_v56, %v2808_v41  ;;  %v294_v27 = vmul.f32 %v2808_v41, %v2808_v41 }
 0x102   :  { %3362 = vst [vmem:[#allocation5_spill] sm:$0xff] %v2811_v44  ;;  %v2817_v48 = vpop.f32.mrf.mxu0  ;;  %v572_v39 = vadd.f32 %v571_v63, %v2811_v44  ;;  %v609_v49 = vadd.f32 %v608_v12, %v594_v11  ;;  %v595_v52 = vmul.f32 %v2811_v44, %v2811_v44 }
 0x103   :  { %3363 = vst [vmem:[#allocation6_spill] sm:$0xff] %v2817_v48  ;;  %v2820_v51 = vpop.f32.mrf.mxu1  ;;  %v885_v40 = vmul.f32 %v2817_v48, %v2817_v48  ;;  %v272_v60 = vadd.f32 %v2789_v21, %v271_v16 }
 0x104   :  { %3364 = vst [vmem:[#allocation7_spill] sm:$0xff] %v2820_v51  ;;  %v2822_v55 = vpop.f32.mrf.mxu0  ;;  %v1186_v63 = vmul.f32 %v2820_v51, %v2820_v51 }
 0x105   :  { %3365 = vst [vmem:[#allocation8_spill] sm:$0xff] %v2822_v55  ;;  %v2825_v57 = vpop.f32.mrf.mxu1  ;;  %v883_v17 = vmul.f32 %v2822_v55, %v2822_v55 }
 0x106   :  { %3366 = vst [vmem:[#allocation9_spill] sm:$0xff] %v2825_v57  ;;  %v2831_v61 = vpop.f32.mrf.mxu0  ;;  %v1184_v28 = vmul.f32 %v2825_v57, %v2825_v57 }
 0x107   :  { %3367 = vst [vmem:[#allocation10_spill] sm:$0xff] %v2831_v61  ;;  %v2834_v7 = vpop.f32.mrf.mxu1  ;;  %v886_v11 = vmul.f32 %v2831_v61, %v2831_v61 }
 0x108   :  { %3368 = vst [vmem:[#allocation11_spill] sm:$0xff] %v2834_v7  ;;  %v2838_v15 = vpop.f32.mrf.mxu0 }
 0x109   :  { %3369 = vst [vmem:[#allocation12_spill] sm:$0xff] %v2838_v15  ;;  %v861_v20 = vadd.f32 %v2838_v15, %v2822_v55  ;;  %v884_v23 = vmul.f32 %v2838_v15, %v2838_v15  ;;  %v2847_v25 = vpop.f32.mrf.mxu1 }
 0x10a   :  { %3370 = vst [vmem:[#allocation13_spill] sm:$0xff] %v2847_v25  ;;  %v1162_v31 = vadd.f32 %v2847_v25, %v2825_v57  ;;  %v1185_v33 = vmul.f32 %v2847_v25, %v2847_v25  ;;  %v2857_v36 = vpop.f32.mrf.mxu0 }
 0x10b   :  { %3371 = vst [vmem:[#allocation14_spill] sm:$0xff] %v2857_v36  ;;  %v862_v43 = vadd.f32 %v2817_v48, %v861_v20  ;;  %v899_v45 = vadd.f32 %v884_v23, %v883_v17  ;;  %v2863_v47 = vpop.f32.mrf.mxu1  ;;  %v309_v17 = vadd.f32 %v308_v8, %v294_v27  ;;  %v295_v20 = vmul.f32 %v2789_v21, %v2789_v21 }
 0x10c   :  { %3372 = vst [vmem:[#allocation15_spill] sm:$0xff] %v2863_v47  ;;  %v1163_v53 = vadd.f32 %v2820_v51, %v1162_v31  ;;  %v1200_v56 = vadd.f32 %v1185_v33, %v1184_v28  ;;  %v2868_v59 = vpop.f32.mrf.mxu0  ;;  %v573_v23 = vadd.f32 %v2792_v24, %v572_v39  ;;  %v610_v33 = vadd.f32 %v609_v49, %v595_v52 }
 0x10d   :  { %3373 = vst [vmem:[#allocation16_spill] sm:$0xff] %v2868_v59  ;;  %v900_v25 = vadd.f32 %v899_v45, %v885_v40  ;;  %v2873_v57 = vpop.f32.mrf.mxu1  ;;  %v863_v16 = vadd.f32 %v2831_v61, %v862_v43  ;;  %v887_v40 = vmul.f32 %v2868_v59, %v2868_v59  ;;  %v273_v51 = vadd.f32 %v2803_v35, %v272_v60 }
 0x10e   :  { %3374 = vst [vmem:[#allocation17_spill] sm:$0xff] %v2873_v57  ;;  %v2877_v12 = vpop.f32.mrf.mxu0  ;;  %v1201_v28 = vadd.f32 %v1200_v56, %v1186_v63  ;;  %v1164_v27 = vadd.f32 %v2834_v7, %v1163_v53  ;;  %v1187_v48 = vmul.f32 %v2834_v7, %v2834_v7  ;;  %v596_v43 = vmul.f32 %v2792_v24, %v2792_v24 }
 0x10f   :  { %3375 = vst [vmem:[#allocation18_spill] sm:$0xff] %v2877_v12  ;;  %v2883_v31 = vpop.f32.mrf.mxu1  ;;  %v901_v8 = vadd.f32 %v900_v25, %v886_v11  ;;  %v864_v39 = vadd.f32 %v863_v16, %v2868_v59  ;;  %v310_v49 = vadd.f32 %v309_v17, %v295_v20  ;;  %v296_v53 = vmul.f32 %v2803_v35, %v2803_v35 }
 0x110   :  { %3376 = vst [vmem:[#allocation19_spill] sm:$0xff] %v2883_v31  ;;  %v2888_v45 = vpop.f32.mrf.mxu0  ;;  %v1165_v25 = vadd.f32 %v1164_v27, %v2873_v57  ;;  %v574_v60 = vadd.f32 %v2806_v37, %v573_v23  ;;  %v1188_v11 = vmul.f32 %v2873_v57, %v2873_v57  ;;  %v1202_v16 = vadd.f32 %v1201_v28, %v1187_v48 }
 0x111   :  { %3377 = vst [vmem:[#allocation20_spill] sm:$0xff] %v2888_v45  ;;  %v2894_v56 = vpop.f32.mrf.mxu1  ;;  %v902_v52 = vadd.f32 %v901_v8, %v887_v40  ;;  %v597_v59 = vmul.f32 %v2806_v37, %v2806_v37  ;;  %v611_v17 = vadd.f32 %v610_v33, %v596_v43  ;;  %v865_v20 = vadd.f32 %v864_v39, %v2888_v45 }
 0x112   :  { %3378 = vst [vmem:[#allocation21_spill] sm:$0xff] %v2894_v56  ;;  %v2899_v63 = vpop.f32.mrf.mxu0  ;;  %v888_v40 = vmul.f32 %v2888_v45, %v2888_v45  ;;  %v274_v27 = vrot.slane %v273_v51, 4  ;;  %v1203_v61 = vadd.f32 %v1202_v16, %v1188_v11  ;;  %v1166_v23 = vadd.f32 %v1165_v25, %v2894_v56 }
 0x113   :  { %3379 = vst [vmem:[#allocation22_spill] sm:$0xff] %v2899_v63  ;;  %v2906_v7 = vpop.f32.mrf.mxu1  ;;  %v1189_v48 = vmul.f32 %v2894_v56, %v2894_v56  ;;  %v311_v57 = vadd.f32 %v310_v49, %v296_v53  ;;  %v889_v33 = vmul.f32 %v2857_v36, %v2857_v36  ;;  %v866_v39 = vadd.f32 %v2857_v36, %v865_v20 }
 0x114   :  { %3380 = vst [vmem:[#allocation23_spill] sm:$0xff] %v2906_v7  ;;  %v2913_v8 = vpop.f32.mrf.mxu0  ;;  %v903_v43 = vadd.f32 %v902_v52, %v888_v40  ;;  %v575_v45 = vrot.slane %v574_v60, 4  ;;  %v1190_v11 = vmul.f32 %v2863_v47, %v2863_v47  ;;  %v1167_v25 = vadd.f32 %v2863_v47, %v1166_v23 }
 0x115   :  { %3381 = vst [vmem:[#allocation24_spill] sm:$0xff] %v2913_v8  ;;  %v2918_v28 = vpop.f32.mrf.mxu1  ;;  %v1204_v16 = vadd.f32 %v1203_v61, %v1189_v48  ;;  %v612_v56 = vadd.f32 %v611_v17, %v597_v59  ;;  %v890_v49 = vmul.f32 %v2877_v12, %v2877_v12  ;;  %v867_v37 = vadd.f32 %v2877_v12, %v866_v39 }
 0x116   :  { %3382 = vst [vmem:[#allocation25_spill] sm:$0xff] %v2918_v28  ;;  %v2923_v15 = vpop.f32.mrf.mxu0  ;;  %v904_v53 = vadd.f32 %v903_v43, %v889_v33  ;;  %v275_v52 = vadd.f32 %v274_v27, %v273_v51  ;;  %v1191_v40 = vmul.f32 %v2883_v31, %v2883_v31  ;;  %v1168_v24 = vadd.f32 %v2883_v31, %v1167_v25 }
 0x117   :  { %3383 = vst [vmem:[#allocation26_spill] sm:$0xff] %v2923_v15  ;;  %v2928_v55 = vpop.f32.mrf.mxu1  ;;  %v1205_v36 = vadd.f32 %v1204_v16, %v1190_v11  ;;  %v868_v61 = vadd.f32 %v867_v37, %v2913_v8  ;;  %v891_v59 = vmul.f32 %v2913_v8, %v2913_v8  ;;  %v1192_v27 = vmul.f32 %v2918_v28, %v2918_v28 }
 0x118   :  { %3384 = vst [vmem:[#allocation27_spill] sm:$0xff] %v2928_v55  ;;  %v2933_v20 = vpop.f32.mrf.mxu0  ;;  %v905_v17 = vadd.f32 %v904_v53, %v890_v49  ;;  %v1169_v51 = vadd.f32 %v1168_v24, %v2918_v28  ;;  %v312_v37 = vrot.slane %v311_v57, 4  ;;  %v613_v53 = vrot.slane %v612_v56, 4 }
 0x119   :  { %3385 = vst [vmem:[#allocation28_spill] sm:$0xff] %v2933_v20  ;;  %v2938_v23 = vpop.f32.mrf.mxu1  ;;  %v892_v48 = vmul.f32 %v2933_v20, %v2933_v20  ;;  %v1206_v39 = vadd.f32 %v1205_v36, %v1191_v40  ;;  %v869_v16 = vadd.f32 %v868_v61, %v2933_v20  ;;  %v576_v8 = vadd.f32 %v575_v45, %v574_v60 }
 0x11a   :  { %3386 = vst [vmem:[#allocation29_spill] sm:$0xff] %v2938_v23  ;;  %v2945_v33 = vpop.f32.mrf.mxu0  ;;  %v1193_v43 = vmul.f32 %v2938_v23, %v2938_v23  ;;  %v906_v25 = vadd.f32 %v905_v17, %v891_v59  ;;  %v1170_v47 = vadd.f32 %v1169_v51, %v2938_v23  ;;  %v893_v36 = vmul.f32 %v2899_v63, %v2899_v63 }
 0x11b   :  { %3387 = vst [vmem:[#allocation30_spill] sm:$0xff] %v2945_v33  ;;  %v2952_v11 = vpop.f32.mrf.mxu1  ;;  %v1207_v31 = vadd.f32 %v1206_v39, %v1192_v27  ;;  %v870_v40 = vadd.f32 %v2899_v63, %v869_v16  ;;  %v276_v59 = vrot.slane %v275_v52, 2  ;;  %v1194_v61 = vmul.f32 %v2906_v7, %v2906_v7 }
 0x11c   :  { %3388 = vst [vmem:[#allocation31_spill] sm:$0xff] %v2952_v11  ;;  %v2955_v49 = vpop.f32.mrf.mxu0  ;;  %v907_v28 = vadd.f32 %v906_v25, %v892_v48  ;;  %v1171_v17 = vadd.f32 %v2906_v7, %v1170_v47  ;;  %v313_v51 = vadd.f32 %v312_v37, %v311_v57  ;;  %v894_v45 = vmul.f32 %v2923_v15, %v2923_v15 }
 0x11d   :  { %3389 = vst [vmem:[#allocation32_spill] sm:$0xff] %v2955_v49  ;;  %v2958_v24 = vpop.f32.mrf.mxu1  ;;  %v1208_v27 = vadd.f32 %v1207_v31, %v1193_v43  ;;  %v871_v23 = vadd.f32 %v2923_v15, %v870_v40  ;;  %v614_v48 = vadd.f32 %v613_v53, %v612_v56  ;;  %v1195_v25 = vmul.f32 %v2928_v55, %v2928_v55 }
 0x11e   :  { %3390 = vst [vmem:[#allocation33_spill] sm:$0xff] %v2958_v24  ;;  %v2963_v12 = vpop.f32.mrf.mxu0  ;;  %v908_v60 = vadd.f32 %v907_v28, %v893_v36  ;;  %v1172_v20 = vadd.f32 %v2928_v55, %v1171_v17  ;;  %v895_v57 = vmul.f32 %v2955_v49, %v2955_v49  ;;  %v1196_v56 = vmul.f32 %v2958_v24, %v2958_v24 }
 0x11f   :  { %3391 = vst [vmem:[#allocation34_spill] sm:$0xff] %v2963_v12  ;;  %v2968_v39 = vpop.f32.mrf.mxu1  ;;  %v1209_v63 = vadd.f32 %v1208_v27, %v1194_v61  ;;  %v872_v31 = vadd.f32 %v871_v23, %v2955_v49  ;;  %v577_v40 = vrot.slane %v576_v8, 2  ;;  %v314_v17 = vrot.slane %v313_v51, 2 }
 0x120   :  { %3392 = vst [vmem:[#allocation35_spill] sm:$0xff] %v2968_v39  ;;  %v2973_v16 = vpop.f32.mrf.mxu0  ;;  %v909_v43 = vadd.f32 %v908_v60, %v894_v45  ;;  %v1173_v37 = vadd.f32 %v1172_v20, %v2958_v24  ;;  %v615_v60 = vrot.slane %v614_v48, 2  ;;  %v897_v55 = vmul.f32 %v2945_v33, %v2945_v33 }
 0x121   :  { %3393 = vst [vmem:[#allocation36_spill] sm:$0xff] %v2973_v16  ;;  %v2978_v47 = vpop.f32.mrf.mxu1  ;;  %v896_v28 = vmul.f32 %v2973_v16, %v2973_v16  ;;  %v1210_v53 = vadd.f32 %v1209_v63, %v1195_v25  ;;  %v873_v23 = vadd.f32 %v872_v31, %v2973_v16  ;;  %v277_v24 = vadd.f32 %v276_v59, %v275_v52 }
 0x122   :  { %3394 = vst [vmem:[#allocation37_spill] sm:$0xff] %v2978_v47  ;;  %v1197_v36 = vmul.f32 %v2978_v47, %v2978_v47  ;;  %v910_v61 = vadd.f32 %v909_v43, %v895_v57  ;;  %v1174_v45 = vadd.f32 %v1173_v37, %v2978_v47  ;;  %v1198_v63 = vmul.f32 %v2952_v11, %v2952_v11 }
 0x123   :  { %v1211_v27 = vadd.f32 %v1210_v53, %v1196_v56  ;;  %v874_v20 = vadd.f32 %v2945_v33, %v873_v23  ;;  %v578_v43 = vadd.f32 %v577_v40, %v576_v8  ;;  %v898_v31 = vmul.f32 %v2963_v12, %v2963_v12 }
 0x124   :  { %v911_v7 = vadd.f32 %v910_v61, %v896_v28  ;;  %v1175_v25 = vadd.f32 %v2952_v11, %v1174_v45  ;;  %v1199_v53 = vmul.f32 %v2968_v39, %v2968_v39  ;;  %v315_v52 = vadd.f32 %v314_v17, %v313_v51 }
 0x125   :  { %v1212_v57 = vadd.f32 %v1211_v27, %v1197_v36  ;;  %v875_v37 = vadd.f32 %v2963_v12, %v874_v20  ;;  %v616_v59 = vadd.f32 %v615_v60, %v614_v48  ;;  %v278_v36 = vrot.slane %v277_v24, 1 }
 0x126   :  { %v912_v56 = vadd.f32 %v911_v7, %v897_v55  ;;  %v1176_v23 = vadd.f32 %v2968_v39, %v1175_v25  ;;  %v579_v8 = vrot.slane %v578_v43, 1  ;;  %v316_v20 = vrot.slane %v315_v52, 1 }
 0x127   :  { %v1213_v28 = vadd.f32 %v1212_v57, %v1198_v63  ;;  %v876_v61 = vrot.slane %v875_v37, 4  ;;  %v617_v55 = vrot.slane %v616_v59, 1  ;;  %v279_v25 = vadd.f32 %v278_v36, %v277_v24 }
 0x128   :  { %v913_v47 = vadd.f32 %v912_v56, %v898_v31  ;;  %v1177_v33 = vrot.slane %v1176_v23, 4  ;;  %v580_v63 = vadd.f32 %v579_v8, %v578_v43  ;;  %v317_v57 = vadd.f32 %v316_v20, %v315_v52  ;;  %v1227_v20 = vld [vmem:[%s3322_s2] sm:$0x1] }
 0x129   :  { %v1214_v45 = vadd.f32 %v1213_v28, %v1199_v53  ;;  %v877_v40 = vadd.f32 %v876_v61, %v875_v37  ;;  %v618_v31 = vadd.f32 %v617_v55, %v616_v59 }
 0x12a   :  { %v914_v27 = vrot.slane %v913_v47, 4  ;;  %v1178_v11 = vadd.f32 %v1177_v33, %v1176_v23  ;;  %v581_v33 = vadd.f32 %v580_v63, %v279_v25 }
 0x12b   :  { %v1215_v16 = vrot.slane %v1214_v45, 4  ;;  %v878_v7 = vrot.slane %v877_v40, 2  ;;  %v619_v44 = vadd.f32 %v618_v31, %v317_v57 }
 0x12c   :  { %v915_v12 = vadd.f32 %v914_v27, %v913_v47  ;;  %v1179_v49 = vrot.slane %v1178_v11, 2 }
 0x12d   :  { %v1216_v15 = vadd.f32 %v1215_v16, %v1214_v45  ;;  %v879_v51 = vadd.f32 %v878_v7, %v877_v40 }
 0x12e   :  { %v916_v48 = vrot.slane %v915_v12, 2  ;;  %v1180_v17 = vadd.f32 %v1179_v49, %v1178_v11 }
 0x12f   :  { %v1217_v60 = vrot.slane %v1216_v15, 2  ;;  %v880_v56 = vrot.slane %v879_v51, 1 }
 0x130   :  { %v917_v53 = vadd.f32 %v916_v48, %v915_v12  ;;  %v1181_v37 = vrot.slane %v1180_v17, 1 }
 0x131   :  { %v1218_v28 = vadd.f32 %v1217_v60, %v1216_v15  ;;  %v881_v23 = vadd.f32 %v880_v56, %v879_v51  ;;  %v1251_v15 = vlaneseq }
 0x132   :  { %v918_v61 = vrot.slane %v917_v53, 1  ;;  %v1182_v16 = vadd.f32 %v1181_v37, %v1180_v17 }
 0x133   :  { %v1219_v39 = vrot.slane %v1218_v28, 1  ;;  %v882_v47 = vadd.f32 %v881_v23, %v581_v33  ;;  %v1252_v40 = vshrl.u32 %v1251_v15, 7 }
 0x134   :  { %v919_v27 = vadd.f32 %v918_v61, %v917_v53 }
 0x135   :  { %v1183_v43 = vadd.f32 %v1182_v16, %v882_v47  ;;  %v1220_v45 = vadd.f32 %v1219_v39, %v1218_v28  ;;  %v1253_v55 = vsub.s32 0, %v1252_v40 }
 0x136   :  { %v920_v24 = vadd.f32 %v919_v27, %v619_v44  ;;  %v1231_v44 = vld [vmem:[%s3323_s3] sm:$0x1] }
 0x137   :  { %v1222_v11 = vmul.f32 0.001953125, %v1183_v43 }
 0x138   :  { %v1221_v36 = vadd.f32 %v1220_v45, %v920_v24 }
 0x139   :  { %v1224_v52 = vmul.f32 %v1222_v11, %v1222_v11 }
 0x13a   :  { %v1223_v49 = vmul.f32 0.001953125, %v1221_v36 }
 0x13c   :  { %v1225_v59 = vsub.f32 %v1223_v49, %v1224_v52 }
 0x13e   :  { %v1226_v8 = vmax.f32 %v1225_v59, 0.0 }
 0x140   :  { %v1228_v12 = vadd.f32 1e-05, %v1226_v8 }
 0x142   :  { %2465 = vrsqrt.f32 %v1228_v12 }
 0x14f   :  { %v2466_v7 = vpop.eup %2465 }
 0x150   :  { %v1230_v25 = vmul.f32 %v2466_v7, %v1227_v20 }
 0x152   :  { %v1232_v39 = vmul.f32 %v1230_v25, %v1222_v11  ;;  %v3010_v63 = vrot.slane %v1230_v25, %v1253_v55 }
 0x154   :  { %v1233_v51 = vsub.f32 %v1231_v44, %v1232_v39  ;;  %v1256_v48 = vmul.f32 %v3010_v63, %v2688_v2  ;;  %v1257_v17 = vmul.f32 %v3010_v63, %v2696_v6  ;;  %v1258_v60 = vmul.f32 %v2684_v0, %v3010_v63 }
 0x155   :  { %v1259_v57 = vmul.f32 %v2692_v4, %v3010_v63  ;;  %v1260_v31 = vmul.f32 %v3010_v63, %v2722_v22  ;;  %v1261_v56 = vmul.f32 %v3010_v63, %v2742_v38  ;;  %v1262_v53 = vmul.f32 %v2712_v14, %v3010_v63 }
 0x156   :  { %v1263_v2 = vmul.f32 %v2732_v30, %v3010_v63  ;;  %v1264_v6 = vmul.f32 %v3010_v63, %v2762_v54  ;;  %v1265_v0 = vmul.f32 %v3010_v63, %v2780_v13  ;;  %v1266_v4 = vmul.f32 %v2752_v46, %v3010_v63 }
 0x157   :  { %v1267_v22 = vmul.f32 %v2772_v62, %v3010_v63  ;;  %v1268_v38 = vmul.f32 %v3010_v63, %v2796_v29  ;;  %v1269_v14 = vmul.f32 %v3010_v63, %v2808_v41  ;;  %v1270_v30 = vmul.f32 %v2789_v21, %v3010_v63 }
 0x158   :  { %v1271_v54 = vmul.f32 %v2803_v35, %v3010_v63  ;;  %v3044_v37 = vrot.slane %v1233_v51, %v1253_v55  ;;  %v3048_v46 = vmul.f32 %v3010_v63, %v2690_v3  ;;  %v3052_v62 = vmul.f32 %v3010_v63, %v2704_v10 }
 0x159   :  { %v3056_v13 = vmul.f32 %v2686_v1, %v3010_v63  ;;  %v3060_v21 = vmul.f32 %v2694_v5, %v3010_v63  ;;  %v3064_v29 = vmul.f32 %v3010_v63, %v2727_v26  ;;  %v3068_v3 = vmul.f32 %v3010_v63, %v2747_v42 }
 0x15a   :  { %v1278_v35 = vadd.f32 %v3044_v37, %v1256_v48  ;;  %v1279_v10 = vadd.f32 %v3044_v37, %v1257_v17  ;;  %v1280_v41 = vadd.f32 %v3044_v37, %v1258_v60  ;;  %v1281_v1 = vadd.f32 %v3044_v37, %v1259_v57 }
 0x15b   :  { %v1282_v28 = vadd.f32 %v3044_v37, %v1260_v31  ;;  %v1283_v5 = vadd.f32 %v3044_v37, %v1261_v56  ;;  %v1284_v33 = vadd.f32 %v3044_v37, %v1262_v53  ;;  %v1285_v26 = vadd.f32 %v3044_v37, %v1263_v2 }
 0x15c   :  { %v1286_v23 = vadd.f32 %v3044_v37, %v1264_v6  ;;  %v1287_v42 = vadd.f32 %v3044_v37, %v1265_v0  ;;  %v1288_v61 = vadd.f32 %v3044_v37, %v1266_v4  ;;  %v1289_v47 = vadd.f32 %v3044_v37, %v1267_v22 }
 0x15d   :  { %v1290_v27 = vadd.f32 %v3044_v37, %v1268_v38  ;;  %v1291_v16 = vadd.f32 %v3044_v37, %v1269_v14  ;;  %v1292_v24 = vadd.f32 %v3044_v37, %v1270_v30  ;;  %v1293_v43 = vadd.f32 %v3044_v37, %v1271_v54  ;;  %v3396_v38 = vld [vmem:[#allocation3_spill] sm:$0xff]  ;;  %v3397_v30 = vld [vmem:[#allocation4_spill] sm:$0xff] }
 0x15e   :  { %v1294_v45 = vmax.f32 %v1278_v35, 0.0  ;;  %v1295_v36 = vmax.f32 %v1279_v10, 0.0  ;;  %v1296_v11 = vmax.f32 %v1280_v41, 0.0  ;;  %v1297_v49 = vmax.f32 %v1281_v1, 0.0 }
 0x15f   :  { %v1298_v52 = vmax.f32 %v1282_v28, 0.0  ;;  %v1299_v59 = vmax.f32 %v1283_v5, 0.0  ;;  %v1300_v8 = vmax.f32 %v1284_v33, 0.0  ;;  %v1301_v12 = vmax.f32 %v1285_v26, 0.0 }
 0x160   :  { %v1302_v15 = vmax.f32 %v1286_v23, 0.0  ;;  %v1303_v40 = vmax.f32 %v1287_v42, 0.0  ;;  %v1304_v20 = vmax.f32 %v1288_v61, 0.0  ;;  %v1305_v55 = vmax.f32 %v1289_v47, 0.0 }
 0x161   :  { %v1306_v7 = vmax.f32 %v1290_v27, 0.0  ;;  %v1307_v25 = vmax.f32 %v1291_v16, 0.0  ;;  %v1308_v44 = vmax.f32 %v1292_v24, 0.0  ;;  %v1309_v39 = vmax.f32 %v1293_v43, 0.0 }
 0x162   :  { %v2021_v51 = vpack.c.bf16 %v1295_v36, %v1294_v45  ;;  %v2026_v48 = vpack.c.bf16 %v1297_v49, %v1296_v11  ;;  %v2031_v17 = vpack.c.bf16 %v1299_v59, %v1298_v52  ;;  %v2036_v60 = vpack.c.bf16 %v1301_v12, %v1300_v8 }
 0x163   :  { %v2041_v57 = vpack.c.bf16 %v1303_v40, %v1302_v15  ;;  %v2046_v31 = vpack.c.bf16 %v1305_v55, %v1304_v20  ;;  %v2051_v56 = vpack.c.bf16 %v1307_v25, %v1306_v7  ;;  %v2056_v53 = vpack.c.bf16 %v1309_v39, %v1308_v44  ;;  %v3398_v39 = vld [vmem:[#allocation8_spill] sm:$0xff] }
 0x164   :  { %2022 = vst [vmem:[%s3324_s4] sm:$0xff] %v2021_v51   ;;  %2178 = vst [vmem:[%s3324_s4 + $0x8] sm:$0xff] %v2026_v48   ;;  %v1412_v2 = vmul.f32 %v2717_v18, %v3010_v63  ;;  %v1413_v6 = vmul.f32 %v2737_v34, %v3010_v63  ;;  %v1414_v0 = vmul.f32 %v3010_v63, %v2767_v58  ;;  %v3399_v48 = vld [vmem:[#allocation12_spill] sm:$0xff] }
 0x165   :  { %2179 = vst [vmem:[%s3324_s4 + $0x10] sm:$0xff] %v2031_v17   ;;  %2180 = vst [vmem:[%s3324_s4 + $0x18] sm:$0xff] %v2036_v60   ;;  %v1415_v4 = vmul.f32 %v3010_v63, %v2785_v19  ;;  %v1416_v18 = vmul.f32 %v2757_v50, %v3010_v63  ;;  %v1417_v34 = vmul.f32 %v2777_v9, %v3010_v63  ;;  %v3395_v19 = vld [vmem:[#allocation5_spill] sm:$0xff]  ;;  %v3400_v60 = vld [vmem:[#allocation6_spill] sm:$0xff] }
 0x166   :  { %2181 = vst [vmem:[%s3324_s4 + $0x20] sm:$0xff] %v2041_v57   ;;  %2182 = vst [vmem:[%s3324_s4 + $0x28] sm:$0xff] %v2046_v31   ;;  %v1418_v58 = vmul.f32 %v3010_v63, %v2799_v32  ;;  %v1419_v22 = vmul.f32 %v3010_v63, %v3395_v19  ;;  %v1420_v14 = vmul.f32 %v3396_v38, %v3010_v63  ;;  %v3401_v31 = vld [vmem:[#allocation10_spill] sm:$0xff]  ;;  %v3406_v19 = vld [vmem:[#allocation24_spill] sm:$0xff] }
 0x167   :  { %2183 = vst [vmem:[%s3324_s4 + $0x30] sm:$0xff] %v2051_v56   ;;  %2184 = vst [vmem:[%s3324_s4 + $0x38] sm:$0xff] %v2056_v53   ;;  %v1421_v54 = vmul.f32 %v3397_v30, %v3010_v63  ;;  %v1422_v35 = vadd.f32 %v3048_v46, %v3044_v37  ;;  %v1423_v50 = vadd.f32 %v3052_v62, %v3044_v37  ;;  %v3402_v53 = vld [vmem:[#allocation16_spill] sm:$0xff]  ;;  %v3408_v30 = vld [vmem:[#allocation22_spill] sm:$0xff] }
 0x168   :  { %v1424_v9 = vadd.f32 %v3056_v13, %v3044_v37  ;;  %v1425_v32 = vadd.f32 %v3060_v21, %v3044_v37  ;;  %v1426_v10 = vadd.f32 %v3064_v29, %v3044_v37  ;;  %v1427_v41 = vadd.f32 %v3068_v3, %v3044_v37  ;;  %v3407_v38 = vld [vmem:[#allocation28_spill] sm:$0xff] }
 0x169   :  { %v1428_v1 = vadd.f32 %v1412_v2, %v3044_v37  ;;  %v1429_v28 = vadd.f32 %v1413_v6, %v3044_v37  ;;  %v1430_v46 = vadd.f32 %v1414_v0, %v3044_v37  ;;  %v1431_v62 = vadd.f32 %v1415_v4, %v3044_v37  ;;  %v3403_v6 = vld [vmem:[#allocation20_spill] sm:$0xff]  ;;  %v3404_v4 = vld [vmem:[#allocation14_spill] sm:$0xff] }
 0x16a   :  { %v1432_v5 = vadd.f32 %v1416_v18, %v3044_v37  ;;  %v1433_v13 = vadd.f32 %v1417_v34, %v3044_v37  ;;  %v1434_v21 = vadd.f32 %v1418_v58, %v3044_v37  ;;  %v1435_v33 = vadd.f32 %v1419_v22, %v3044_v37  ;;  %v3405_v34 = vld [vmem:[#allocation18_spill] sm:$0xff] }
 0x16b   :  { %v1436_v29 = vadd.f32 %v1420_v14, %v3044_v37  ;;  %v1437_v3 = vadd.f32 %v1421_v54, %v3044_v37  ;;  %v1438_v26 = vmax.f32 %v1422_v35, 0.0  ;;  %v1439_v23 = vmax.f32 %v1423_v50, 0.0  ;;  %v3409_v35 = vld [vmem:[#allocation26_spill] sm:$0xff] }
 0x16c   :  { %v1440_v42 = vmax.f32 %v1424_v9, 0.0  ;;  %v1441_v61 = vmax.f32 %v1425_v32, 0.0  ;;  %v1442_v47 = vmax.f32 %v1426_v10, 0.0  ;;  %v1443_v27 = vmax.f32 %v1427_v41, 0.0  ;;  %v3410_v9 = vld [vmem:[#allocation32_spill] sm:$0xff] }
 0x16d   :  { %v1444_v16 = vmax.f32 %v1428_v1, 0.0  ;;  %v1445_v24 = vmax.f32 %v1429_v28, 0.0  ;;  %v1446_v43 = vmax.f32 %v1430_v46, 0.0  ;;  %v1447_v45 = vmax.f32 %v1431_v62, 0.0  ;;  %v3411_v10 = vld [vmem:[#allocation36_spill] sm:$0xff]  ;;  %v3412_v1 = vld [vmem:[#allocation30_spill] sm:$0xff] }
 0x16e   :  { %v1448_v36 = vmax.f32 %v1432_v5, 0.0  ;;  %v1449_v11 = vmax.f32 %v1433_v13, 0.0  ;;  %v1450_v49 = vmax.f32 %v1434_v21, 0.0  ;;  %v1451_v52 = vmax.f32 %v1435_v33, 0.0  ;;  %v3413_v46 = vld [vmem:[#allocation34_spill] sm:$0xff] }
 0x16f   :  { %v1452_v59 = vmax.f32 %v1436_v29, 0.0  ;;  %v1453_v8 = vmax.f32 %v1437_v3, 0.0  ;;  %v2061_v12 = vpack.c.bf16 %v1439_v23, %v1438_v26  ;;  %v2066_v15 = vpack.c.bf16 %v1441_v61, %v1440_v42 }
 0x170   :  { %v2071_v40 = vpack.c.bf16 %v1443_v27, %v1442_v47  ;;  %v2076_v20 = vpack.c.bf16 %v1445_v24, %v1444_v16  ;;  %v2081_v55 = vpack.c.bf16 %v1447_v45, %v1446_v43  ;;  %v2086_v7 = vpack.c.bf16 %v1449_v11, %v1448_v36 }
 0x171   :  { %2185 = vst [vmem:[%s3324_s4 + $0x40] sm:$0xff] %v2061_v12   ;;  %2186 = vst [vmem:[%s3324_s4 + $0x48] sm:$0xff] %v2066_v15   ;;  %v2091_v25 = vpack.c.bf16 %v1451_v52, %v1450_v49  ;;  %v2096_v44 = vpack.c.bf16 %v1453_v8, %v1452_v59  ;;  %v1550_v51 = vmul.f32 %v3010_v63, %v3398_v39 }
 0x172   :  { %v1551_v17 = vmul.f32 %v3010_v63, %v3399_v48  ;;  %2187 = vst [vmem:[%s3324_s4 + $0x50] sm:$0xff] %v2071_v40   ;;  %2188 = vst [vmem:[%s3324_s4 + $0x58] sm:$0xff] %v2076_v20   ;;  %v1552_v57 = vmul.f32 %v3400_v60, %v3010_v63  ;;  %v1553_v56 = vmul.f32 %v3401_v31, %v3010_v63 }
 0x173   :  { %2189 = vst [vmem:[%s3324_s4 + $0x60] sm:$0xff] %v2081_v55   ;;  %2190 = vst [vmem:[%s3324_s4 + $0x68] sm:$0xff] %v2086_v7   ;;  %v1554_v2 = vmul.f32 %v3010_v63, %v3402_v53  ;;  %v1555_v0 = vmul.f32 %v3010_v63, %v3403_v6  ;;  %v1556_v18 = vmul.f32 %v3404_v4, %v3010_v63  ;;  %v3414_v6 = vld [vmem:[#allocation9_spill] sm:$0xff] }
 0x174   :  { %2191 = vst [vmem:[%s3324_s4 + $0x70] sm:$0xff] %v2091_v25   ;;  %2192 = vst [vmem:[%s3324_s4 + $0x78] sm:$0xff] %v2096_v44   ;;  %v1557_v58 = vmul.f32 %v3405_v34, %v3010_v63  ;;  %v1558_v22 = vmul.f32 %v3010_v63, %v3406_v19  ;;  %v1559_v14 = vmul.f32 %v3010_v63, %v3407_v38  ;;  %v3415_v4 = vld [vmem:[#allocation13_spill] sm:$0xff]  ;;  %v3416_v34 = vld [vmem:[#allocation7_spill] sm:$0xff] }
 0x175   :  { %v1560_v54 = vmul.f32 %v3408_v30, %v3010_v63  ;;  %v1561_v50 = vmul.f32 %v3409_v35, %v3010_v63  ;;  %v1562_v32 = vmul.f32 %v3010_v63, %v3410_v9  ;;  %v1563_v41 = vmul.f32 %v3010_v63, %v3411_v10  ;;  %v3417_v19 = vld [vmem:[#allocation11_spill] sm:$0xff]  ;;  %v3418_v38 = vld [vmem:[#allocation17_spill] sm:$0xff] }
 0x176   :  { %v1564_v28 = vmul.f32 %v3412_v1, %v3010_v63  ;;  %v1565_v62 = vmul.f32 %v3413_v46, %v3010_v63  ;;  %v1566_v5 = vadd.f32 %v1550_v51, %v3044_v37  ;;  %v1567_v13 = vadd.f32 %v1551_v17, %v3044_v37  ;;  %v3419_v30 = vld [vmem:[#allocation21_spill] sm:$0xff]  ;;  %v3420_v35 = vld [vmem:[#allocation15_spill] sm:$0xff] }
 0x177   :  { %v1568_v21 = vadd.f32 %v1552_v57, %v3044_v37  ;;  %v1569_v33 = vadd.f32 %v1553_v56, %v3044_v37  ;;  %v1570_v29 = vadd.f32 %v1554_v2, %v3044_v37  ;;  %v1571_v3 = vadd.f32 %v1555_v0, %v3044_v37  ;;  %v3421_v9 = vld [vmem:[#allocation19_spill] sm:$0xff]  ;;  %v3422_v10 = vld [vmem:[#allocation25_spill] sm:$0xff] }
 0x178   :  { %v1572_v26 = vadd.f32 %v1556_v18, %v3044_v37  ;;  %v1573_v23 = vadd.f32 %v1557_v58, %v3044_v37  ;;  %v1574_v42 = vadd.f32 %v1558_v22, %v3044_v37  ;;  %v1575_v61 = vadd.f32 %v1559_v14, %v3044_v37  ;;  %v3423_v1 = vld [vmem:[#allocation29_spill] sm:$0xff]  ;;  %v3424_v46 = vld [vmem:[#allocation23_spill] sm:$0xff] }
 0x179   :  { %v1576_v47 = vadd.f32 %v1560_v54, %v3044_v37  ;;  %v1577_v27 = vadd.f32 %v1561_v50, %v3044_v37  ;;  %v1578_v16 = vadd.f32 %v1562_v32, %v3044_v37  ;;  %v1579_v24 = vadd.f32 %v1563_v41, %v3044_v37 }
 0x17a   :  { %v1580_v43 = vadd.f32 %v1564_v28, %v3044_v37  ;;  %v1581_v45 = vadd.f32 %v1565_v62, %v3044_v37  ;;  %v1582_v36 = vmax.f32 %v1566_v5, 0.0  ;;  %v1583_v11 = vmax.f32 %v1567_v13, 0.0  ;;  %v3425_v5 = vld [vmem:[#allocation27_spill] sm:$0xff] }
 0x17b   :  { %v1584_v49 = vmax.f32 %v1568_v21, 0.0  ;;  %v1585_v52 = vmax.f32 %v1569_v33, 0.0  ;;  %v1586_v59 = vmax.f32 %v1570_v29, 0.0  ;;  %v1587_v8 = vmax.f32 %v1571_v3, 0.0  ;;  %v3426_v21 = vld [vmem:[#allocation33_spill] sm:$0xff] }
 0x17c   :  { %v1588_v12 = vmax.f32 %v1572_v26, 0.0  ;;  %v1589_v15 = vmax.f32 %v1573_v23, 0.0  ;;  %v1590_v40 = vmax.f32 %v1574_v42, 0.0  ;;  %v1591_v20 = vmax.f32 %v1575_v61, 0.0  ;;  %v3427_v29 = vld [vmem:[#allocation37_spill] sm:$0xff]  ;;  %v3428_v26 = vld [vmem:[#allocation31_spill] sm:$0xff] }
 0x17d   :  { %v1592_v55 = vmax.f32 %v1576_v47, 0.0  ;;  %v1593_v7 = vmax.f32 %v1577_v27, 0.0  ;;  %v1594_v25 = vmax.f32 %v1578_v16, 0.0  ;;  %v1595_v44 = vmax.f32 %v1579_v24, 0.0  ;;  %v3429_v42 = vld [vmem:[#allocation35_spill] sm:$0xff] }
 0x17e   :  { %v1596_v39 = vmax.f32 %v1580_v43, 0.0  ;;  %v1597_v51 = vmax.f32 %v1581_v45, 0.0  ;;  %v2101_v48 = vpack.c.bf16 %v1583_v11, %v1582_v36  ;;  %v2106_v17 = vpack.c.bf16 %v1585_v52, %v1584_v49 }
 0x17f   :  { %v2111_v60 = vpack.c.bf16 %v1587_v8, %v1586_v59  ;;  %v2116_v57 = vpack.c.bf16 %v1589_v15, %v1588_v12  ;;  %v2121_v31 = vpack.c.bf16 %v1591_v20, %v1590_v40  ;;  %v2126_v56 = vpack.c.bf16 %v1593_v7, %v1592_v55 }
 0x180   :  { %2193 = vst [vmem:[%s3324_s4 + $0x80] sm:$0xff] %v2101_v48   ;;  %2194 = vst [vmem:[%s3324_s4 + $0x88] sm:$0xff] %v2106_v17   ;;  %v2131_v53 = vpack.c.bf16 %v1595_v44, %v1594_v25  ;;  %v2136_v2 = vpack.c.bf16 %v1597_v51, %v1596_v39  ;;  %v1694_v0 = vmul.f32 %v3010_v63, %v3414_v6 }
 0x181   :  { %v1695_v18 = vmul.f32 %v3010_v63, %v3415_v4  ;;  %2195 = vst [vmem:[%s3324_s4 + $0x90] sm:$0xff] %v2111_v60   ;;  %2196 = vst [vmem:[%s3324_s4 + $0x98] sm:$0xff] %v2116_v57   ;;  %v1696_v58 = vmul.f32 %v3416_v34, %v3010_v63  ;;  %v1697_v22 = vmul.f32 %v3417_v19, %v3010_v63 }
 0x182   :  { %2197 = vst [vmem:[%s3324_s4 + $0xa0] sm:$0xff] %v2121_v31   ;;  %2198 = vst [vmem:[%s3324_s4 + $0xa8] sm:$0xff] %v2126_v56   ;;  %v1698_v14 = vmul.f32 %v3010_v63, %v3418_v38  ;;  %v1699_v54 = vmul.f32 %v3010_v63, %v3419_v30  ;;  %v1700_v50 = vmul.f32 %v3420_v35, %v3010_v63 }
 0x183   :  { %2199 = vst [vmem:[%s3324_s4 + $0xb0] sm:$0xff] %v2131_v53   ;;  %2200 = vst [vmem:[%s3324_s4 + $0xb8] sm:$0xff] %v2136_v2   ;;  %v1701_v32 = vmul.f32 %v3421_v9, %v3010_v63  ;;  %v1702_v41 = vmul.f32 %v3010_v63, %v3422_v10  ;;  %v1703_v28 = vmul.f32 %v3010_v63, %v3423_v1 }
 0x184   :  { %v1704_v62 = vmul.f32 %v3424_v46, %v3010_v63  ;;  %v1705_v13 = vmul.f32 %v3425_v5, %v3010_v63  ;;  %v1706_v33 = vmul.f32 %v3010_v63, %v3426_v21  ;;  %v1707_v3 = vmul.f32 %v3010_v63, %v3427_v29 }
 0x185   :  { %v1708_v23 = vmul.f32 %v3428_v26, %v3010_v63  ;;  %v1709_v61 = vmul.f32 %v3429_v42, %v3010_v63  ;;  %v1710_v47 = vadd.f32 %v1694_v0, %v3044_v37  ;;  %v1711_v27 = vadd.f32 %v1695_v18, %v3044_v37 }
 0x186   :  { %v1712_v16 = vadd.f32 %v1696_v58, %v3044_v37  ;;  %v1713_v24 = vadd.f32 %v1697_v22, %v3044_v37  ;;  %v1714_v43 = vadd.f32 %v1698_v14, %v3044_v37  ;;  %v1715_v45 = vadd.f32 %v1699_v54, %v3044_v37 }
 0x187   :  { %v1716_v36 = vadd.f32 %v1700_v50, %v3044_v37  ;;  %v1717_v11 = vadd.f32 %v1701_v32, %v3044_v37  ;;  %v1718_v49 = vadd.f32 %v1702_v41, %v3044_v37  ;;  %v1719_v63 = vadd.f32 %v1703_v28, %v3044_v37 }
 0x188   :  { %v1720_v52 = vadd.f32 %v1704_v62, %v3044_v37  ;;  %v1721_v59 = vadd.f32 %v1705_v13, %v3044_v37  ;;  %v1722_v8 = vadd.f32 %v1706_v33, %v3044_v37  ;;  %v1723_v12 = vadd.f32 %v1707_v3, %v3044_v37 }
 0x189   :  { %v1724_v15 = vadd.f32 %v1708_v23, %v3044_v37  ;;  %v1725_v40 = vadd.f32 %v1709_v61, %v3044_v37  ;;  %v1726_v20 = vmax.f32 %v1710_v47, 0.0  ;;  %v1727_v55 = vmax.f32 %v1711_v27, 0.0 }
 0x18a   :  { %v1728_v7 = vmax.f32 %v1712_v16, 0.0  ;;  %v1729_v25 = vmax.f32 %v1713_v24, 0.0  ;;  %v1730_v44 = vmax.f32 %v1714_v43, 0.0  ;;  %v1731_v39 = vmax.f32 %v1715_v45, 0.0 }
 0x18b   :  { %v1732_v51 = vmax.f32 %v1716_v36, 0.0  ;;  %v1733_v48 = vmax.f32 %v1717_v11, 0.0  ;;  %v1734_v17 = vmax.f32 %v1718_v49, 0.0  ;;  %v1735_v60 = vmax.f32 %v1719_v63, 0.0 }
 0x18c   :  { %v1736_v57 = vmax.f32 %v1720_v52, 0.0  ;;  %v1737_v31 = vmax.f32 %v1721_v59, 0.0  ;;  %v1738_v56 = vmax.f32 %v1722_v8, 0.0  ;;  %v1739_v53 = vmax.f32 %v1723_v12, 0.0 }
 0x18d   :  { %v1740_v2 = vmax.f32 %v1724_v15, 0.0  ;;  %v1741_v6 = vmax.f32 %v1725_v40, 0.0  ;;  %v2141_v0 = vpack.c.bf16 %v1727_v55, %v1726_v20  ;;  %v2146_v4 = vpack.c.bf16 %v1729_v25, %v1728_v7 }
 0x18e   :  { %v2151_v18 = vpack.c.bf16 %v1731_v39, %v1730_v44  ;;  %v2156_v37 = vpack.c.bf16 %v1733_v48, %v1732_v51  ;;  %v2161_v34 = vpack.c.bf16 %v1735_v60, %v1734_v17  ;;  %v2166_v58 = vpack.c.bf16 %v1737_v31, %v1736_v57 }
 0x18f   :  { %2201 = vst [vmem:[%s3324_s4 + $0xc0] sm:$0xff] %v2141_v0   ;;  %2202 = vst [vmem:[%s3324_s4 + $0xc8] sm:$0xff] %v2146_v4   ;;  %v2171_v19 = vpack.c.bf16 %v1739_v53, %v1738_v56  ;;  %v2176_v22 = vpack.c.bf16 %v1741_v6, %v1740_v2 }
 0x190   :  { %2203 = vst [vmem:[%s3324_s4 + $0xd0] sm:$0xff] %v2151_v18   ;;  %2204 = vst [vmem:[%s3324_s4 + $0xd8] sm:$0xff] %v2156_v37  }
 0x191   :  { %2205 = vst [vmem:[%s3324_s4 + $0xe0] sm:$0xff] %v2161_v34   ;;  %2206 = vst [vmem:[%s3324_s4 + $0xe8] sm:$0xff] %v2166_v58  }
 0x192   :  { %2207 = vst [vmem:[%s3324_s4 + $0xf0] sm:$0xff] %v2171_v19   ;;  %2208 = vst [vmem:[%s3324_s4 + $0xf8] sm:$0xff] %v2176_v22  }

// kernel: dc_discriminator_forward.5
= control target key start
LH: loop header
LB: loop body
LE: loop exit
PB: predicated region body
PF: predicated region fallthrough
CT: control target
= control target key end

     0   :  { %s861_s1 = inlined_call_operand.vmem [shape: bf16[128,128], index: 1, kind: input, shape index: {}]   ;;  %s862_s0 = inlined_call_operand.vmem [shape: bf16[128,128], index: 0, kind: input, shape index: {}]   ;;  %s863_s2 = inlined_call_operand.vmem [shape: f32[1,128], index: 2, kind: input, shape index: {}]   ;;  %s864_s3 = inlined_call_operand.vmem [shape: f32[1,128], index: 3, kind: input, shape index: {}]   ;;  %s865_s4 = inlined_call_operand.vmem [shape: bf16[128,128], index: 4, kind: output, shape index: {}]  }
   0x1   :  { %v650_v0 = vld [vmem:[%s861_s1 + $0x38] sm:$0xff]   ;;  %v651_v1 = vld [vmem:[%s861_s1 + $0x30] sm:$0xff]   ;;  %v652_v2 = vld [vmem:[%s861_s1 + $0x28] sm:$0xff]  }
   0x2   :  { %602 = vmatprep.subr.bf16.mxu0 %v650_v0  ;;  %634 = vmatprep.subr.bf16.mxu1 %v650_v0  ;;  %v653_v3 = vld [vmem:[%s861_s1 + $0x20] sm:$0xff]   ;;  %v654_v5 = vld [vmem:[%s861_s1 + $0x18] sm:$0xff]   ;;  %v655_v7 = vld [vmem:[%s861_s1 + $0x10] sm:$0xff]  }
   0x3   :  { %603 = vmatpush3.bf16.msra.mxu0 %v650_v0  ;;  %642 = vmatpush3.bf16.msra.mxu1 %v650_v0  ;;  %v658_v4 = vld [vmem:[%s862_s0] sm:$0xff]   ;;  %v656_v8 = vld [vmem:[%s861_s1 + $0x8] sm:$0xff]   ;;  %v660_v12 = vld [vmem:[%s862_s0 + $0x10] sm:$0xff]  }
   0x4   :  { %604 = vmatprep.subr.bf16.mxu0 %v651_v1  ;;  %635 = vmatprep.subr.bf16.mxu1 %v651_v1  ;;  %v662_v6 = vld [vmem:[%s862_s0 + $0x20] sm:$0xff]   ;;  %v659_v10 = vld [vmem:[%s862_s0 + $0x8] sm:$0xff]   ;;  %v664_v13 = vld [vmem:[%s862_s0 + $0x30] sm:$0xff]  }
   0x5   :  { %618 = vmatprep.mubr.bf16.mxu0 %v658_v4  ;;  %626 = vmatprep.mubr.bf16.mxu1 %v662_v6  ;;  %v657_v9 = vld [vmem:[%s861_s1] sm:$0xff]   ;;  %v663_v11 = vld [vmem:[%s862_s0 + $0x28] sm:$0xff]   ;;  %v661_v14 = vld [vmem:[%s862_s0 + $0x18] sm:$0xff]  }
   0x6   :  { %v665_v15 = vld [vmem:[%s862_s0 + $0x38] sm:$0xff]  }
   0x7   :  { %605 = vmatpush3.bf16.msra.mxu0 %v651_v1  ;;  %643 = vmatpush3.bf16.msra.mxu1 %v651_v1 }
   0x8   :  { %606 = vmatprep.subr.bf16.mxu0 %v652_v2  ;;  %636 = vmatprep.subr.bf16.mxu1 %v652_v2 }
   0xb   :  { %607 = vmatpush3.bf16.msra.mxu0 %v652_v2  ;;  %644 = vmatpush3.bf16.msra.mxu1 %v652_v2 }
   0xc   :  { %608 = vmatprep.subr.bf16.mxu0 %v653_v3  ;;  %637 = vmatprep.subr.bf16.mxu1 %v653_v3 }
   0xf   :  { %609 = vmatpush3.bf16.msra.mxu0 %v653_v3  ;;  %645 = vmatpush3.bf16.msra.mxu1 %v653_v3 }
  0x10   :  { %610 = vmatprep.subr.bf16.mxu0 %v654_v5  ;;  %638 = vmatprep.subr.bf16.mxu1 %v654_v5 }
  0x13   :  { %611 = vmatpush3.bf16.msra.mxu0 %v654_v5  ;;  %646 = vmatpush3.bf16.msra.mxu1 %v654_v5 }
  0x14   :  { %612 = vmatprep.subr.bf16.mxu0 %v655_v7  ;;  %639 = vmatprep.subr.bf16.mxu1 %v655_v7 }
  0x17   :  { %613 = vmatpush3.bf16.msra.mxu0 %v655_v7  ;;  %647 = vmatpush3.bf16.msra.mxu1 %v655_v7 }
  0x18   :  { %614 = vmatprep.subr.bf16.mxu0 %v656_v8  ;;  %640 = vmatprep.subr.bf16.mxu1 %v656_v8 }
  0x1b   :  { %615 = vmatpush3.bf16.msra.mxu0 %v656_v8  ;;  %648 = vmatpush3.bf16.msra.mxu1 %v656_v8 }
  0x1c   :  { %616 = vmatprep.subr.bf16.mxu0 %v657_v9  ;;  %641 = vmatprep.subr.bf16.mxu1 %v657_v9 }
  0x1f   :  { %617 = vmatpush3.bf16.msra.mxu0 %v657_v9  ;;  %649 = vmatpush3.bf16.msra.mxu1 %v657_v9 }
  0x22   :  { %619 = vmatmul.mubr.bf16.vlgmr.msra.gmra.mxu0 %v659_v10  ;;  %627 = vmatmul.mubr.bf16.vlgmr.msra.gmra.mxu1 %v663_v11 }
  0x23   :  { %622 = vmatprep.mubr.bf16.mxu0 %v660_v12  ;;  %630 = vmatprep.mubr.bf16.mxu1 %v664_v13 }
  0x2a   :  { %623 = vmatmul.mubr.bf16.gmra.mxu0 %v661_v14  ;;  %631 = vmatmul.mubr.bf16.gmra.mxu1 %v665_v15 }
  0xe2   :  { %v741_v16 = vpop.f32.mrf.mxu0  ;;  %v743_v17 = vpop.f32.mrf.mxu1 }
  0xe3   :  { %v283_v27 = vmul.f32 %v741_v16, %v741_v16  ;;  %v291_v58 = vmul.f32 %v743_v17, %v743_v17 }
  0xe4   :  { %v745_v18 = vpop.f32.mrf.mxu0  ;;  %v749_v20 = vpop.f32.mrf.mxu1 }
  0xe5   :  { %v281_v22 = vmul.f32 %v745_v18, %v745_v18  ;;  %v289_v51 = vmul.f32 %v749_v20, %v749_v20 }
  0xe6   :  { %v747_v19 = vpop.f32.mrf.mxu0  ;;  %v761_v26 = vpop.f32.mrf.mxu1 }
  0xe7   :  { %v284_v31 = vmul.f32 %v747_v19, %v747_v19  ;;  %v292_v61 = vmul.f32 %v761_v26, %v761_v26 }
  0xe8   :  { %v751_v21 = vpop.f32.mrf.mxu0  ;;  %v773_v35 = vpop.f32.mrf.mxu1 }
  0xe9   :  { %v259_v23 = vadd.f32 %v751_v21, %v745_v18  ;;  %v282_v24 = vmul.f32 %v751_v21, %v751_v21  ;;  %v290_v55 = vmul.f32 %v773_v35, %v773_v35 }
  0xea   :  { %v759_v25 = vpop.f32.mrf.mxu0  ;;  %v783_v43 = vpop.f32.mrf.mxu1 }
  0xeb   :  { %v260_v28 = vadd.f32 %v741_v16, %v259_v23  ;;  %v297_v29 = vadd.f32 %v282_v24, %v281_v22  ;;  %v287_v44 = vmul.f32 %v759_v25, %v759_v25  ;;  %v295_v7 = vmul.f32 %v783_v43, %v783_v43 }
  0xec   :  { %v766_v30 = vpop.f32.mrf.mxu0  ;;  %v791_v50 = vpop.f32.mrf.mxu1 }
  0xed   :  { %v298_v32 = vadd.f32 %v297_v29, %v283_v27  ;;  %v261_v33 = vadd.f32 %v747_v19, %v260_v28  ;;  %v285_v37 = vmul.f32 %v766_v30, %v766_v30  ;;  %v293_v2 = vmul.f32 %v791_v50, %v791_v50 }
  0xee   :  { %v771_v34 = vpop.f32.mrf.mxu0  ;;  %v799_v57 = vpop.f32.mrf.mxu1 }
  0xef   :  { %v262_v36 = vadd.f32 %v261_v33, %v766_v30  ;;  %v299_v38 = vadd.f32 %v298_v32, %v284_v31  ;;  %v288_v47 = vmul.f32 %v771_v34, %v771_v34  ;;  %v296_v10 = vmul.f32 %v799_v57, %v799_v57 }
  0xf0   :  { %v778_v39 = vpop.f32.mrf.mxu0  ;;  %v231_v0 = vpop.f32.mrf.mxu1 }
  0xf1   :  { %v300_v40 = vadd.f32 %v299_v38, %v285_v37  ;;  %v263_v41 = vadd.f32 %v262_v36, %v778_v39  ;;  %v286_v42 = vmul.f32 %v778_v39, %v778_v39  ;;  %v294_v6 = vmul.f32 %v231_v0, %v231_v0 }
  0xf3   :  { %v264_v45 = vadd.f32 %v759_v25, %v263_v41  ;;  %v301_v46 = vadd.f32 %v300_v40, %v286_v42 }
  0xf5   :  { %v265_v48 = vadd.f32 %v771_v34, %v264_v45  ;;  %v302_v49 = vadd.f32 %v301_v46, %v287_v44  ;;  %v348_v45 = vlaneseq }
  0xf7   :  { %v303_v52 = vadd.f32 %v302_v49, %v288_v47  ;;  %v266_v53 = vadd.f32 %v265_v48, %v749_v20  ;;  %v349_v46 = vshrl.u32 %v348_v45, 7  ;;  %v324_v47 = vld [vmem:[%s863_s2] sm:$0x1] }
  0xf9   :  { %v267_v54 = vadd.f32 %v266_v53, %v773_v35  ;;  %v304_v56 = vadd.f32 %v303_v52, %v289_v51  ;;  %v350_v48 = vsub.s32 0, %v349_v46  ;;  %v328_v52 = vld [vmem:[%s864_s3] sm:$0x1] }
  0xfb   :  { %v268_v59 = vadd.f32 %v743_v17, %v267_v54  ;;  %v305_v60 = vadd.f32 %v304_v56, %v290_v55 }
  0xfd   :  { %v306_v62 = vadd.f32 %v305_v60, %v291_v58  ;;  %v269_v63 = vadd.f32 %v761_v26, %v268_v59 }
  0xff   :  { %v270_v1 = vadd.f32 %v269_v63, %v791_v50  ;;  %v307_v3 = vadd.f32 %v306_v62, %v292_v61 }
 0x101   :  { %v308_v4 = vadd.f32 %v307_v3, %v293_v2  ;;  %v271_v5 = vadd.f32 %v270_v1, %v231_v0 }
 0x103   :  { %v272_v8 = vadd.f32 %v783_v43, %v271_v5  ;;  %v309_v9 = vadd.f32 %v308_v4, %v294_v6 }
 0x105   :  { %v273_v11 = vadd.f32 %v799_v57, %v272_v8  ;;  %v310_v12 = vadd.f32 %v309_v9, %v295_v7 }
 0x107   :  { %v274_v13 = vrot.slane %v273_v11, 4  ;;  %v311_v14 = vadd.f32 %v310_v12, %v296_v10 }
 0x109   :  { %v275_v15 = vadd.f32 %v274_v13, %v273_v11  ;;  %v312_v22 = vrot.slane %v311_v14, 4 }
 0x10b   :  { %v276_v23 = vrot.slane %v275_v15, 2  ;;  %v313_v24 = vadd.f32 %v312_v22, %v311_v14 }
 0x10d   :  { %v277_v27 = vadd.f32 %v276_v23, %v275_v15  ;;  %v314_v28 = vrot.slane %v313_v24, 2 }
 0x10f   :  { %v278_v29 = vrot.slane %v277_v27, 1  ;;  %v315_v31 = vadd.f32 %v314_v28, %v313_v24 }
 0x111   :  { %v279_v32 = vadd.f32 %v278_v29, %v277_v27  ;;  %v316_v33 = vrot.slane %v315_v31, 1 }
 0x113   :  { %v317_v36 = vadd.f32 %v316_v33, %v315_v31  ;;  %v319_v37 = vmul.f32 0.0078125, %v279_v32 }
 0x115   :  { %v320_v38 = vmul.f32 0.0078125, %v317_v36  ;;  %v321_v40 = vmul.f32 %v319_v37, %v319_v37 }
 0x117   :  { %v322_v41 = vsub.f32 %v320_v38, %v321_v40 }
 0x119   :  { %v323_v42 = vmax.f32 %v322_v41, 0.0 }
 0x11b   :  { %v325_v44 = vadd.f32 1e-05, %v323_v42 }
 0x11d   :  { %666 = vrsqrt.f32 %v325_v44 }
 0x12a   :  { %v667_v49 = vpop.eup %666 }
 0x12b   :  { %v327_v51 = vmul.f32 %v667_v49, %v324_v47 }
 0x12d   :  { %v329_v53 = vmul.f32 %v327_v51, %v319_v37  ;;  %v351_v54 = vrot.slane %v327_v51, %v350_v48 }
 0x12f   :  { %v330_v55 = vsub.f32 %v328_v52, %v329_v53  ;;  %v353_v56 = vmul.f32 %v351_v54, %v745_v18  ;;  %v354_v58 = vmul.f32 %v351_v54, %v751_v21  ;;  %v355_v59 = vmul.f32 %v741_v16, %v351_v54 }
 0x130   :  { %v356_v60 = vmul.f32 %v747_v19, %v351_v54  ;;  %v357_v61 = vmul.f32 %v351_v54, %v766_v30  ;;  %v358_v62 = vmul.f32 %v351_v54, %v778_v39  ;;  %v359_v63 = vmul.f32 %v759_v25, %v351_v54 }
 0x131   :  { %v360_v1 = vmul.f32 %v771_v34, %v351_v54  ;;  %v361_v2 = vmul.f32 %v351_v54, %v749_v20  ;;  %v362_v3 = vmul.f32 %v351_v54, %v773_v35  ;;  %v363_v18 = vmul.f32 %v743_v17, %v351_v54 }
 0x132   :  { %v364_v21 = vmul.f32 %v761_v26, %v351_v54  ;;  %v373_v4 = vrot.slane %v330_v55, %v350_v48  ;;  %v365_v16 = vmul.f32 %v351_v54, %v791_v50  ;;  %v366_v19 = vmul.f32 %v351_v54, %v231_v0 }
 0x133   :  { %v367_v30 = vmul.f32 %v783_v43, %v351_v54  ;;  %v368_v39 = vmul.f32 %v799_v57, %v351_v54 }
 0x134   :  { %v375_v5 = vadd.f32 %v373_v4, %v353_v56  ;;  %v376_v25 = vadd.f32 %v373_v4, %v354_v58  ;;  %v377_v6 = vadd.f32 %v373_v4, %v355_v59  ;;  %v378_v34 = vadd.f32 %v373_v4, %v356_v60 }
 0x135   :  { %v379_v7 = vadd.f32 %v373_v4, %v357_v61  ;;  %v380_v20 = vadd.f32 %v373_v4, %v358_v62  ;;  %v381_v8 = vadd.f32 %v373_v4, %v359_v63  ;;  %v382_v35 = vadd.f32 %v373_v4, %v360_v1 }
 0x136   :  { %v383_v9 = vadd.f32 %v373_v4, %v361_v2  ;;  %v384_v17 = vadd.f32 %v373_v4, %v362_v3  ;;  %v385_v10 = vadd.f32 %v373_v4, %v363_v18  ;;  %v386_v26 = vadd.f32 %v373_v4, %v364_v21 }
 0x137   :  { %v387_v11 = vadd.f32 %v373_v4, %v365_v16  ;;  %v388_v12 = vadd.f32 %v373_v4, %v366_v19  ;;  %v389_v50 = vadd.f32 %v373_v4, %v367_v30  ;;  %v390_v0 = vadd.f32 %v373_v4, %v368_v39 }
 0x138   :  { %v391_v13 = vmax.f32 %v375_v5, 0.0  ;;  %v392_v43 = vmax.f32 %v376_v25, 0.0  ;;  %v393_v14 = vmax.f32 %v377_v6, 0.0  ;;  %v394_v57 = vmax.f32 %v378_v34, 0.0 }
 0x139   :  { %v395_v15 = vmax.f32 %v379_v7, 0.0  ;;  %v396_v22 = vmax.f32 %v380_v20, 0.0  ;;  %v397_v23 = vmax.f32 %v381_v8, 0.0  ;;  %v398_v24 = vmax.f32 %v382_v35, 0.0 }
 0x13a   :  { %v399_v27 = vmax.f32 %v383_v9, 0.0  ;;  %v400_v28 = vmax.f32 %v384_v17, 0.0  ;;  %v401_v29 = vmax.f32 %v385_v10, 0.0  ;;  %v402_v31 = vmax.f32 %v386_v26, 0.0 }
 0x13b   :  { %v403_v32 = vmax.f32 %v387_v11, 0.0  ;;  %v404_v33 = vmax.f32 %v388_v12, 0.0  ;;  %v405_v36 = vmax.f32 %v389_v50, 0.0  ;;  %v406_v37 = vmax.f32 %v390_v0, 0.0 }
 0x13c   :  { %v542_v38 = vpack.c.bf16 %v392_v43, %v391_v13  ;;  %v547_v40 = vpack.c.bf16 %v394_v57, %v393_v14  ;;  %v552_v41 = vpack.c.bf16 %v396_v22, %v395_v15  ;;  %v557_v42 = vpack.c.bf16 %v398_v24, %v397_v23 }
 0x13d   :  { %v562_v44 = vpack.c.bf16 %v400_v28, %v399_v27  ;;  %v567_v45 = vpack.c.bf16 %v402_v31, %v401_v29  ;;  %v572_v46 = vpack.c.bf16 %v404_v33, %v403_v32  ;;  %v577_v47 = vpack.c.bf16 %v406_v37, %v405_v36 }
 0x13e   :  { %543 = vst [vmem:[%s865_s4] sm:$0xff] %v542_v38   ;;  %579 = vst [vmem:[%s865_s4 + $0x8] sm:$0xff] %v547_v40  }
 0x13f   :  { %580 = vst [vmem:[%s865_s4 + $0x10] sm:$0xff] %v552_v41   ;;  %581 = vst [vmem:[%s865_s4 + $0x18] sm:$0xff] %v557_v42  }
 0x140   :  { %582 = vst [vmem:[%s865_s4 + $0x20] sm:$0xff] %v562_v44   ;;  %583 = vst [vmem:[%s865_s4 + $0x28] sm:$0xff] %v567_v45  }
 0x141   :  { %584 = vst [vmem:[%s865_s4 + $0x30] sm:$0xff] %v572_v46   ;;  %585 = vst [vmem:[%s865_s4 + $0x38] sm:$0xff] %v577_v47  }

// kernel: dc_discriminator_forward.6
= control target key start
LH: loop header
LB: loop body
LE: loop exit
PB: predicated region body
PF: predicated region fallthrough
CT: control target
= control target key end

     0   :  { %s1055_s1 = inlined_call_operand.vmem [shape: bf16[256,128], index: 1, kind: input, shape index: {}]   ;;  %s1056_s0 = inlined_call_operand.vmem [shape: bf16[128,256], index: 0, kind: input, shape index: {}]   ;;  %s1057_s2 = inlined_call_operand.vmem [shape: f32[1,128], index: 2, kind: input, shape index: {}]   ;;  %s1058_s3 = inlined_call_operand.vmem [shape: f32[1,128], index: 3, kind: input, shape index: {}]   ;;  %s1059_s4 = inlined_call_operand.vmem [shape: bf16[128,128], index: 4, kind: output, shape index: {}]  }
   0x1   :  { %v778_v0 = vld [vmem:[%s1055_s1 + $0x78] sm:$0xff]   ;;  %v780_v2 = vld [vmem:[%s1055_s1 + $0x70] sm:$0xff]   ;;  %v782_v4 = vld [vmem:[%s1055_s1 + $0x68] sm:$0xff]  }
   0x2   :  { %v779_v1 = vld [vmem:[%s1055_s1 + $0x38] sm:$0xff]   ;;  %698 = vmatprep.subr.bf16.mxu0 %v778_v0  ;;  %762 = vmatprep.subr.bf16.mxu1 %v778_v0  ;;  %v781_v3 = vld [vmem:[%s1055_s1 + $0x30] sm:$0xff]   ;;  %v783_v5 = vld [vmem:[%s1055_s1 + $0x28] sm:$0xff]  }
   0x3   :  { %699 = vmatpush3.bf16.msra.mxu0 %v779_v1  ;;  %770 = vmatpush3.bf16.msra.mxu1 %v779_v1  ;;  %v784_v6 = vld [vmem:[%s1055_s1 + $0x60] sm:$0xff]   ;;  %v786_v8 = vld [vmem:[%s1055_s1 + $0x58] sm:$0xff]   ;;  %v788_v10 = vld [vmem:[%s1055_s1 + $0x50] sm:$0xff]  }
   0x4   :  { %700 = vmatprep.subr.bf16.mxu0 %v780_v2  ;;  %763 = vmatprep.subr.bf16.mxu1 %v780_v2  ;;  %v785_v7 = vld [vmem:[%s1055_s1 + $0x20] sm:$0xff]   ;;  %v787_v9 = vld [vmem:[%s1055_s1 + $0x18] sm:$0xff]   ;;  %v789_v12 = vld [vmem:[%s1055_s1 + $0x10] sm:$0xff]  }
   0x5   :  { %v796_v11 = vld [vmem:[%s1056_s0 + $0x4] ss:$8 sps:$4 sm:$0xff]   ;;  %v794_v18 = vld [vmem:[%s1056_s0] ss:$8 sps:$4 sm:$0xff]   ;;  %v797_v20 = vld [vmem:[%s1056_s0 + $0x14] ss:$8 sps:$4 sm:$0xff]  }
   0x6   :  { %v802_v13 = vld [vmem:[%s1056_s0 + $0x44] ss:$8 sps:$4 sm:$0xff]   ;;  %274 = vmatprep.mubr.bf16.mxu0 %v796_v11  ;;  %v800_v19 = vld [vmem:[%s1056_s0 + $0x40] ss:$8 sps:$4 sm:$0xff]   ;;  %v806_v21 = vld [vmem:[%s1056_s0 + $0x54] ss:$8 sps:$4 sm:$0xff]  }
   0x7   :  { %701 = vmatpush3.bf16.msra.mxu0 %v781_v3  ;;  %771 = vmatpush3.bf16.msra.mxu1 %v781_v3  ;;  %v790_v14 = vld [vmem:[%s1055_s1 + $0x48] sm:$0xff]   ;;  %v792_v16 = vld [vmem:[%s1055_s1 + $0x40] sm:$0xff]   ;;  %v799_v22 = vld [vmem:[%s1056_s0 + $0x10] ss:$8 sps:$4 sm:$0xff]  }
   0x8   :  { %702 = vmatprep.subr.bf16.mxu0 %v782_v4  ;;  %764 = vmatprep.subr.bf16.mxu1 %v782_v4  ;;  %v791_v15 = vld [vmem:[%s1055_s1 + $0x8] sm:$0xff]   ;;  %v793_v17 = vld [vmem:[%s1055_s1] sm:$0xff]   ;;  %v808_v23 = vld [vmem:[%s1056_s0 + $0x50] ss:$8 sps:$4 sm:$0xff]  }
   0x9   :  { %306 = vmatprep.mubr.bf16.mxu1 %v802_v13  ;;  %v803_v24 = vld [vmem:[%s1056_s0 + $0x24] ss:$8 sps:$4 sm:$0xff]   ;;  %v805_v26 = vld [vmem:[%s1056_s0 + $0x20] ss:$8 sps:$4 sm:$0xff]   ;;  %v809_v28 = vld [vmem:[%s1056_s0 + $0x34] ss:$8 sps:$4 sm:$0xff]  }
   0xa   :  { %v812_v25 = vld [vmem:[%s1056_s0 + $0x64] ss:$8 sps:$4 sm:$0xff]   ;;  %v814_v27 = vld [vmem:[%s1056_s0 + $0x60] ss:$8 sps:$4 sm:$0xff]   ;;  %v815_v29 = vld [vmem:[%s1056_s0 + $0x74] ss:$8 sps:$4 sm:$0xff]  }
   0xb   :  { %703 = vmatpush3.bf16.msra.mxu0 %v783_v5  ;;  %772 = vmatpush3.bf16.msra.mxu1 %v783_v5  ;;  %v811_v30 = vld [vmem:[%s1056_s0 + $0x30] ss:$8 sps:$4 sm:$0xff]  }
   0xc   :  { %704 = vmatprep.subr.bf16.mxu0 %v784_v6  ;;  %765 = vmatprep.subr.bf16.mxu1 %v784_v6  ;;  %v817_v31 = vld [vmem:[%s1056_s0 + $0x70] ss:$8 sps:$4 sm:$0xff]  }
   0xf   :  { %705 = vmatpush3.bf16.msra.mxu0 %v785_v7  ;;  %773 = vmatpush3.bf16.msra.mxu1 %v785_v7 }
  0x10   :  { %706 = vmatprep.subr.bf16.mxu0 %v786_v8  ;;  %766 = vmatprep.subr.bf16.mxu1 %v786_v8 }
  0x13   :  { %707 = vmatpush3.bf16.msra.mxu0 %v787_v9  ;;  %774 = vmatpush3.bf16.msra.mxu1 %v787_v9 }
  0x14   :  { %708 = vmatprep.subr.bf16.mxu0 %v788_v10  ;;  %767 = vmatprep.subr.bf16.mxu1 %v788_v10 }
  0x17   :  { %709 = vmatpush3.bf16.msra.mxu0 %v789_v12  ;;  %775 = vmatpush3.bf16.msra.mxu1 %v789_v12 }
  0x18   :  { %710 = vmatprep.subr.bf16.mxu0 %v790_v14  ;;  %768 = vmatprep.subr.bf16.mxu1 %v790_v14 }
  0x1b   :  { %711 = vmatpush3.bf16.msra.mxu0 %v791_v15  ;;  %776 = vmatpush3.bf16.msra.mxu1 %v791_v15 }
  0x1c   :  { %712 = vmatprep.subr.bf16.mxu0 %v792_v16  ;;  %769 = vmatprep.subr.bf16.mxu1 %v792_v16 }
  0x1f   :  { %713 = vmatpush3.bf16.msra.mxu0 %v793_v17  ;;  %777 = vmatpush3.bf16.msra.mxu1 %v793_v17 }
  0x22   :  { %275 = vmatmul.mubr.bf16.vlgmr.msra.gmra.mxu0 %v794_v18  ;;  %307 = vmatmul.mubr.bf16.vlgmr.msra.gmra.mxu1 %v800_v19 }
  0x23   :  { %282 = vmatprep.mubr.bf16.mxu0 %v797_v20  ;;  %314 = vmatprep.mubr.bf16.mxu1 %v806_v21 }
  0x2a   :  { %283 = vmatmul.mubr.bf16.gmra.mxu0 %v799_v22  ;;  %315 = vmatmul.mubr.bf16.gmra.mxu1 %v808_v23 }
  0x2b   :  { %290 = vmatprep.mubr.bf16.mxu0 %v803_v24  ;;  %322 = vmatprep.mubr.bf16.mxu1 %v812_v25 }
  0x32   :  { %291 = vmatmul.mubr.bf16.gmra.mxu0 %v805_v26  ;;  %323 = vmatmul.mubr.bf16.gmra.mxu1 %v814_v27 }
  0x33   :  { %298 = vmatprep.mubr.bf16.mxu0 %v809_v28  ;;  %330 = vmatprep.mubr.bf16.mxu1 %v815_v29 }
  0x3a   :  { %299 = vmatmul.mubr.bf16.gmra.mxu0 %v811_v30  ;;  %331 = vmatmul.mubr.bf16.gmra.mxu1 %v817_v31 }
  0xe2   :  { %v714_v32 = vpop.f32.mrf.mxu0  ;;  %v738_v33 = vpop.f32.mrf.mxu1 }
  0xe4   :  { %v715_v34 = vpop.f32.mrf.mxu0  ;;  %v739_v35 = vpop.f32.mrf.mxu1 }
  0xe5   :  { %v943_v51 = vadd.f32 %v715_v34, %v714_v32  ;;  %v975_v20 = vadd.f32 %v739_v35, %v738_v33 }
  0xe6   :  { %v717_v36 = vpop.f32.mrf.mxu0  ;;  %v741_v37 = vpop.f32.mrf.mxu1 }
  0xe7   :  { %v377_v58 = vmul.f32 %v943_v51, %v943_v51  ;;  %v385_v29 = vmul.f32 %v975_v20, %v975_v20 }
  0xe8   :  { %v718_v38 = vpop.f32.mrf.mxu0  ;;  %v742_v39 = vpop.f32.mrf.mxu1 }
  0xe9   :  { %v941_v48 = vadd.f32 %v718_v38, %v717_v36  ;;  %v980_v24 = vadd.f32 %v742_v39, %v741_v37 }
  0xea   :  { %v720_v40 = vpop.f32.mrf.mxu0  ;;  %v744_v41 = vpop.f32.mrf.mxu1 }
  0xeb   :  { %v378_v55 = vmul.f32 %v941_v48, %v941_v48  ;;  %v355_v59 = vadd.f32 %v941_v48, %v943_v51  ;;  %v386_v33 = vmul.f32 %v980_v24, %v980_v24 }
  0xec   :  { %v721_v42 = vpop.f32.mrf.mxu0  ;;  %v745_v43 = vpop.f32.mrf.mxu1 }
  0xed   :  { %v945_v52 = vadd.f32 %v721_v42, %v720_v40  ;;  %v393_v0 = vadd.f32 %v378_v55, %v377_v58  ;;  %v987_v30 = vadd.f32 %v745_v43, %v744_v41 }
  0xee   :  { %v723_v44 = vpop.f32.mrf.mxu0  ;;  %v747_v45 = vpop.f32.mrf.mxu1 }
  0xef   :  { %v379_v60 = vmul.f32 %v945_v52, %v945_v52  ;;  %v356_v1 = vadd.f32 %v945_v52, %v355_v59  ;;  %v387_v38 = vmul.f32 %v987_v30, %v987_v30 }
  0xf0   :  { %v724_v46 = vpop.f32.mrf.mxu0  ;;  %v748_v47 = vpop.f32.mrf.mxu1 }
  0xf1   :  { %v949_v56 = vadd.f32 %v724_v46, %v723_v44  ;;  %v394_v5 = vadd.f32 %v393_v0, %v379_v60  ;;  %v992_v34 = vadd.f32 %v748_v47, %v747_v45 }
  0xf2   :  { %v726_v49 = vpop.f32.mrf.mxu0  ;;  %v750_v50 = vpop.f32.mrf.mxu1 }
  0xf3   :  { %v380_v2 = vmul.f32 %v949_v56, %v949_v56  ;;  %v357_v6 = vadd.f32 %v949_v56, %v356_v1  ;;  %v388_v42 = vmul.f32 %v992_v34, %v992_v34 }
  0xf4   :  { %v727_v53 = vpop.f32.mrf.mxu0  ;;  %v751_v54 = vpop.f32.mrf.mxu1 }
  0xf5   :  { %v957_v61 = vadd.f32 %v727_v53, %v726_v49  ;;  %v395_v10 = vadd.f32 %v394_v5, %v380_v2  ;;  %v997_v39 = vadd.f32 %v751_v54, %v750_v50 }
  0xf6   :  { %v729_v57 = vpop.f32.mrf.mxu0  ;;  %v753_v63 = vpop.f32.mrf.mxu1 }
  0xf7   :  { %v381_v7 = vmul.f32 %v957_v61, %v957_v61  ;;  %v358_v11 = vadd.f32 %v957_v61, %v357_v6  ;;  %v389_v47 = vmul.f32 %v997_v39, %v997_v39 }
  0xf8   :  { %v730_v62 = vpop.f32.mrf.mxu0  ;;  %v754_v9 = vpop.f32.mrf.mxu1 }
  0xf9   :  { %v962_v3 = vadd.f32 %v730_v62, %v729_v57  ;;  %v396_v15 = vadd.f32 %v395_v10, %v381_v7  ;;  %v1002_v43 = vadd.f32 %v754_v9, %v753_v63 }
  0xfa   :  { %v732_v4 = vpop.f32.mrf.mxu0  ;;  %v756_v19 = vpop.f32.mrf.mxu1 }
  0xfb   :  { %v382_v12 = vmul.f32 %v962_v3, %v962_v3  ;;  %v359_v16 = vadd.f32 %v962_v3, %v358_v11  ;;  %v390_v55 = vmul.f32 %v1002_v43, %v1002_v43 }
  0xfc   :  { %v733_v8 = vpop.f32.mrf.mxu0  ;;  %v757_v28 = vpop.f32.mrf.mxu1 }
  0xfd   :  { %v970_v13 = vadd.f32 %v733_v8, %v732_v4  ;;  %v397_v21 = vadd.f32 %v396_v15, %v382_v12  ;;  %v758_v50 = vadd.f32 %v757_v28, %v756_v19  ;;  %v420_v28 = vld [vmem:[%s1057_s2] sm:$0x1] }
  0xfe   :  { %v735_v14 = vpop.f32.mrf.mxu0  ;;  %v759_v37 = vpop.f32.mrf.mxu1 }
  0xff   :  { %v383_v17 = vmul.f32 %v970_v13, %v970_v13  ;;  %v360_v22 = vadd.f32 %v970_v13, %v359_v16  ;;  %v391_v62 = vmul.f32 %v758_v50, %v758_v50 }
 0x100   :  { %v736_v18 = vpop.f32.mrf.mxu0  ;;  %v760_v46 = vpop.f32.mrf.mxu1 }
 0x101   :  { %v978_v23 = vadd.f32 %v736_v18, %v735_v14  ;;  %v398_v25 = vadd.f32 %v397_v21, %v383_v17  ;;  %v761_v58 = vadd.f32 %v760_v46, %v759_v37 }
 0x103   :  { %v361_v26 = vadd.f32 %v978_v23, %v360_v22  ;;  %v384_v27 = vmul.f32 %v978_v23, %v978_v23  ;;  %v392_v1 = vmul.f32 %v761_v58, %v761_v58 }
 0x105   :  { %v362_v31 = vadd.f32 %v975_v20, %v361_v26  ;;  %v399_v32 = vadd.f32 %v398_v25, %v384_v27  ;;  %v444_v26 = vlaneseq }
 0x107   :  { %v363_v35 = vadd.f32 %v980_v24, %v362_v31  ;;  %v400_v36 = vadd.f32 %v399_v32, %v385_v29  ;;  %v445_v27 = vshrl.u32 %v444_v26, 7 }
 0x109   :  { %v401_v40 = vadd.f32 %v400_v36, %v386_v33  ;;  %v364_v41 = vadd.f32 %v987_v30, %v363_v35  ;;  %v446_v29 = vsub.s32 0, %v445_v27  ;;  %v424_v33 = vld [vmem:[%s1058_s3] sm:$0x1] }
 0x10b   :  { %v365_v44 = vadd.f32 %v992_v34, %v364_v41  ;;  %v402_v45 = vadd.f32 %v401_v40, %v387_v38 }
 0x10d   :  { %v366_v49 = vadd.f32 %v997_v39, %v365_v44  ;;  %v403_v53 = vadd.f32 %v402_v45, %v388_v42 }
 0x10f   :  { %v367_v54 = vadd.f32 %v1002_v43, %v366_v49  ;;  %v404_v57 = vadd.f32 %v403_v53, %v389_v47 }
 0x111   :  { %v405_v59 = vadd.f32 %v404_v57, %v390_v55  ;;  %v368_v60 = vadd.f32 %v758_v50, %v367_v54 }
 0x113   :  { %v406_v63 = vadd.f32 %v405_v59, %v391_v62  ;;  %v369_v0 = vadd.f32 %v761_v58, %v368_v60 }
 0x115   :  { %v370_v2 = vrot.slane %v369_v0, 4  ;;  %v407_v4 = vadd.f32 %v406_v63, %v392_v1 }
 0x117   :  { %v371_v5 = vadd.f32 %v370_v2, %v369_v0  ;;  %v408_v6 = vrot.slane %v407_v4, 4 }
 0x119   :  { %v372_v7 = vrot.slane %v371_v5, 2  ;;  %v409_v8 = vadd.f32 %v408_v6, %v407_v4 }
 0x11b   :  { %v373_v9 = vadd.f32 %v372_v7, %v371_v5  ;;  %v410_v10 = vrot.slane %v409_v8, 2 }
 0x11d   :  { %v374_v11 = vrot.slane %v373_v9, 1  ;;  %v411_v12 = vadd.f32 %v410_v10, %v409_v8 }
 0x11f   :  { %v375_v14 = vadd.f32 %v374_v11, %v373_v9  ;;  %v412_v15 = vrot.slane %v411_v12, 1 }
 0x121   :  { %v413_v16 = vadd.f32 %v412_v15, %v411_v12  ;;  %v415_v17 = vmul.f32 0.03125, %v375_v14 }
 0x123   :  { %v416_v18 = vmul.f32 0.03125, %v413_v16  ;;  %v417_v19 = vmul.f32 %v415_v17, %v415_v17 }
 0x125   :  { %v418_v21 = vsub.f32 %v416_v18, %v417_v19 }
 0x127   :  { %v419_v22 = vmax.f32 %v418_v21, 0.0 }
 0x129   :  { %v421_v25 = vadd.f32 1e-05, %v419_v22 }
 0x12b   :  { %818 = vrsqrt.f32 %v421_v25 }
 0x138   :  { %v819_v31 = vpop.eup %818 }
 0x139   :  { %v423_v32 = vmul.f32 %v819_v31, %v420_v28 }
 0x13b   :  { %v425_v35 = vmul.f32 %v423_v32, %v415_v17  ;;  %v447_v36 = vrot.slane %v423_v32, %v446_v29 }
 0x13d   :  { %v426_v37 = vsub.f32 %v424_v33, %v425_v35  ;;  %v449_v38 = vmul.f32 %v943_v51, %v447_v36  ;;  %v450_v40 = vmul.f32 %v941_v48, %v447_v36  ;;  %v451_v41 = vmul.f32 %v945_v52, %v447_v36 }
 0x13e   :  { %v452_v42 = vmul.f32 %v949_v56, %v447_v36  ;;  %v453_v44 = vmul.f32 %v957_v61, %v447_v36  ;;  %v454_v45 = vmul.f32 %v962_v3, %v447_v36  ;;  %v455_v46 = vmul.f32 %v970_v13, %v447_v36 }
 0x13f   :  { %v456_v47 = vmul.f32 %v978_v23, %v447_v36  ;;  %v457_v49 = vmul.f32 %v975_v20, %v447_v36  ;;  %v458_v53 = vmul.f32 %v980_v24, %v447_v36  ;;  %v459_v51 = vmul.f32 %v987_v30, %v447_v36 }
 0x140   :  { %v460_v48 = vmul.f32 %v992_v34, %v447_v36  ;;  %v469_v54 = vrot.slane %v426_v37, %v446_v29  ;;  %v461_v52 = vmul.f32 %v997_v39, %v447_v36  ;;  %v462_v56 = vmul.f32 %v1002_v43, %v447_v36 }
 0x141   :  { %v463_v61 = vmul.f32 %v758_v50, %v447_v36  ;;  %v464_v55 = vmul.f32 %v761_v58, %v447_v36 }
 0x142   :  { %v471_v3 = vadd.f32 %v469_v54, %v449_v38  ;;  %v472_v57 = vadd.f32 %v469_v54, %v450_v40  ;;  %v473_v13 = vadd.f32 %v469_v54, %v451_v41  ;;  %v474_v59 = vadd.f32 %v469_v54, %v452_v42 }
 0x143   :  { %v475_v23 = vadd.f32 %v469_v54, %v453_v44  ;;  %v476_v60 = vadd.f32 %v469_v54, %v454_v45  ;;  %v477_v20 = vadd.f32 %v469_v54, %v455_v46  ;;  %v478_v62 = vadd.f32 %v469_v54, %v456_v47 }
 0x144   :  { %v479_v24 = vadd.f32 %v469_v54, %v457_v49  ;;  %v480_v63 = vadd.f32 %v469_v54, %v458_v53  ;;  %v481_v30 = vadd.f32 %v469_v54, %v459_v51  ;;  %v482_v0 = vadd.f32 %v469_v54, %v460_v48 }
 0x145   :  { %v483_v34 = vadd.f32 %v469_v54, %v461_v52  ;;  %v484_v1 = vadd.f32 %v469_v54, %v462_v56  ;;  %v485_v2 = vadd.f32 %v469_v54, %v463_v61  ;;  %v486_v39 = vadd.f32 %v469_v54, %v464_v55 }
 0x146   :  { %v487_v4 = vmax.f32 %v471_v3, 0.0  ;;  %v488_v43 = vmax.f32 %v472_v57, 0.0  ;;  %v489_v50 = vmax.f32 %v473_v13, 0.0  ;;  %v490_v58 = vmax.f32 %v474_v59, 0.0 }
 0x147   :  { %v491_v5 = vmax.f32 %v475_v23, 0.0  ;;  %v492_v6 = vmax.f32 %v476_v60, 0.0  ;;  %v493_v7 = vmax.f32 %v477_v20, 0.0  ;;  %v494_v8 = vmax.f32 %v478_v62, 0.0 }
 0x148   :  { %v495_v9 = vmax.f32 %v479_v24, 0.0  ;;  %v496_v10 = vmax.f32 %v480_v63, 0.0  ;;  %v497_v11 = vmax.f32 %v481_v30, 0.0  ;;  %v498_v12 = vmax.f32 %v482_v0, 0.0 }
 0x149   :  { %v499_v14 = vmax.f32 %v483_v34, 0.0  ;;  %v500_v15 = vmax.f32 %v484_v1, 0.0  ;;  %v501_v16 = vmax.f32 %v485_v2, 0.0  ;;  %v502_v17 = vmax.f32 %v486_v39, 0.0 }
 0x14a   :  { %v654_v18 = vpack.c.bf16 %v488_v43, %v487_v4  ;;  %v659_v19 = vpack.c.bf16 %v490_v58, %v489_v50  ;;  %v664_v21 = vpack.c.bf16 %v492_v6, %v491_v5  ;;  %v669_v22 = vpack.c.bf16 %v494_v8, %v493_v7 }
 0x14b   :  { %v674_v25 = vpack.c.bf16 %v496_v10, %v495_v9  ;;  %v679_v26 = vpack.c.bf16 %v498_v12, %v497_v11  ;;  %v684_v27 = vpack.c.bf16 %v500_v15, %v499_v14  ;;  %v689_v28 = vpack.c.bf16 %v502_v17, %v501_v16 }
 0x14c   :  { %655 = vst [vmem:[%s1059_s4] sm:$0xff] %v654_v18   ;;  %691 = vst [vmem:[%s1059_s4 + $0x8] sm:$0xff] %v659_v19  }
 0x14d   :  { %692 = vst [vmem:[%s1059_s4 + $0x10] sm:$0xff] %v664_v21   ;;  %693 = vst [vmem:[%s1059_s4 + $0x18] sm:$0xff] %v669_v22  }
 0x14e   :  { %694 = vst [vmem:[%s1059_s4 + $0x20] sm:$0xff] %v674_v25   ;;  %695 = vst [vmem:[%s1059_s4 + $0x28] sm:$0xff] %v679_v26  }
 0x14f   :  { %696 = vst [vmem:[%s1059_s4 + $0x30] sm:$0xff] %v684_v27   ;;  %697 = vst [vmem:[%s1059_s4 + $0x38] sm:$0xff] %v689_v28  }

// kernel: dc_discriminator_forward.7
= control target key start
LH: loop header
LB: loop body
LE: loop exit
PB: predicated region body
PF: predicated region fallthrough
CT: control target
= control target key end

     0   :  { %s1629_s1 = inlined_call_operand.vmem [shape: bf16[512,128], index: 1, kind: input, shape index: {}]   ;;  %s1630_s0 = inlined_call_operand.vmem [shape: bf16[128,512], index: 0, kind: input, shape index: {}]   ;;  %s1631_s2 = inlined_call_operand.vmem [shape: f32[1,128], index: 2, kind: input, shape index: {}]   ;;  %s1632_s3 = inlined_call_operand.vmem [shape: f32[1,128], index: 3, kind: input, shape index: {}]   ;;  %s1633_s4 = inlined_call_operand.vmem [shape: f32[128,128], index: 4, kind: output, shape index: {}]  }
   0x1   :  { %v1116_v0 = vld [vmem:[%s1629_s1 + $0x78] sm:$0xff]   ;;  %v1120_v4 = vld [vmem:[%s1629_s1 + $0x70] sm:$0xff]   ;;  %v1124_v8 = vld [vmem:[%s1629_s1 + $0x68] sm:$0xff]  }
   0x2   :  { %v1117_v1 = vld [vmem:[%s1629_s1 + $0xf8] sm:$0xff]   ;;  %988 = vmatprep.subr.bf16.mxu0 %v1116_v0  ;;  %v1121_v5 = vld [vmem:[%s1629_s1 + $0xf0] sm:$0xff]   ;;  %v1125_v9 = vld [vmem:[%s1629_s1 + $0xe8] sm:$0xff]  }
   0x3   :  { %v1118_v2 = vld [vmem:[%s1629_s1 + $0x38] sm:$0xff]   ;;  %1052 = vmatprep.subr.bf16.mxu1 %v1117_v1  ;;  %v1122_v6 = vld [vmem:[%s1629_s1 + $0x30] sm:$0xff]   ;;  %v1126_v10 = vld [vmem:[%s1629_s1 + $0x28] sm:$0xff]  }
   0x4   :  { %v1119_v3 = vld [vmem:[%s1629_s1 + $0xb8] sm:$0xff]   ;;  %989 = vmatpush3.bf16.msra.mxu0 %v1118_v2  ;;  %v1123_v7 = vld [vmem:[%s1629_s1 + $0xb0] sm:$0xff]   ;;  %v1127_v11 = vld [vmem:[%s1629_s1 + $0xa8] sm:$0xff]  }
   0x5   :  { %1053 = vmatpush3.bf16.msra.mxu1 %v1119_v3  ;;  %990 = vmatprep.subr.bf16.mxu0 %v1120_v4  ;;  %v1128_v12 = vld [vmem:[%s1629_s1 + $0x60] sm:$0xff]   ;;  %v1132_v16 = vld [vmem:[%s1629_s1 + $0x58] sm:$0xff]   ;;  %v1136_v20 = vld [vmem:[%s1629_s1 + $0x50] sm:$0xff]  }
   0x6   :  { %1054 = vmatprep.subr.bf16.mxu1 %v1121_v5  ;;  %v1129_v13 = vld [vmem:[%s1629_s1 + $0xe0] sm:$0xff]   ;;  %v1133_v17 = vld [vmem:[%s1629_s1 + $0xd8] sm:$0xff]   ;;  %v1137_v21 = vld [vmem:[%s1629_s1 + $0xd0] sm:$0xff]  }
   0x7   :  { %v1130_v14 = vld [vmem:[%s1629_s1 + $0x20] sm:$0xff]   ;;  %v1134_v18 = vld [vmem:[%s1629_s1 + $0x18] sm:$0xff]   ;;  %v1138_v22 = vld [vmem:[%s1629_s1 + $0x10] sm:$0xff]  }
   0x8   :  { %991 = vmatpush3.bf16.msra.mxu0 %v1122_v6  ;;  %v1131_v15 = vld [vmem:[%s1629_s1 + $0xa0] sm:$0xff]   ;;  %v1135_v19 = vld [vmem:[%s1629_s1 + $0x98] sm:$0xff]   ;;  %v1139_v23 = vld [vmem:[%s1629_s1 + $0x90] sm:$0xff]  }
   0x9   :  { %1055 = vmatpush3.bf16.msra.mxu1 %v1123_v7  ;;  %992 = vmatprep.subr.bf16.mxu0 %v1124_v8  ;;  %v1140_v24 = vld [vmem:[%s1629_s1 + $0x48] sm:$0xff]   ;;  %v1144_v28 = vld [vmem:[%s1629_s1 + $0x40] sm:$0xff]  }
   0xa   :  { %1056 = vmatprep.subr.bf16.mxu1 %v1125_v9  ;;  %v1141_v25 = vld [vmem:[%s1629_s1 + $0xc8] sm:$0xff]   ;;  %v1145_v29 = vld [vmem:[%s1629_s1 + $0xc0] sm:$0xff]  }
   0xb   :  { %v1142_v26 = vld [vmem:[%s1629_s1 + $0x8] sm:$0xff]   ;;  %v1146_v30 = vld [vmem:[%s1629_s1] sm:$0xff]  }
   0xc   :  { %993 = vmatpush3.bf16.msra.mxu0 %v1126_v10  ;;  %v1143_v27 = vld [vmem:[%s1629_s1 + $0x88] sm:$0xff]   ;;  %v1147_v31 = vld [vmem:[%s1629_s1 + $0x80] sm:$0xff]  }
   0xd   :  { %1057 = vmatpush3.bf16.msra.mxu1 %v1127_v11  ;;  %994 = vmatprep.subr.bf16.mxu0 %v1128_v12  ;;  %v1148_v32 = vld [vmem:[%s1630_s0] ss:$16 sps:$4 sm:$0xff]   ;;  %v1150_v33 = vld [vmem:[%s1630_s0 + $0x4] ss:$16 sps:$4 sm:$0xff]   ;;  %v1151_v34 = vld [vmem:[%s1630_s0 + $0x8] ss:$16 sps:$4 sm:$0xff]  }
   0xe   :  { %1058 = vmatprep.subr.bf16.mxu1 %v1129_v13  ;;  %v1153_v35 = vld [vmem:[%s1630_s0 + $0xc] ss:$16 sps:$4 sm:$0xff]   ;;  %498 = vmatprep.mubr.bf16.mxu0 %v1150_v33  ;;  %v1154_v36 = vld [vmem:[%s1630_s0 + $0x24] ss:$16 sps:$4 sm:$0xff]   ;;  %v1158_v38 = vld [vmem:[%s1630_s0 + $0x20] ss:$16 sps:$4 sm:$0xff]  }
   0xf   :  { %595 = vmatprep.mubr.bf16.mxu1 %v1153_v35  ;;  %v1156_v37 = vld [vmem:[%s1630_s0 + $0x2c] ss:$16 sps:$4 sm:$0xff]   ;;  %v1159_v39 = vld [vmem:[%s1630_s0 + $0x28] ss:$16 sps:$4 sm:$0xff]   ;;  %v1160_v40 = vld [vmem:[%s1630_s0 + $0x44] ss:$16 sps:$4 sm:$0xff]  }
  0x10   :  { %995 = vmatpush3.bf16.msra.mxu0 %v1130_v14  ;;  %v1162_v41 = vld [vmem:[%s1630_s0 + $0x4c] ss:$16 sps:$4 sm:$0xff]   ;;  %v1164_v42 = vld [vmem:[%s1630_s0 + $0x40] ss:$16 sps:$4 sm:$0xff]   ;;  %v1165_v43 = vld [vmem:[%s1630_s0 + $0x48] ss:$16 sps:$4 sm:$0xff]  }
  0x11   :  { %1059 = vmatpush3.bf16.msra.mxu1 %v1131_v15  ;;  %996 = vmatprep.subr.bf16.mxu0 %v1132_v16  ;;  %v1166_v44 = vld [vmem:[%s1630_s0 + $0x64] ss:$16 sps:$4 sm:$0xff]   ;;  %v1168_v45 = vld [vmem:[%s1630_s0 + $0x6c] ss:$16 sps:$4 sm:$0xff]   ;;  %v1170_v46 = vld [vmem:[%s1630_s0 + $0x60] ss:$16 sps:$4 sm:$0xff]  }
  0x12   :  { %1060 = vmatprep.subr.bf16.mxu1 %v1133_v17  ;;  %v1171_v47 = vld [vmem:[%s1630_s0 + $0x68] ss:$16 sps:$4 sm:$0xff]   ;;  %v1172_v48 = vld [vmem:[%s1630_s0 + $0x84] ss:$16 sps:$4 sm:$0xff]   ;;  %v1174_v49 = vld [vmem:[%s1630_s0 + $0x8c] ss:$16 sps:$4 sm:$0xff]  }
  0x13   :  { %v1176_v50 = vld [vmem:[%s1630_s0 + $0x80] ss:$16 sps:$4 sm:$0xff]   ;;  %v1177_v51 = vld [vmem:[%s1630_s0 + $0x88] ss:$16 sps:$4 sm:$0xff]   ;;  %v1178_v52 = vld [vmem:[%s1630_s0 + $0xa4] ss:$16 sps:$4 sm:$0xff]  }
  0x14   :  { %997 = vmatpush3.bf16.msra.mxu0 %v1134_v18  ;;  %v1180_v53 = vld [vmem:[%s1630_s0 + $0xac] ss:$16 sps:$4 sm:$0xff]   ;;  %v1182_v54 = vld [vmem:[%s1630_s0 + $0xa0] ss:$16 sps:$4 sm:$0xff]   ;;  %v1183_v55 = vld [vmem:[%s1630_s0 + $0xa8] ss:$16 sps:$4 sm:$0xff]  }
  0x15   :  { %1061 = vmatpush3.bf16.msra.mxu1 %v1135_v19  ;;  %998 = vmatprep.subr.bf16.mxu0 %v1136_v20  ;;  %v1184_v56 = vld [vmem:[%s1630_s0 + $0xc4] ss:$16 sps:$4 sm:$0xff]   ;;  %v1186_v57 = vld [vmem:[%s1630_s0 + $0xcc] ss:$16 sps:$4 sm:$0xff]   ;;  %v1188_v58 = vld [vmem:[%s1630_s0 + $0xc0] ss:$16 sps:$4 sm:$0xff]  }
  0x16   :  { %1062 = vmatprep.subr.bf16.mxu1 %v1137_v21  ;;  %v1189_v59 = vld [vmem:[%s1630_s0 + $0xc8] ss:$16 sps:$4 sm:$0xff]   ;;  %v1190_v60 = vld [vmem:[%s1630_s0 + $0xe4] ss:$16 sps:$4 sm:$0xff]   ;;  %v1192_v61 = vld [vmem:[%s1630_s0 + $0xec] ss:$16 sps:$4 sm:$0xff]  }
  0x17   :  { %v1194_v62 = vld [vmem:[%s1630_s0 + $0xe0] ss:$16 sps:$4 sm:$0xff]   ;;  %v1195_v63 = vld [vmem:[%s1630_s0 + $0xe8] ss:$16 sps:$4 sm:$0xff]  }
  0x18   :  { %999 = vmatpush3.bf16.msra.mxu0 %v1138_v22 }
  0x19   :  { %1063 = vmatpush3.bf16.msra.mxu1 %v1139_v23  ;;  %1000 = vmatprep.subr.bf16.mxu0 %v1140_v24 }
  0x1a   :  { %1064 = vmatprep.subr.bf16.mxu1 %v1141_v25 }
  0x1c   :  { %1001 = vmatpush3.bf16.msra.mxu0 %v1142_v26 }
  0x1d   :  { %1065 = vmatpush3.bf16.msra.mxu1 %v1143_v27  ;;  %1002 = vmatprep.subr.bf16.mxu0 %v1144_v28 }
  0x1e   :  { %1066 = vmatprep.subr.bf16.mxu1 %v1145_v29 }
  0x20   :  { %1003 = vmatpush3.bf16.msra.mxu0 %v1146_v30 }
  0x21   :  { %1067 = vmatpush3.bf16.msra.mxu1 %v1147_v31 }
  0x23   :  { %499 = vmatmul.mubr.bf16.vlgmr.msra.gmra.mxu0 %v1148_v32 }
  0x24   :  { %596 = vmatmul.mubr.bf16.vlgmr.msra.gmra.mxu1 %v1151_v34  ;;  %506 = vmatprep.mubr.bf16.mxu0 %v1154_v36 }
  0x25   :  { %603 = vmatprep.mubr.bf16.mxu1 %v1156_v37 }
  0x2b   :  { %507 = vmatmul.mubr.bf16.gmra.mxu0 %v1158_v38 }
  0x2c   :  { %604 = vmatmul.mubr.bf16.gmra.mxu1 %v1159_v39  ;;  %514 = vmatprep.mubr.bf16.mxu0 %v1160_v40 }
  0x2d   :  { %611 = vmatprep.mubr.bf16.mxu1 %v1162_v41 }
  0x33   :  { %515 = vmatmul.mubr.bf16.gmra.mxu0 %v1164_v42 }
  0x34   :  { %612 = vmatmul.mubr.bf16.gmra.mxu1 %v1165_v43  ;;  %522 = vmatprep.mubr.bf16.mxu0 %v1166_v44 }
  0x35   :  { %619 = vmatprep.mubr.bf16.mxu1 %v1168_v45 }
  0x3b   :  { %523 = vmatmul.mubr.bf16.gmra.mxu0 %v1170_v46 }
  0x3c   :  { %620 = vmatmul.mubr.bf16.gmra.mxu1 %v1171_v47  ;;  %530 = vmatprep.mubr.bf16.mxu0 %v1172_v48 }
  0x3d   :  { %627 = vmatprep.mubr.bf16.mxu1 %v1174_v49 }
  0x43   :  { %531 = vmatmul.mubr.bf16.gmra.mxu0 %v1176_v50 }
  0x44   :  { %628 = vmatmul.mubr.bf16.gmra.mxu1 %v1177_v51  ;;  %538 = vmatprep.mubr.bf16.mxu0 %v1178_v52 }
  0x45   :  { %635 = vmatprep.mubr.bf16.mxu1 %v1180_v53 }
  0x4b   :  { %539 = vmatmul.mubr.bf16.gmra.mxu0 %v1182_v54 }
  0x4c   :  { %636 = vmatmul.mubr.bf16.gmra.mxu1 %v1183_v55  ;;  %546 = vmatprep.mubr.bf16.mxu0 %v1184_v56 }
  0x4d   :  { %643 = vmatprep.mubr.bf16.mxu1 %v1186_v57 }
  0x53   :  { %547 = vmatmul.mubr.bf16.gmra.mxu0 %v1188_v58 }
  0x54   :  { %644 = vmatmul.mubr.bf16.gmra.mxu1 %v1189_v59  ;;  %554 = vmatprep.mubr.bf16.mxu0 %v1190_v60 }
  0x55   :  { %651 = vmatprep.mubr.bf16.mxu1 %v1192_v61 }
  0x5b   :  { %555 = vmatmul.mubr.bf16.gmra.mxu0 %v1194_v62 }
  0x5c   :  { %652 = vmatmul.mubr.bf16.gmra.mxu1 %v1195_v63 }
  0xe3   :  { %v1004_v0 = vpop.f32.mrf.mxu0 }
  0xe4   :  { %v1068_v1 = vpop.f32.mrf.mxu1 }
  0xe5   :  { %v1005_v2 = vpop.f32.mrf.mxu0 }
  0xe6   :  { %v1069_v3 = vpop.f32.mrf.mxu1  ;;  %v1006_v32 = vadd.f32 %v1005_v2, %v1004_v0 }
  0xe7   :  { %v1007_v4 = vpop.f32.mrf.mxu0  ;;  %v1070_v33 = vadd.f32 %v1069_v3, %v1068_v1 }
  0xe8   :  { %v1071_v5 = vpop.f32.mrf.mxu1 }
  0xe9   :  { %v1008_v6 = vpop.f32.mrf.mxu0  ;;  %v1481_v43 = vadd.f32 %v1070_v33, %v1006_v32 }
  0xea   :  { %v1072_v7 = vpop.f32.mrf.mxu1  ;;  %v1009_v28 = vadd.f32 %v1008_v6, %v1007_v4 }
  0xeb   :  { %v1010_v8 = vpop.f32.mrf.mxu0  ;;  %v1073_v29 = vadd.f32 %v1072_v7, %v1071_v5  ;;  %v698_v55 = vmul.f32 %v1481_v43, %v1481_v43 }
  0xec   :  { %v1074_v9 = vpop.f32.mrf.mxu1 }
  0xed   :  { %v1011_v10 = vpop.f32.mrf.mxu0  ;;  %v1479_v38 = vadd.f32 %v1073_v29, %v1009_v28 }
  0xee   :  { %v1075_v11 = vpop.f32.mrf.mxu1  ;;  %v1012_v34 = vadd.f32 %v1011_v10, %v1010_v8 }
  0xef   :  { %v1013_v12 = vpop.f32.mrf.mxu0  ;;  %v1076_v35 = vadd.f32 %v1075_v11, %v1074_v9  ;;  %v699_v49 = vmul.f32 %v1479_v38, %v1479_v38  ;;  %v676_v62 = vadd.f32 %v1479_v38, %v1481_v43 }
  0xf0   :  { %v1077_v13 = vpop.f32.mrf.mxu1 }
  0xf1   :  { %v1014_v14 = vpop.f32.mrf.mxu0  ;;  %v1483_v44 = vadd.f32 %v1076_v35, %v1012_v34  ;;  %v714_v63 = vadd.f32 %v699_v49, %v698_v55 }
  0xf2   :  { %v1078_v15 = vpop.f32.mrf.mxu1  ;;  %v1015_v40 = vadd.f32 %v1014_v14, %v1013_v12 }
  0xf3   :  { %v1016_v16 = vpop.f32.mrf.mxu0  ;;  %v1079_v41 = vadd.f32 %v1078_v15, %v1077_v13  ;;  %v700_v56 = vmul.f32 %v1483_v44, %v1483_v44  ;;  %v677_v6 = vadd.f32 %v676_v62, %v1483_v44 }
  0xf4   :  { %v1080_v17 = vpop.f32.mrf.mxu1 }
  0xf5   :  { %v1017_v18 = vpop.f32.mrf.mxu0  ;;  %v1487_v51 = vadd.f32 %v1079_v41, %v1015_v40  ;;  %v715_v7 = vadd.f32 %v714_v63, %v700_v56 }
  0xf6   :  { %v1081_v19 = vpop.f32.mrf.mxu1  ;;  %v1018_v46 = vadd.f32 %v1017_v18, %v1016_v16 }
  0xf7   :  { %v1019_v20 = vpop.f32.mrf.mxu0  ;;  %v1082_v47 = vadd.f32 %v1081_v19, %v1080_v17  ;;  %v701_v1 = vmul.f32 %v1487_v51, %v1487_v51  ;;  %v678_v14 = vadd.f32 %v677_v6, %v1487_v51 }
  0xf8   :  { %v1083_v21 = vpop.f32.mrf.mxu1 }
  0xf9   :  { %v1020_v22 = vpop.f32.mrf.mxu0  ;;  %v1493_v58 = vadd.f32 %v1082_v47, %v1018_v46  ;;  %v716_v16 = vadd.f32 %v715_v7, %v701_v1 }
  0xfa   :  { %v1084_v23 = vpop.f32.mrf.mxu1  ;;  %v1021_v52 = vadd.f32 %v1020_v22, %v1019_v20 }
  0xfb   :  { %v1022_v24 = vpop.f32.mrf.mxu0  ;;  %v1085_v53 = vadd.f32 %v1084_v23, %v1083_v21  ;;  %v702_v9 = vmul.f32 %v1493_v58, %v1493_v58  ;;  %v679_v20 = vadd.f32 %v678_v14, %v1493_v58 }
  0xfc   :  { %v1086_v25 = vpop.f32.mrf.mxu1 }
  0xfd   :  { %v1023_v26 = vpop.f32.mrf.mxu0  ;;  %v1499_v2 = vadd.f32 %v1085_v53, %v1021_v52 }
  0xfe   :  { %v1087_v27 = vpop.f32.mrf.mxu1  ;;  %v1024_v59 = vadd.f32 %v1023_v26, %v1022_v24  ;;  %v717_v24 = vadd.f32 %v716_v16, %v702_v9 }
  0xff   :  { %v1025_v30 = vpop.f32.mrf.mxu0  ;;  %v1088_v60 = vadd.f32 %v1087_v27, %v1086_v25  ;;  %v703_v17 = vmul.f32 %v1499_v2, %v1499_v2  ;;  %v680_v28 = vadd.f32 %v679_v20, %v1499_v2 }
 0x100   :  { %v1089_v31 = vpop.f32.mrf.mxu1 }
 0x101   :  { %v1026_v36 = vpop.f32.mrf.mxu0  ;;  %v1504_v10 = vadd.f32 %v1088_v60, %v1024_v59  ;;  %v718_v32 = vadd.f32 %v717_v24, %v703_v17 }
 0x102   :  { %v1090_v37 = vpop.f32.mrf.mxu1  ;;  %v1027_v3 = vadd.f32 %v1026_v36, %v1025_v30 }
 0x103   :  { %v1028_v39 = vpop.f32.mrf.mxu0  ;;  %v1091_v4 = vadd.f32 %v1090_v37, %v1089_v31  ;;  %v704_v25 = vmul.f32 %v1504_v10, %v1504_v10  ;;  %v681_v35 = vadd.f32 %v680_v28, %v1504_v10 }
 0x104   :  { %v1092_v42 = vpop.f32.mrf.mxu1 }
 0x105   :  { %v1029_v45 = vpop.f32.mrf.mxu0  ;;  %v1509_v18 = vadd.f32 %v1091_v4, %v1027_v3  ;;  %v719_v41 = vadd.f32 %v718_v32, %v704_v25 }
 0x106   :  { %v1093_v48 = vpop.f32.mrf.mxu1  ;;  %v1030_v11 = vadd.f32 %v1029_v45, %v1028_v39 }
 0x107   :  { %v1031_v50 = vpop.f32.mrf.mxu0  ;;  %v1094_v12 = vadd.f32 %v1093_v48, %v1092_v42  ;;  %v705_v33 = vmul.f32 %v1509_v18, %v1509_v18  ;;  %v682_v46 = vadd.f32 %v681_v35, %v1509_v18 }
 0x108   :  { %v1095_v54 = vpop.f32.mrf.mxu1 }
 0x109   :  { %v1032_v57 = vpop.f32.mrf.mxu0  ;;  %v1514_v26 = vadd.f32 %v1094_v12, %v1030_v11  ;;  %v720_v52 = vadd.f32 %v719_v41, %v705_v33 }
 0x10a   :  { %v1096_v61 = vpop.f32.mrf.mxu1  ;;  %v1033_v21 = vadd.f32 %v1032_v57, %v1031_v50 }
 0x10b   :  { %v1034_v0 = vpop.f32.mrf.mxu0  ;;  %v1097_v22 = vadd.f32 %v1096_v61, %v1095_v54  ;;  %v706_v42 = vmul.f32 %v1514_v26, %v1514_v26  ;;  %v683_v54 = vadd.f32 %v682_v46, %v1514_v26 }
 0x10c   :  { %v1098_v5 = vpop.f32.mrf.mxu1 }
 0x10d   :  { %v1035_v8 = vpop.f32.mrf.mxu0  ;;  %v1520_v36 = vadd.f32 %v1097_v22, %v1033_v21  ;;  %v721_v59 = vadd.f32 %v720_v52, %v706_v42 }
 0x10e   :  { %v1099_v13 = vpop.f32.mrf.mxu1  ;;  %v1036_v29 = vadd.f32 %v1035_v8, %v1034_v0 }
 0x10f   :  { %v1037_v15 = vpop.f32.mrf.mxu0  ;;  %v1100_v30 = vadd.f32 %v1099_v13, %v1098_v5  ;;  %v707_v55 = vmul.f32 %v1520_v36, %v1520_v36  ;;  %v684_v62 = vadd.f32 %v683_v54, %v1520_v36 }
 0x110   :  { %v1101_v19 = vpop.f32.mrf.mxu1 }
 0x111   :  { %v1038_v23 = vpop.f32.mrf.mxu0  ;;  %v1525_v47 = vadd.f32 %v1100_v30, %v1036_v29  ;;  %v722_v5 = vadd.f32 %v721_v59, %v707_v55 }
 0x112   :  { %v1102_v27 = vpop.f32.mrf.mxu1  ;;  %v1039_v37 = vadd.f32 %v1038_v23, %v1037_v15 }
 0x113   :  { %v1040_v31 = vpop.f32.mrf.mxu0  ;;  %v1103_v39 = vadd.f32 %v1102_v27, %v1101_v19  ;;  %v708_v63 = vmul.f32 %v1525_v47, %v1525_v47  ;;  %v685_v6 = vadd.f32 %v684_v62, %v1525_v47 }
 0x114   :  { %v1104_v34 = vpop.f32.mrf.mxu1 }
 0x115   :  { %v1041_v40 = vpop.f32.mrf.mxu0  ;;  %v1530_v56 = vadd.f32 %v1103_v39, %v1039_v37  ;;  %v723_v13 = vadd.f32 %v722_v5, %v708_v63  ;;  %v741_v5 = vld [vmem:[%s1631_s2] sm:$0x1] }
 0x116   :  { %v1105_v45 = vpop.f32.mrf.mxu1  ;;  %v1042_v48 = vadd.f32 %v1041_v40, %v1040_v31 }
 0x117   :  { %v1106_v49 = vadd.f32 %v1105_v45, %v1104_v34  ;;  %v1043_v50 = vpop.f32.mrf.mxu0  ;;  %v709_v7 = vmul.f32 %v1530_v56, %v1530_v56  ;;  %v686_v14 = vadd.f32 %v685_v6, %v1530_v56 }
 0x118   :  { %v1107_v53 = vpop.f32.mrf.mxu1 }
 0x119   :  { %v1044_v57 = vpop.f32.mrf.mxu0  ;;  %v1535_v0 = vadd.f32 %v1106_v49, %v1042_v48  ;;  %v724_v20 = vadd.f32 %v723_v13, %v709_v7 }
 0x11a   :  { %v1045_v60 = vadd.f32 %v1044_v57, %v1043_v50  ;;  %v1108_v61 = vpop.f32.mrf.mxu1 }
 0x11b   :  { %v1109_v1 = vadd.f32 %v1108_v61, %v1107_v53  ;;  %v1046_v3 = vpop.f32.mrf.mxu0  ;;  %v710_v15 = vmul.f32 %v1535_v0, %v1535_v0  ;;  %v687_v21 = vadd.f32 %v686_v14, %v1535_v0 }
 0x11c   :  { %v1110_v4 = vpop.f32.mrf.mxu1 }
 0x11d   :  { %v1540_v8 = vadd.f32 %v1109_v1, %v1045_v60  ;;  %v1047_v9 = vpop.f32.mrf.mxu0  ;;  %v725_v28 = vadd.f32 %v724_v20, %v710_v15 }
 0x11e   :  { %v1048_v11 = vadd.f32 %v1047_v9, %v1046_v3  ;;  %v1111_v12 = vpop.f32.mrf.mxu1  ;;  %v765_v3 = vlaneseq }
 0x11f   :  { %v1112_v16 = vadd.f32 %v1111_v12, %v1110_v4  ;;  %v1049_v17 = vpop.f32.mrf.mxu0  ;;  %v711_v22 = vmul.f32 %v1540_v8, %v1540_v8  ;;  %v688_v29 = vadd.f32 %v687_v21, %v1540_v8 }
 0x120   :  { %v1113_v19 = vpop.f32.mrf.mxu1  ;;  %v766_v4 = vshrl.u32 %v765_v3, 7 }
 0x121   :  { %v1548_v23 = vadd.f32 %v1112_v16, %v1048_v11  ;;  %v1050_v24 = vpop.f32.mrf.mxu0  ;;  %v726_v32 = vadd.f32 %v725_v28, %v711_v22  ;;  %v745_v11 = vld [vmem:[%s1632_s3] sm:$0x1] }
 0x122   :  { %v1051_v25 = vadd.f32 %v1050_v24, %v1049_v17  ;;  %v1114_v27 = vpop.f32.mrf.mxu1  ;;  %v767_v9 = vsub.s32 0, %v766_v4 }
 0x123   :  { %v712_v30 = vmul.f32 %v1548_v23, %v1548_v23  ;;  %v1115_v31 = vadd.f32 %v1114_v27, %v1113_v19  ;;  %v689_v33 = vadd.f32 %v688_v29, %v1548_v23 }
 0x125   :  { %v1554_v34 = vadd.f32 %v1115_v31, %v1051_v25  ;;  %v727_v35 = vadd.f32 %v726_v32, %v712_v30 }
 0x127   :  { %v690_v37 = vadd.f32 %v689_v33, %v1554_v34  ;;  %v713_v39 = vmul.f32 %v1554_v34, %v1554_v34 }
 0x129   :  { %v691_v40 = vrot.slane %v690_v37, 4  ;;  %v728_v41 = vadd.f32 %v727_v35, %v713_v39 }
 0x12b   :  { %v692_v42 = vadd.f32 %v691_v40, %v690_v37  ;;  %v729_v45 = vrot.slane %v728_v41, 4 }
 0x12d   :  { %v693_v46 = vrot.slane %v692_v42, 2  ;;  %v730_v48 = vadd.f32 %v729_v45, %v728_v41 }
 0x12f   :  { %v694_v49 = vadd.f32 %v693_v46, %v692_v42  ;;  %v731_v50 = vrot.slane %v730_v48, 2 }
 0x131   :  { %v695_v52 = vrot.slane %v694_v49, 1  ;;  %v732_v53 = vadd.f32 %v731_v50, %v730_v48 }
 0x133   :  { %v696_v54 = vadd.f32 %v695_v52, %v694_v49  ;;  %v733_v55 = vrot.slane %v732_v53, 1 }
 0x135   :  { %v734_v57 = vadd.f32 %v733_v55, %v732_v53  ;;  %v736_v59 = vmul.f32 0.125, %v696_v54 }
 0x137   :  { %v737_v60 = vmul.f32 0.125, %v734_v57  ;;  %v738_v61 = vmul.f32 %v736_v59, %v736_v59 }
 0x139   :  { %v739_v62 = vsub.f32 %v737_v60, %v738_v61 }
 0x13b   :  { %v740_v63 = vmax.f32 %v739_v62, 0.0 }
 0x13d   :  { %v742_v1 = vadd.f32 1e-05, %v740_v63 }
 0x13f   :  { %1196 = vrsqrt.f32 %v742_v1 }
 0x14c   :  { %v1197_v6 = vpop.eup %1196 }
 0x14d   :  { %v744_v7 = vmul.f32 %v1197_v6, %v741_v5 }
 0x14f   :  { %v746_v12 = vmul.f32 %v744_v7, %v736_v59  ;;  %v768_v14 = vrot.slane %v744_v7, %v767_v9 }
 0x151   :  { %v747_v13 = vsub.f32 %v745_v11, %v746_v12  ;;  %v770_v15 = vmul.f32 %v768_v14, %v1481_v43  ;;  %v771_v16 = vmul.f32 %v768_v14, %v1479_v38  ;;  %v772_v17 = vmul.f32 %v768_v14, %v1483_v44 }
 0x152   :  { %v773_v20 = vmul.f32 %v768_v14, %v1487_v51  ;;  %v774_v21 = vmul.f32 %v768_v14, %v1493_v58  ;;  %v775_v27 = vmul.f32 %v768_v14, %v1499_v2  ;;  %v776_v28 = vmul.f32 %v768_v14, %v1504_v10 }
 0x153   :  { %v790_v19 = vrot.slane %v747_v13, %v767_v9  ;;  %v777_v43 = vmul.f32 %v768_v14, %v1509_v18  ;;  %v778_v38 = vmul.f32 %v768_v14, %v1514_v26  ;;  %v779_v32 = vmul.f32 %v768_v14, %v1520_v36 }
 0x154   :  { %v780_v35 = vmul.f32 %v768_v14, %v1525_v47  ;;  %v781_v37 = vmul.f32 %v768_v14, %v1530_v56  ;;  %v782_v10 = vmul.f32 %v768_v14, %v1535_v0  ;;  %v783_v40 = vmul.f32 %v768_v14, %v1540_v8 }
 0x155   :  { %v792_v22 = vadd.f32 %v790_v19, %v770_v15  ;;  %v793_v24 = vadd.f32 %v790_v19, %v771_v16  ;;  %v794_v25 = vadd.f32 %v790_v19, %v772_v17  ;;  %v795_v29 = vadd.f32 %v790_v19, %v773_v20 }
 0x156   :  { %v796_v30 = vadd.f32 %v790_v19, %v774_v21  ;;  %v797_v31 = vadd.f32 %v790_v19, %v775_v27  ;;  %v798_v44 = vadd.f32 %v790_v19, %v776_v28  ;;  %v799_v2 = vadd.f32 %v790_v19, %v777_v43 }
 0x157   :  { %v808_v51 = vsub.f32 0.0, %v792_v22  ;;  %v809_v33 = vsub.f32 0.0, %v793_v24  ;;  %v810_v58 = vsub.f32 0.0, %v794_v25  ;;  %v811_v39 = vsub.f32 0.0, %v795_v29 }
 0x158   :  { %v800_v18 = vadd.f32 %v790_v19, %v778_v38  ;;  %v812_v41 = vsub.f32 0.0, %v796_v30  ;;  %v784_v26 = vmul.f32 %v768_v14, %v1548_v23  ;;  %v801_v42 = vadd.f32 %v790_v19, %v779_v32 }
 0x159   :  { %v813_v45 = vsub.f32 0.0, %v797_v31  ;;  %v814_v36 = vsub.f32 0.0, %v798_v44  ;;  %v802_v46 = vadd.f32 %v790_v19, %v780_v35  ;;  %v824_v48 = vmul.f32 1.442695, %v808_v51 }
 0x15a   :  { %v826_v49 = vmul.f32 1.442695, %v809_v33  ;;  %v828_v50 = vmul.f32 1.442695, %v810_v58  ;;  %v785_v47 = vmul.f32 %v768_v14, %v1554_v34  ;;  %v803_v56 = vadd.f32 %v790_v19, %v781_v37 }
 0x15b   :  { %v815_v52 = vsub.f32 0.0, %v799_v2  ;;  %v830_v53 = vmul.f32 1.442695, %v811_v39  ;;  %v804_v54 = vadd.f32 %v790_v19, %v782_v10  ;;  %v816_v0 = vsub.f32 0.0, %v800_v18 }
 0x15c   :  { %1198 = vpow2.f32 %v824_v48  ;;  %v832_v8 = vmul.f32 1.442695, %v812_v41  ;;  %v805_v55 = vadd.f32 %v790_v19, %v783_v40  ;;  %v817_v57 = vsub.f32 0.0, %v801_v42 }
 0x15d   :  { %1200 = vpow2.f32 %v826_v49  ;;  %v834_v23 = vmul.f32 1.442695, %v813_v45  ;;  %v806_v59 = vadd.f32 %v790_v19, %v784_v26  ;;  %v818_v60 = vsub.f32 0.0, %v802_v46 }
 0x15e   :  { %1202 = vpow2.f32 %v828_v50  ;;  %v836_v61 = vmul.f32 1.442695, %v814_v36  ;;  %v807_v62 = vadd.f32 %v790_v19, %v785_v47  ;;  %v819_v63 = vsub.f32 0.0, %v803_v56 }
 0x15f   :  { %1204 = vpow2.f32 %v830_v53  ;;  %v838_v1 = vmul.f32 1.442695, %v815_v52  ;;  %v820_v34 = vsub.f32 0.0, %v804_v54  ;;  %v840_v3 = vmul.f32 1.442695, %v816_v0 }
 0x160   :  { %1206 = vpow2.f32 %v832_v8  ;;  %v821_v4 = vsub.f32 0.0, %v805_v55  ;;  %v842_v5 = vmul.f32 1.442695, %v817_v57  ;;  %v822_v6 = vsub.f32 0.0, %v806_v59 }
 0x161   :  { %1208 = vpow2.f32 %v834_v23  ;;  %v844_v7 = vmul.f32 1.442695, %v818_v60  ;;  %v823_v9 = vsub.f32 0.0, %v807_v62  ;;  %v846_v11 = vmul.f32 1.442695, %v819_v63 }
 0x162   :  { %1210 = vpow2.f32 %v836_v61  ;;  %v848_v12 = vmul.f32 1.442695, %v820_v34  ;;  %v850_v13 = vmul.f32 1.442695, %v821_v4  ;;  %v852_v14 = vmul.f32 1.442695, %v822_v6 }
 0x163   :  { %1212 = vpow2.f32 %v838_v1  ;;  %v854_v15 = vmul.f32 1.442695, %v823_v9 }
 0x164   :  { %1214 = vpow2.f32 %v840_v3 }
 0x165   :  { %1216 = vpow2.f32 %v842_v5 }
 0x166   :  { %1218 = vpow2.f32 %v844_v7 }
 0x167   :  { %1220 = vpow2.f32 %v846_v11 }
 0x168   :  { %1222 = vpow2.f32 %v848_v12 }
 0x169   :  { %v1199_v16 = vpop.eup %1198  ;;  %1224 = vpow2.f32 %v850_v13 }
 0x16a   :  { %v1201_v17 = vpop.eup %1200  ;;  %1226 = vpow2.f32 %v852_v14  ;;  %v856_v19 = vadd.f32 1.0, %v1199_v16 }
 0x16b   :  { %v1203_v20 = vpop.eup %1202  ;;  %1228 = vpow2.f32 %v854_v15  ;;  %v857_v21 = vadd.f32 1.0, %v1201_v17 }
 0x16c   :  { %v1205_v22 = vpop.eup %1204  ;;  %v858_v24 = vadd.f32 1.0, %v1203_v20  ;;  %1230 = vrcp.f32 %v856_v19 }
 0x16d   :  { %v1207_v25 = vpop.eup %1206  ;;  %v859_v27 = vadd.f32 1.0, %v1205_v22  ;;  %1232 = vrcp.f32 %v857_v21 }
 0x16e   :  { %v1209_v28 = vpop.eup %1208  ;;  %v860_v29 = vadd.f32 1.0, %v1207_v25  ;;  %1234 = vrcp.f32 %v858_v24 }
 0x16f   :  { %v1211_v30 = vpop.eup %1210  ;;  %v861_v43 = vadd.f32 1.0, %v1209_v28  ;;  %1236 = vrcp.f32 %v859_v27 }
 0x170   :  { %v1213_v38 = vpop.eup %1212  ;;  %v862_v31 = vadd.f32 1.0, %v1211_v30  ;;  %1238 = vrcp.f32 %v860_v29 }
 0x171   :  { %v1215_v44 = vpop.eup %1214  ;;  %v863_v32 = vadd.f32 1.0, %v1213_v38  ;;  %1240 = vrcp.f32 %v861_v43 }
 0x172   :  { %v1217_v51 = vpop.eup %1216  ;;  %v864_v33 = vadd.f32 1.0, %v1215_v44  ;;  %1242 = vrcp.f32 %v862_v31 }
 0x173   :  { %v1219_v58 = vpop.eup %1218  ;;  %v865_v35 = vadd.f32 1.0, %v1217_v51  ;;  %1244 = vrcp.f32 %v863_v32 }
 0x174   :  { %v1221_v37 = vpop.eup %1220  ;;  %v866_v2 = vadd.f32 1.0, %v1219_v58  ;;  %1246 = vrcp.f32 %v864_v33 }
 0x175   :  { %v1223_v39 = vpop.eup %1222  ;;  %v867_v10 = vadd.f32 1.0, %v1221_v37  ;;  %1248 = vrcp.f32 %v865_v35 }
 0x176   :  { %v1225_v40 = vpop.eup %1224  ;;  %v868_v18 = vadd.f32 1.0, %v1223_v39  ;;  %1250 = vrcp.f32 %v866_v2 }
 0x177   :  { %v1227_v41 = vpop.eup %1226  ;;  %v869_v26 = vadd.f32 1.0, %v1225_v40  ;;  %1252 = vrcp.f32 %v867_v10 }
 0x178   :  { %v1229_v42 = vpop.eup %1228  ;;  %v870_v45 = vadd.f32 1.0, %v1227_v41  ;;  %1254 = vrcp.f32 %v868_v18 }
 0x179   :  { %v1231_v36 = vpop.eup %1230  ;;  %v871_v46 = vadd.f32 1.0, %v1229_v42  ;;  %1256 = vrcp.f32 %v869_v26 }
 0x17a   :  { %v1233_v48 = vpop.eup %1232  ;;  %1258 = vrcp.f32 %v870_v45  ;;  %904 = vst [vmem:[%s1633_s4] sm:$0xff] %v1231_v36 }
 0x17b   :  { %v1235_v49 = vpop.eup %1234  ;;  %1260 = vrcp.f32 %v871_v46  ;;  %905 = vst [vmem:[%s1633_s4 + $0x8] sm:$0xff] %v1233_v48 }
 0x17c   :  { %v1237_v50 = vpop.eup %1236  ;;  %906 = vst [vmem:[%s1633_s4 + $0x10] sm:$0xff] %v1235_v49 }
 0x17d   :  { %v1239_v47 = vpop.eup %1238  ;;  %907 = vst [vmem:[%s1633_s4 + $0x18] sm:$0xff] %v1237_v50 }
 0x17e   :  { %v1241_v56 = vpop.eup %1240  ;;  %908 = vst [vmem:[%s1633_s4 + $0x20] sm:$0xff] %v1239_v47 }
 0x17f   :  { %v1243_v52 = vpop.eup %1242  ;;  %909 = vst [vmem:[%s1633_s4 + $0x28] sm:$0xff] %v1241_v56 }
 0x180   :  { %v1245_v53 = vpop.eup %1244  ;;  %910 = vst [vmem:[%s1633_s4 + $0x30] sm:$0xff] %v1243_v52 }
 0x181   :  { %v1247_v54 = vpop.eup %1246  ;;  %911 = vst [vmem:[%s1633_s4 + $0x38] sm:$0xff] %v1245_v53 }
 0x182   :  { %v1249_v0 = vpop.eup %1248  ;;  %912 = vst [vmem:[%s1633_s4 + $0x40] sm:$0xff] %v1247_v54 }
 0x183   :  { %v1251_v8 = vpop.eup %1250  ;;  %913 = vst [vmem:[%s1633_s4 + $0x48] sm:$0xff] %v1249_v0 }
 0x184   :  { %v1253_v55 = vpop.eup %1252  ;;  %914 = vst [vmem:[%s1633_s4 + $0x50] sm:$0xff] %v1251_v8 }
 0x185   :  { %v1255_v57 = vpop.eup %1254  ;;  %915 = vst [vmem:[%s1633_s4 + $0x58] sm:$0xff] %v1253_v55 }
 0x186   :  { %v1257_v23 = vpop.eup %1256  ;;  %916 = vst [vmem:[%s1633_s4 + $0x60] sm:$0xff] %v1255_v57 }
 0x187   :  { %v1259_v59 = vpop.eup %1258  ;;  %917 = vst [vmem:[%s1633_s4 + $0x68] sm:$0xff] %v1257_v23 }
 0x188   :  { %v1261_v60 = vpop.eup %1260  ;;  %918 = vst [vmem:[%s1633_s4 + $0x70] sm:$0xff] %v1259_v59 }
 0x189   :  { %919 = vst [vmem:[%s1633_s4 + $0x78] sm:$0xff] %v1261_v60 }

</bundles_post_ra>
